<compile_context>
chip_gen: v6e
topology: v6e:2x2x1
jax: 0.10.0
libtpu: 0.0.40
codegen_flags: <defaults>
</compile_context>

<pallas_src>
import functools

import jax
import jax.numpy as jnp
from jax.experimental import pallas as pl
from jax.experimental.pallas import tpu as pltpu


# ----------------------------------------------------------------------------
# Fused Pallas kernel: conv3x3+ReLU, conv3x3+ReLU, convT(2,2,s=2)
# ----------------------------------------------------------------------------
def _upconv_kernel(xcol_ref, w1_ref, b1_ref, w2_ref, b2_ref, wt_ref, bt_ref,
                   o_ref, y1p_ref, *, H, W, Cout, pad0, s_rows):
    Wp = W + 2
    R = H * Wp                               # flat rows (incl. 2 wrap cols/row)

    # ---- conv1 (+bias, ReLU): one K=9*Cin matmul on wrapper-side im2col ----
    acc = jnp.dot(xcol_ref[0], w1_ref[...], preferred_element_type=jnp.float32)
    y1 = jnp.maximum(acc + b1_ref[...], 0.0)
    # Zero the 2 wrap columns of each flat row (they are conv2's implicit zero
    # padding).  In-kernel iota mask; jnp.where keeps it NaN/garbage-safe.
    col = jax.lax.broadcasted_iota(jnp.int32, (R, Cout), 0) % Wp
    y1 = jnp.where(col < W, y1, 0.0).astype(jnp.bfloat16)

    # ---- stage y1 into the zero-padded bf16 scratch (conv2's halo) ---------
    # Only the head [0, pad0) and tail [pad0+R, s_rows) halos need zeros; the
    # interior is fully overwritten each grid step.
    tail = s_rows - pad0 - R
    y1p_ref[pl.ds(0, pad0), :] = jnp.zeros((pad0, Cout), jnp.bfloat16)
    y1p_ref[pl.ds(pad0 + R, tail), :] = jnp.zeros((tail, Cout), jnp.bfloat16)
    y1p_ref[pl.ds(pad0, R), :] = y1          # pad0 is 16-sublane aligned

    # ---- conv2 (+bias, ReLU): 9 shifted bf16 taps of the padded y1 ---------
    # TODO(synk): at larger H*W, im2col these taps into a (R, 9*Cout) bf16
    # scratch and do a single K=9*Cout matmul instead.
    base = pad0 - Wp - 1
    acc = jnp.zeros((R, Cout), jnp.float32)
    for kh in range(3):
        for kw in range(3):
            t = kh * 3 + kw
            tap = y1p_ref[pl.ds(base + kh * Wp + kw, R), :]
            acc = acc + jnp.dot(tap, w2_ref[pl.ds(t * Cout, Cout), :],
                                preferred_element_type=jnp.float32)
    y2 = jnp.maximum(acc + b2_ref[...], 0.0).astype(jnp.bfloat16)

    # ---- ConvTranspose2d(k=2, s=2): lane-dense (R, 4*Cout) bf16 store ------
    z = jnp.dot(y2, wt_ref[...], preferred_element_type=jnp.float32)
    o_ref[0, :, :] = (z + bt_ref[...]).astype(o_ref.dtype)


def upconv_forward(x_nchw, params):
    B, Cin, H, W = x_nchw.shape
    Cout = params["w1"].shape[0]
    Wp = W + 2
    R = H * Wp                                  # flat rows per image
    Rp = (H + 2) * Wp                           # rows of the zero-padded input
    pad0 = -(-(Wp + 1) // 16) * 16              # 16-aligned start of y1 in scratch
    s_rows = -(-(pad0 + R + Wp + 1) // 16) * 16 # covers the deepest conv2 tap

    # NHWC, zero-pad by 1, flatten (H+2, W+2) into rows; add 2 extra zero rows
    # so the shifted im2col slices for kh=2 stay strictly in bounds.
    x = jnp.transpose(x_nchw, (0, 2, 3, 1))
    xp = jnp.pad(x, ((0, 0), (1, 1), (1, 1), (0, 0))).reshape(B, Rp, Cin)
    xp = jnp.pad(xp, ((0, 0), (0, 2), (0, 0)))
    # Wrapper-side im2col for conv1: (B, R, 9*Cin) bf16 (tiny at these shapes).
    xcol = jnp.concatenate(
        [xp[:, kh * Wp + kw: kh * Wp + kw + R, :]
         for kh in range(3) for kw in range(3)], axis=-1).astype(jnp.bfloat16)

    # Weights as bf16 matmul matrices (f32 accumulation happens in-kernel).
    w1c = jnp.transpose(params["w1"], (2, 3, 1, 0)).reshape(9 * Cin, Cout).astype(jnp.bfloat16)
    w2c = jnp.transpose(params["w2"], (2, 3, 1, 0)).reshape(9 * Cout, Cout).astype(jnp.bfloat16)
    # ConvT weight (C, D, 2, 2) -> (C, (di, dj, d)): 4*Cout = 128-lane store.
    wtm = jnp.transpose(params["wt"], (0, 2, 3, 1)).reshape(Cout, 4 * Cout).astype(jnp.bfloat16)
    b1 = params["b1"][None, :].astype(jnp.float32)
    b2 = params["b2"][None, :].astype(jnp.float32)
    bt4 = jnp.tile(params["bt"], 4)[None, :].astype(jnp.float32)

    kernel = functools.partial(_upconv_kernel, H=H, W=W, Cout=Cout,
                               pad0=pad0, s_rows=s_rows)
    flops = 2 * B * R * Cout * (9 * Cin + 9 * Cout + 4 * Cout)
    bytes_accessed = (B * R * 9 * Cin * 2 + B * R * 4 * Cout * 2
                      + (9 * Cin * Cout + 9 * Cout * Cout + 4 * Cout * Cout) * 2
                      + (2 * Cout + 4 * Cout) * 4)

    z = pl.pallas_call(
        kernel,
        out_shape=jax.ShapeDtypeStruct((B, R, 4 * Cout), jnp.bfloat16),
        grid_spec=pltpu.PrefetchScalarGridSpec(
            num_scalar_prefetch=0,
            grid=(B,),
            in_specs=[
                pl.BlockSpec((1, R, 9 * Cin), lambda b: (b, 0, 0)),   # im2col(x)
                pl.BlockSpec((9 * Cin, Cout), lambda b: (0, 0)),      # conv1 W
                pl.BlockSpec((1, Cout), lambda b: (0, 0)),            # b1
                pl.BlockSpec((9 * Cout, Cout), lambda b: (0, 0)),     # conv2 taps
                pl.BlockSpec((1, Cout), lambda b: (0, 0)),            # b2
                pl.BlockSpec((Cout, 4 * Cout), lambda b: (0, 0)),     # convT W
                pl.BlockSpec((1, 4 * Cout), lambda b: (0, 0)),        # convT bias
            ],
            out_specs=pl.BlockSpec((1, R, 4 * Cout), lambda b: (b, 0, 0)),
            scratch_shapes=[pltpu.VMEM((s_rows, Cout), jnp.bfloat16)],
        ),
        compiler_params=pltpu.CompilerParams(
            dimension_semantics=("parallel",),   # B>=2 -> both v7x TCs busy
            vmem_limit_bytes=32 * 1024 * 1024),
        cost_estimate=pl.CostEstimate(flops=flops, transcendentals=0,
                                      bytes_accessed=bytes_accessed),
    )(xcol, w1c, b1, w2c, b2, wtm, bt4)

    # (B, R, 4*Cout) bf16 -> NCHW f32: split rows into (h, w'), crop the 2
    # wrap columns, interleave the 2x2 sub-pixels.  Done at bf16 (half the
    # relayout bytes), cast to f32 at the end to match the PyTorch module.
    z = z.reshape(B, H, Wp, 2, 2, Cout)[:, :, :W]
    z = jnp.transpose(z, (0, 5, 1, 3, 2, 4))
    return z.reshape(B, Cout, 2 * H, 2 * W).astype(jnp.float32)


# ----------------------------------------------------------------------------
# Params (PyTorch layouts) and pure-JAX references
# ----------------------------------------------------------------------------
def init_params(key, cin=1, cout=32):
    ks = jax.random.split(key, 6)
    return dict(
        # Conv2d weight (Co, Ci, kh, kw); ConvTranspose2d weight (Ci, Co, kh, kw)
        w1=0.20 * jax.random.normal(ks[0], (cout, cin, 3, 3), jnp.float32),
        b1=0.10 * jax.random.normal(ks[1], (cout,), jnp.float32),
        w2=0.05 * jax.random.normal(ks[2], (cout, cout, 3, 3), jnp.float32),
        b2=0.10 * jax.random.normal(ks[3], (cout,), jnp.float32),
        wt=0.10 * jax.random.normal(ks[4], (cout, cout, 2, 2), jnp.float32),
        bt=0.10 * jax.random.normal(ks[5], (cout,), jnp.float32),
    )


def _round_bf16(a):
    return a.astype(jnp.bfloat16).astype(jnp.float32)


def _ref_conv3x3(x, w, b):                     # NCHW, pad=1, stride=1
    B, Ci, H, W = x.shape
    xp = jnp.pad(x, ((0, 0), (0, 0), (1, 1), (1, 1)))
    out = jnp.broadcast_to(b[None, :, None, None],
                           (B, w.shape[0], H, W)).astype(jnp.float32)
    for kh in range(3):
        for kw in range(3):
            out = out + jnp.einsum("bchw,oc->bohw",
                                   xp[:, :, kh:kh + H, kw:kw + W],
                                   w[:, :, kh, kw],
                                   precision=jax.lax.Precision.HIGHEST)
    return out


def _ref_convT2x2(x, w, b):                    # NCHW, kernel 2, stride 2
    B, C, H, W = x.shape
    D = w.shape[1]
    out = jnp.broadcast_to(b[None, :, None, None],
                           (B, D, 2 * H, 2 * W)).astype(jnp.float32)
    for di in range(2):
        for dj in range(2):
            out = out.at[:, :, di::2, dj::2].add(
                jnp.einsum("bchw,cd->bdhw", x, w[:, :, di, dj],
                           precision=jax.lax.Precision.HIGHEST))
    return out


def upconv_reference(x, p, *, bf16_inputs=False):
    """PyTorch-equivalent forward.  With bf16_inputs=True it mirrors the
    kernel's numerics (bf16 matmul operands, f32 accumulation)."""
    rd = _round_bf16 if bf16_inputs else (lambda a: a)
    y = jax.nn.relu(_ref_conv3x3(rd(x), rd(p["w1"]), p["b1"]))
    y = jax.nn.relu(_ref_conv3x3(rd(y), rd(p["w2"]), p["b2"]))
    return _ref_convT2x2(rd(y), rd(p["wt"]), p["bt"])


# ----------------------------------------------------------------------------
if __name__ == "__main__":
    key = jax.random.PRNGKey(0)
    k_x, k_p = jax.random.split(key)

    B, Cin, H, W, Cout = 2, 4, 16, 16, 32
    x = jax.random.normal(k_x, (B, Cin, H, W), jnp.float32)
    params = init_params(k_p, cin=Cin, cout=Cout)

    out = jax.block_until_ready(jax.jit(upconv_forward)(x, params))
    assert out.shape == (B, Cout, 2 * H, 2 * W), out.shape
    assert bool(jnp.all(jnp.isfinite(out)))

    # Check against a reference that mirrors the kernel's numerics (bf16
    # matmul operands + bf16 output store, f32 accumulation) but uses an
    # independent NCHW-conv formulation.
    ref_bf16 = _round_bf16(upconv_reference(x, params, bf16_inputs=True))
    if not jnp.allclose(out, ref_bf16, rtol=3e-2, atol=3e-2):
        err = float(jnp.max(jnp.abs(out - ref_bf16)))
        raise AssertionError(f"Pallas UpConv mismatch vs bf16-matched ref: {err}")

    # Loose sanity check against the pure-f32 PyTorch-equivalent path; the
    # remaining gap is the intended bf16 rounding of operands/output.
    ref_f32 = upconv_reference(x, params, bf16_inputs=False)
    if not jnp.allclose(out, ref_f32, rtol=1e-1, atol=1e-1):
        err = float(jnp.max(jnp.abs(out - ref_f32)))
        raise AssertionError(f"Pallas UpConv mismatch vs f32 reference: {err}")

    print("KERNEL_OK")
</pallas_src>

<mosaic_0001>
module attributes {stable_mosaic.version = 11 : i64} {
  func.func @_upconv_kernel(%arg0: i32, %arg1: memref<1x288x36xbf16, #tpu.memory_space<vmem>>, %arg2: memref<36x32xbf16, #tpu.memory_space<vmem>>, %arg3: memref<1x32xf32, #tpu.memory_space<vmem>>, %arg4: memref<288x32xbf16, #tpu.memory_space<vmem>>, %arg5: memref<1x32xf32, #tpu.memory_space<vmem>>, %arg6: memref<32x128xbf16, #tpu.memory_space<vmem>>, %arg7: memref<1x128xf32, #tpu.memory_space<vmem>>, %arg8: memref<1x288x128xbf16, #tpu.memory_space<vmem>>, %arg9: memref<352x32xbf16, #tpu.memory_space<vmem>>) attributes {dimension_semantics = [#tpu.dimension_semantics<parallel>], iteration_bounds = array<i64: 2>, scalar_prefetch = 0 : i64, scratch_operands = 1 : i64, tpu.core_type = #tpu.core_type<tc>, window_params = [{transform_indices = @transform_0, window_bounds = array<i64: 1, 288, 36>}, {pipeline_mode = #tpu.pipeline_mode<synchronous>, transform_indices = @transform_1, window_bounds = array<i64: 36, 32>}, {pipeline_mode = #tpu.pipeline_mode<synchronous>, transform_indices = @transform_2, window_bounds = array<i64: 1, 32>}, {pipeline_mode = #tpu.pipeline_mode<synchronous>, transform_indices = @transform_3, window_bounds = array<i64: 288, 32>}, {pipeline_mode = #tpu.pipeline_mode<synchronous>, transform_indices = @transform_4, window_bounds = array<i64: 1, 32>}, {pipeline_mode = #tpu.pipeline_mode<synchronous>, transform_indices = @transform_5, window_bounds = array<i64: 32, 128>}, {pipeline_mode = #tpu.pipeline_mode<synchronous>, transform_indices = @transform_6, window_bounds = array<i64: 1, 128>}, {transform_indices = @transform_7, window_bounds = array<i64: 1, 288, 128>}]} {
    %c0 = arith.constant 0 : index
    %c0_0 = arith.constant 0 : index
    %c0_1 = arith.constant 0 : index
    %0 = vector.load %arg1[%c0, %c0_0, %c0_1] : memref<1x288x36xbf16, #tpu.memory_space<vmem>>, vector<1x288x36xbf16>
    %1 = vector.shape_cast %0 : vector<1x288x36xbf16> to vector<288x36xbf16>
    %c0_2 = arith.constant 0 : index
    %c0_3 = arith.constant 0 : index
    %2 = vector.load %arg2[%c0_2, %c0_3] : memref<36x32xbf16, #tpu.memory_space<vmem>>, vector<36x32xbf16>
    %cst = arith.constant dense<0.000000e+00> : vector<288x32xf32>
    %3 = tpu.matmul %1, %2, %cst {dimension_numbers = #tpu.dot_dimension_numbers<[1], [0], [0], [1], [0, 0, 1, 1], [], []>} : vector<288x36xbf16>, vector<36x32xbf16>, vector<288x32xf32> -> vector<288x32xf32>
    %c0_4 = arith.constant 0 : index
    %c0_5 = arith.constant 0 : index
    %4 = vector.load %arg3[%c0_4, %c0_5] : memref<1x32xf32, #tpu.memory_space<vmem>>, vector<1x32xf32>
    %5 = vector.broadcast %4 : vector<1x32xf32> to vector<288x32xf32>
    %6 = arith.addf %3, %5 : vector<288x32xf32>
    %cst_6 = arith.constant 0.000000e+00 : f32
    %7 = vector.broadcast %cst_6 : f32 to vector<288x32xf32>
    %8 = arith.maximumf %6, %7 : vector<288x32xf32>
    %9 = tpu.iota {dimensions = array<i32: 0>} : vector<288x32xi32>
    %c18_i32 = arith.constant 18 : i32
    %c0_i32 = arith.constant 0 : i32
    %10 = arith.cmpi eq, %c18_i32, %c0_i32 : i32
    %c1_i32 = arith.constant 1 : i32
    %11 = arith.select %10, %c1_i32, %c18_i32 : i32
    %12 = vector.broadcast %11 : i32 to vector<288x32xi32>
    %13 = arith.remsi %9, %12 : vector<288x32xi32>
    %c0_i32_7 = arith.constant 0 : i32
    %14 = vector.broadcast %c0_i32_7 : i32 to vector<288x32xi32>
    %15 = arith.cmpi ne, %13, %14 : vector<288x32xi32>
    %c0_i32_8 = arith.constant 0 : i32
    %16 = vector.broadcast %c0_i32_8 : i32 to vector<288x32xi32>
    %17 = arith.cmpi slt, %13, %16 : vector<288x32xi32>
    %c0_i32_9 = arith.constant 0 : i32
    %18 = arith.cmpi slt, %11, %c0_i32_9 : i32
    %19 = vector.broadcast %18 : i1 to vector<288x32xi1>
    %20 = vector.broadcast %19 : vector<288x32xi1> to vector<288x32xi1>
    %21 = arith.xori %17, %20 : vector<288x32xi1>
    %22 = arith.andi %21, %15 : vector<288x32xi1>
    %23 = vector.broadcast %11 : i32 to vector<288x32xi32>
    %24 = arith.addi %13, %23 : vector<288x32xi32>
    %25 = arith.select %22, %24, %13 : vector<288x32xi1>, vector<288x32xi32>
    %c16_i32 = arith.constant 16 : i32
    %26 = vector.broadcast %c16_i32 : i32 to vector<288x32xi32>
    %27 = arith.cmpi slt, %25, %26 : vector<288x32xi32>
    %cst_10 = arith.constant 0.000000e+00 : f32
    %28 = vector.broadcast %cst_10 : f32 to vector<288x32xf32>
    %29 = arith.select %27, %8, %28 : vector<288x32xi1>, vector<288x32xf32>
    %30 = arith.truncf %29 : vector<288x32xf32> to vector<288x32xbf16>
    %cst_11 = arith.constant 0.000000e+00 : bf16
    %31 = vector.broadcast %cst_11 : bf16 to vector<32x32xbf16>
    %c0_12 = arith.constant 0 : index
    %c0_13 = arith.constant 0 : index
    %32 = vector.load %arg9[%c0_12, %c0_13] : memref<352x32xbf16, #tpu.memory_space<vmem>>, vector<32x32xbf16>
    tpu.vector_store %arg9[%c0_12, %c0_13], %31 {strides = array<i32>} : memref<352x32xbf16, #tpu.memory_space<vmem>>, vector<32x32xbf16>,
    %cst_14 = arith.constant 0.000000e+00 : bf16
    %33 = vector.broadcast %cst_14 : bf16 to vector<32x32xbf16>
    %c320 = arith.constant 320 : index
    %c0_15 = arith.constant 0 : index
    %34 = vector.load %arg9[%c320, %c0_15] : memref<352x32xbf16, #tpu.memory_space<vmem>>, vector<32x32xbf16>
    tpu.vector_store %arg9[%c320, %c0_15], %33 {strides = array<i32>} : memref<352x32xbf16, #tpu.memory_space<vmem>>, vector<32x32xbf16>,
    %c32 = arith.constant 32 : index
    %c0_16 = arith.constant 0 : index
    %35 = vector.load %arg9[%c32, %c0_16] : memref<352x32xbf16, #tpu.memory_space<vmem>>, vector<288x32xbf16>
    tpu.vector_store %arg9[%c32, %c0_16], %30 {strides = array<i32>} : memref<352x32xbf16, #tpu.memory_space<vmem>>, vector<288x32xbf16>,
    %cst_17 = arith.constant 0.000000e+00 : f32
    %36 = vector.broadcast %cst_17 : f32 to vector<288x32xf32>
    %c13 = arith.constant 13 : index
    %c0_18 = arith.constant 0 : index
    %37 = vector.load %arg9[%c13, %c0_18] : memref<352x32xbf16, #tpu.memory_space<vmem>>, vector<288x32xbf16>
    %c0_19 = arith.constant 0 : index
    %c0_20 = arith.constant 0 : index
    %38 = vector.load %arg4[%c0_19, %c0_20] : memref<288x32xbf16, #tpu.memory_space<vmem>>, vector<32x32xbf16>
    %cst_21 = arith.constant dense<0.000000e+00> : vector<288x32xf32>
    %39 = tpu.matmul %37, %38, %cst_21 {dimension_numbers = #tpu.dot_dimension_numbers<[1], [0], [0], [1], [0, 0, 1, 1], [], []>} : vector<288x32xbf16>, vector<32x32xbf16>, vector<288x32xf32> -> vector<288x32xf32>
    %40 = arith.addf %36, %39 : vector<288x32xf32>
    %c14 = arith.constant 14 : index
    %c0_22 = arith.constant 0 : index
    %41 = vector.load %arg9[%c14, %c0_22] : memref<352x32xbf16, #tpu.memory_space<vmem>>, vector<288x32xbf16>
    %c32_23 = arith.constant 32 : index
    %c0_24 = arith.constant 0 : index
    %42 = vector.load %arg4[%c32_23, %c0_24] : memref<288x32xbf16, #tpu.memory_space<vmem>>, vector<32x32xbf16>
    %cst_25 = arith.constant dense<0.000000e+00> : vector<288x32xf32>
    %43 = tpu.matmul %41, %42, %cst_25 {dimension_numbers = #tpu.dot_dimension_numbers<[1], [0], [0], [1], [0, 0, 1, 1], [], []>} : vector<288x32xbf16>, vector<32x32xbf16>, vector<288x32xf32> -> vector<288x32xf32>
    %44 = arith.addf %40, %43 : vector<288x32xf32>
    %c15 = arith.constant 15 : index
    %c0_26 = arith.constant 0 : index
    %45 = vector.load %arg9[%c15, %c0_26] : memref<352x32xbf16, #tpu.memory_space<vmem>>, vector<288x32xbf16>
    %c64 = arith.constant 64 : index
    %c0_27 = arith.constant 0 : index
    %46 = vector.load %arg4[%c64, %c0_27] : memref<288x32xbf16, #tpu.memory_space<vmem>>, vector<32x32xbf16>
    %cst_28 = arith.constant dense<0.000000e+00> : vector<288x32xf32>
    %47 = tpu.matmul %45, %46, %cst_28 {dimension_numbers = #tpu.dot_dimension_numbers<[1], [0], [0], [1], [0, 0, 1, 1], [], []>} : vector<288x32xbf16>, vector<32x32xbf16>, vector<288x32xf32> -> vector<288x32xf32>
    %48 = arith.addf %44, %47 : vector<288x32xf32>
    %c31 = arith.constant 31 : index
    %c0_29 = arith.constant 0 : index
    %49 = vector.load %arg9[%c31, %c0_29] : memref<352x32xbf16, #tpu.memory_space<vmem>>, vector<288x32xbf16>
    %c96 = arith.constant 96 : index
    %c0_30 = arith.constant 0 : index
    %50 = vector.load %arg4[%c96, %c0_30] : memref<288x32xbf16, #tpu.memory_space<vmem>>, vector<32x32xbf16>
    %cst_31 = arith.constant dense<0.000000e+00> : vector<288x32xf32>
    %51 = tpu.matmul %49, %50, %cst_31 {dimension_numbers = #tpu.dot_dimension_numbers<[1], [0], [0], [1], [0, 0, 1, 1], [], []>} : vector<288x32xbf16>, vector<32x32xbf16>, vector<288x32xf32> -> vector<288x32xf32>
    %52 = arith.addf %48, %51 : vector<288x32xf32>
    %c32_32 = arith.constant 32 : index
    %c0_33 = arith.constant 0 : index
    %53 = vector.load %arg9[%c32_32, %c0_33] : memref<352x32xbf16, #tpu.memory_space<vmem>>, vector<288x32xbf16>
    %c128 = arith.constant 128 : index
    %c0_34 = arith.constant 0 : index
    %54 = vector.load %arg4[%c128, %c0_34] : memref<288x32xbf16, #tpu.memory_space<vmem>>, vector<32x32xbf16>
    %cst_35 = arith.constant dense<0.000000e+00> : vector<288x32xf32>
    %55 = tpu.matmul %53, %54, %cst_35 {dimension_numbers = #tpu.dot_dimension_numbers<[1], [0], [0], [1], [0, 0, 1, 1], [], []>} : vector<288x32xbf16>, vector<32x32xbf16>, vector<288x32xf32> -> vector<288x32xf32>
    %56 = arith.addf %52, %55 : vector<288x32xf32>
    %c33 = arith.constant 33 : index
    %c0_36 = arith.constant 0 : index
    %57 = vector.load %arg9[%c33, %c0_36] : memref<352x32xbf16, #tpu.memory_space<vmem>>, vector<288x32xbf16>
    %c160 = arith.constant 160 : index
    %c0_37 = arith.constant 0 : index
    %58 = vector.load %arg4[%c160, %c0_37] : memref<288x32xbf16, #tpu.memory_space<vmem>>, vector<32x32xbf16>
    %cst_38 = arith.constant dense<0.000000e+00> : vector<288x32xf32>
    %59 = tpu.matmul %57, %58, %cst_38 {dimension_numbers = #tpu.dot_dimension_numbers<[1], [0], [0], [1], [0, 0, 1, 1], [], []>} : vector<288x32xbf16>, vector<32x32xbf16>, vector<288x32xf32> -> vector<288x32xf32>
    %60 = arith.addf %56, %59 : vector<288x32xf32>
    %c49 = arith.constant 49 : index
    %c0_39 = arith.constant 0 : index
    %61 = vector.load %arg9[%c49, %c0_39] : memref<352x32xbf16, #tpu.memory_space<vmem>>, vector<288x32xbf16>
    %c192 = arith.constant 192 : index
    %c0_40 = arith.constant 0 : index
    %62 = vector.load %arg4[%c192, %c0_40] : memref<288x32xbf16, #tpu.memory_space<vmem>>, vector<32x32xbf16>
    %cst_41 = arith.constant dense<0.000000e+00> : vector<288x32xf32>
    %63 = tpu.matmul %61, %62, %cst_41 {dimension_numbers = #tpu.dot_dimension_numbers<[1], [0], [0], [1], [0, 0, 1, 1], [], []>} : vector<288x32xbf16>, vector<32x32xbf16>, vector<288x32xf32> -> vector<288x32xf32>
    %64 = arith.addf %60, %63 : vector<288x32xf32>
    %c50 = arith.constant 50 : index
    %c0_42 = arith.constant 0 : index
    %65 = vector.load %arg9[%c50, %c0_42] : memref<352x32xbf16, #tpu.memory_space<vmem>>, vector<288x32xbf16>
    %c224 = arith.constant 224 : index
    %c0_43 = arith.constant 0 : index
    %66 = vector.load %arg4[%c224, %c0_43] : memref<288x32xbf16, #tpu.memory_space<vmem>>, vector<32x32xbf16>
    %cst_44 = arith.constant dense<0.000000e+00> : vector<288x32xf32>
    %67 = tpu.matmul %65, %66, %cst_44 {dimension_numbers = #tpu.dot_dimension_numbers<[1], [0], [0], [1], [0, 0, 1, 1], [], []>} : vector<288x32xbf16>, vector<32x32xbf16>, vector<288x32xf32> -> vector<288x32xf32>
    %68 = arith.addf %64, %67 : vector<288x32xf32>
    %c51 = arith.constant 51 : index
    %c0_45 = arith.constant 0 : index
    %69 = vector.load %arg9[%c51, %c0_45] : memref<352x32xbf16, #tpu.memory_space<vmem>>, vector<288x32xbf16>
    %c256 = arith.constant 256 : index
    %c0_46 = arith.constant 0 : index
    %70 = vector.load %arg4[%c256, %c0_46] : memref<288x32xbf16, #tpu.memory_space<vmem>>, vector<32x32xbf16>
    %cst_47 = arith.constant dense<0.000000e+00> : vector<288x32xf32>
    %71 = tpu.matmul %69, %70, %cst_47 {dimension_numbers = #tpu.dot_dimension_numbers<[1], [0], [0], [1], [0, 0, 1, 1], [], []>} : vector<288x32xbf16>, vector<32x32xbf16>, vector<288x32xf32> -> vector<288x32xf32>
    %72 = arith.addf %68, %71 : vector<288x32xf32>
    %c0_48 = arith.constant 0 : index
    %c0_49 = arith.constant 0 : index
    %73 = vector.load %arg5[%c0_48, %c0_49] : memref<1x32xf32, #tpu.memory_space<vmem>>, vector<1x32xf32>
    %74 = vector.broadcast %73 : vector<1x32xf32> to vector<288x32xf32>
    %75 = arith.addf %72, %74 : vector<288x32xf32>
    %cst_50 = arith.constant 0.000000e+00 : f32
    %76 = vector.broadcast %cst_50 : f32 to vector<288x32xf32>
    %77 = arith.maximumf %75, %76 : vector<288x32xf32>
    %78 = arith.truncf %77 : vector<288x32xf32> to vector<288x32xbf16>
    %c0_51 = arith.constant 0 : index
    %c0_52 = arith.constant 0 : index
    %79 = vector.load %arg6[%c0_51, %c0_52] : memref<32x128xbf16, #tpu.memory_space<vmem>>, vector<32x128xbf16>
    %cst_53 = arith.constant dense<0.000000e+00> : vector<288x128xf32>
    %80 = tpu.matmul %78, %79, %cst_53 {dimension_numbers = #tpu.dot_dimension_numbers<[1], [0], [0], [1], [0, 0, 1, 1], [], []>} : vector<288x32xbf16>, vector<32x128xbf16>, vector<288x128xf32> -> vector<288x128xf32>
    %c0_54 = arith.constant 0 : index
    %c0_55 = arith.constant 0 : index
    %81 = vector.load %arg7[%c0_54, %c0_55] : memref<1x128xf32, #tpu.memory_space<vmem>>, vector<1x128xf32>
    %82 = vector.broadcast %81 : vector<1x128xf32> to vector<288x128xf32>
    %83 = arith.addf %80, %82 : vector<288x128xf32>
    %84 = arith.truncf %83 : vector<288x128xf32> to vector<288x128xbf16>
    %c0_56 = arith.constant 0 : index
    %c0_57 = arith.constant 0 : index
    %c0_58 = arith.constant 0 : index
    %85 = vector.load %arg8[%c0_56, %c0_57, %c0_58] : memref<1x288x128xbf16, #tpu.memory_space<vmem>>, vector<1x288x128xbf16>
    %86 = vector.shape_cast %85 : vector<1x288x128xbf16> to vector<288x128xbf16>
    %87 = vector.shape_cast %84 : vector<288x128xbf16> to vector<1x288x128xbf16>
    tpu.vector_store %arg8[%c0_56, %c0_57, %c0_58], %87 {strides = array<i32>} : memref<1x288x128xbf16, #tpu.memory_space<vmem>>, vector<1x288x128xbf16>,
    return
  }
  func.func @transform_0(%arg0: i32) -> (i32, i32, i32) {
    %c0_i32 = arith.constant 0 : i32
    %c0_i32_0 = arith.constant 0 : i32
    %c0_i32_1 = arith.constant 0 : i32
    return %arg0, %c0_i32, %c0_i32_0 : i32, i32, i32
  }
  func.func @transform_1(%arg0: i32) -> (i32, i32) {
    %c0_i32 = arith.constant 0 : i32
    %c0_i32_0 = arith.constant 0 : i32
    %c0_i32_1 = arith.constant 0 : i32
    return %c0_i32, %c0_i32_0 : i32, i32
  }
  func.func @transform_2(%arg0: i32) -> (i32, i32) {
    %c0_i32 = arith.constant 0 : i32
    %c0_i32_0 = arith.constant 0 : i32
    %c0_i32_1 = arith.constant 0 : i32
    return %c0_i32, %c0_i32_0 : i32, i32
  }
  func.func @transform_3(%arg0: i32) -> (i32, i32) {
    %c0_i32 = arith.constant 0 : i32
    %c0_i32_0 = arith.constant 0 : i32
    %c0_i32_1 = arith.constant 0 : i32
    return %c0_i32, %c0_i32_0 : i32, i32
  }
  func.func @transform_4(%arg0: i32) -> (i32, i32) {
    %c0_i32 = arith.constant 0 : i32
    %c0_i32_0 = arith.constant 0 : i32
    %c0_i32_1 = arith.constant 0 : i32
    return %c0_i32, %c0_i32_0 : i32, i32
  }
  func.func @transform_5(%arg0: i32) -> (i32, i32) {
    %c0_i32 = arith.constant 0 : i32
    %c0_i32_0 = arith.constant 0 : i32
    %c0_i32_1 = arith.constant 0 : i32
    return %c0_i32, %c0_i32_0 : i32, i32
  }
  func.func @transform_6(%arg0: i32) -> (i32, i32) {
    %c0_i32 = arith.constant 0 : i32
    %c0_i32_0 = arith.constant 0 : i32
    %c0_i32_1 = arith.constant 0 : i32
    return %c0_i32, %c0_i32_0 : i32, i32
  }
  func.func @transform_7(%arg0: i32) -> (i32, i32, i32) {
    %c0_i32 = arith.constant 0 : i32
    %c0_i32_0 = arith.constant 0 : i32
    %c0_i32_1 = arith.constant 0 : i32
    return %arg0, %c0_i32, %c0_i32_0 : i32, i32, i32
  }
}

</mosaic_0001>

<bundles_post_ra>
// kernel: tile.8
= control target key start
LH: loop header
LB: loop body
LE: loop exit
PB: predicated region body
PF: predicated region fallthrough
CT: control target
= control target key end

     0   :  { %s22_s0 = inlined_call_operand.vmem [shape: f32[32], index: 0, kind: input, shape index: {}]   ;;  %s23_s1 = inlined_call_operand.vmem [shape: f32[4,32], index: 1, kind: output, shape index: {}]  }
   0x1   :  { %v4_v0 = vld [vmem:[%s22_s0] ss:$0 sm:$0xff] }
   0x2   :  { %5 = vst [vmem:[%s23_s1] sm:$0xf] %v4_v0 }

// kernel: tile.9
= control target key start
LH: loop header
LB: loop body
LE: loop exit
PB: predicated region body
PF: predicated region fallthrough
CT: control target
= control target key end

     0   :  { %vm8_vm0 = vcmask 261120   ;;  %s40_s8 = smov 32   ;;  %s41_s9 = smov 64   ;;  %vm14_vm1 = vcmask 1048320   ;;  %vm20_vm2 = vcmask 785920   ;;  %vm26_vm3 = vcmask 523520   ;;  %s58_s0 = inlined_call_operand.vmem [shape: f32[4,32], index: 0, kind: input, shape index: {}]   ;;  %s59_s1 = inlined_call_operand.vmem [shape: f32[1,128], index: 1, kind: output, shape index: {}]  }
   0x1   :  { %v5_v0 = vld [vmem:[%s58_s0] sm:$0xf]  ;;  %s39_s0 = smov 96  }
   0x2   :  { %6 = vst [vmem:[#allocation1] sm:$0xf] %v5_v0 }
   0x9   :  { %v11_v1 = vld [vmem:[#allocation1 + $0x3] sm:$0x1]   ;;  %v23_v2 = vld [vmem:[#allocation1 + $0x1] sm:$0x1]   ;;  %v7_v3 = vld [vmem:[#allocation1] sm:$0x1]  }
   0xa   :  { %12 = vrot.lane.b32.xlu0 %v11_v1, %s39_s0  ;;  %24 = vrot.lane.b32.xlu1 %v23_v2, %s40_s8  ;;  %v17_v4 = vld [vmem:[#allocation1 + $0x2] sm:$0x1]   ;;  %9 = vst.msk [vmem:[#allocation0] sm:$0x1] %vm8_vm0, %v7_v3  }
   0xe   :  { %18 = vrot.lane.b32.xlu0 %v17_v4, %s41_s9 }
  0x7c   :  { %v13_v5 = vpop.permute.xlu0 %12   ;;  %v25_v6 = vpop.permute.xlu1 %24  }
  0x7d   :  { %15 = vst.msk [vmem:[#allocation0] sm:$0x1] %vm14_vm1, %v13_v5  }
  0x80   :  { %v19_v7 = vpop.permute.xlu0 %18  }
  0x81   :  { %21 = vst.msk [vmem:[#allocation0] sm:$0x1] %vm20_vm2, %v19_v7  }
  0x82   :  { %27 = vst.msk [vmem:[#allocation0] sm:$0x1] %vm26_vm3, %v25_v6  }
  0x89   :  { %v32_v8 = vld [vmem:[#allocation0] sm:$0x1] }
  0x8a   :  { %35 = vst [vmem:[%s59_s1] sm:$0x1] %v32_v8 }

// kernel: upconv_forward.1
= control target key start
LH: loop header
LB: loop body
LE: loop exit
PB: predicated region body
PF: predicated region fallthrough
CT: control target
= control target key end

     0   :  { %s7625_s24 = smov 0   ;;  %s11262_s0 = inlined_call_operand.vmem [shape: bf16[2,288,36], index: 0, kind: input, shape index: {}]   ;;  %s11263_s1 = inlined_call_operand.vmem [shape: bf16[36,32], index: 1, kind: input, shape index: {}]   ;;  %s11264_s2 = inlined_call_operand.vmem [shape: f32[1,32], index: 2, kind: input, shape index: {}]   ;;  %s11265_s3 = inlined_call_operand.vmem [shape: bf16[288,32], index: 3, kind: input, shape index: {}]   ;;  %s11266_s4 = inlined_call_operand.vmem [shape: f32[1,32], index: 4, kind: input, shape index: {}]   ;;  %s11267_s5 = inlined_call_operand.vmem [shape: bf16[32,128], index: 5, kind: input, shape index: {}]   ;;  %s11268_s6 = inlined_call_operand.vmem [shape: f32[1,128], index: 6, kind: input, shape index: {}]   ;;  %s11269_s7 = inlined_call_operand.vmem [shape: bf16[2,288,128], index: 7, kind: output, shape index: {}]  }
   0x1 LB: > { %s6081_s25 = sadd.s32 4294967295, %s7582_s24   ;;  %p6085_p0 = scmp.ge.s32.totalorder %s7582_s24, 1  ;;  %s7582_s24 = sphi %s7625_s24, %s17_s24  }
   0x2   : > { %p237_p1 = scmp.lt.s32.totalorder %s7582_s24, 3 }
   0x4   : > { %p238_p2 = pnand %p6085_p0, %p237_p1 }
   0x6   : > { %241 = sbr.rel (%p238_p2) target bundleno = 1034 (0x40a), region = 48 }
   0xb   : > { %v7431_v0 = vld [vmem:[%s11263_s1 + $0x10] ss:$0 sps:$4 sm:$0x33]   ;;  %vm488_vm0 = vcmask 1041408   ;;  %v7432_v1 = vld [vmem:[%s11263_s1 + $0x8] sm:$0xff]   ;;  %p269_p3 = scmp.lt.s32.totalorder %s6081_s25, 1  ;;  %v705_v25 = vlaneseq }
   0xc   : > { %7348 = vmatprep.subr.msk.bf16.mxu0 %vm488_vm0, %v7431_v0  ;;  %v490_v2 = vsel %vm488_vm0, %v7431_v0, 0  ;;  %v7433_v3 = vld [vmem:[%s11263_s1] sm:$0xff]   ;;  %v7452_v4 = vld [vmem:[%s11265_s3 + $0x18] sm:$0xff]   ;;  %vm433_vm1 = vcmask 293888   ;;  %vm11270_vm2 = vcmask 257024   ;;  %v7584_v23 = vmov 0  }
   0xd   : > { %6903 = vmatpush3.bf16.msra.mxu0 %v490_v2  ;;  %s12071_s25 = smov (!%p269_p3, %s6081_s25), 1  ;;  %7344 = vmatprep.subr.bf16.mxu1 %v7452_v4  ;;  %1410 = vst.msk [vmem:[#allocation2 + $0x4] sm:$0xf] %vm11270_vm2, %v7584_v23  ;;  %1411 = vst.msk [vmem:[#allocation2 + $0x8] sm:$0xf] %vm11270_vm2, %v7584_v23  ;;  %v7453_v24 = vld [vmem:[%s11265_s3 + $0x10] sm:$0xff]  }
   0xe   : > { %6904 = vmatprep.subr.bf16.mxu0 %v7432_v1  ;;  %s7349_s11 = smul.u32 144, %s12071_s25  ;;  %7346 = vmatpush3.bf16.msra.mxu1 %v7452_v4  ;;  %1412 = vst.msk [vmem:[#allocation2 + $0xc] sm:$0xf] %vm11270_vm2, %v7584_v23  ;;  %1413 = vst.msk [vmem:[#allocation2 + $0xa0] sm:$0xf] %vm11270_vm2, %v7584_v23  ;;  %v7700_v26 = vshrl.u32 %v705_v25, 7 }
   0xf   : > { %1414 = vst.msk [vmem:[#allocation2 + $0xa4] sm:$0xf] %vm11270_vm2, %v7584_v23  ;;  %1415 = vst.msk [vmem:[#allocation2 + $0xa8] sm:$0xf] %vm11270_vm2, %v7584_v23  ;;  %7345 = vmatprep.subr.bf16.mxu1 %v7453_v24  ;;  %v7718_v36 = vld [vmem:[%s11265_s3 + $0x28] sm:$0xff]  }
  0x10   : > { %s7653_s14 = scalar_lea.vmem %s11262_s0, %s7349_s11  ;;  %v708_v27 = vadd.s32 16, %v7700_v26  ;;  %v709_v30 = vadd.s32 24, %v7700_v26  ;;  %v707_v31 = vadd.s32 8, %v7700_v26  ;;  %11368 = vst [vmem:[#allocation3_spill] sm:$0xff] %v7718_v36  ;;  %v712_v40 = vadd.s32 48, %v7700_v26  ;;  %s11205_s27 = scalar_lea.vmem %s11269_s7, %s7349_s11 }
  0x11   : > { %6905 = vmatpush3.bf16.msra.mxu0 %v7432_v1  ;;  %v7434_v5 = vld [vmem:[%s7653_s14] sm:$0xff]   ;;  %v7435_v6 = vld [vmem:[%s7653_s14 + $0x8] sm:$0xff]   ;;  %v7436_v7 = vld [vmem:[%s7653_s14 + $0x10] sm:$0xff]   ;;  %v7709_v32 = vmul.u32.u64.low 3817748708, %v7700_v26  ;;  %v7710_v33 = vmul.u32.u64.high 3817748708, %v7700_v26, %v7709_v32  ;;  %v7728_v42 = vadd.s32 32, %v7700_v26 }
  0x12   : > { %6906 = vmatprep.subr.bf16.mxu0 %v7433_v3  ;;  %6908 = vmatprep.mubr.msk.bf16.mxu0 %vm433_vm1, %v7434_v5  ;;  %v7437_v8 = vld [vmem:[%s7653_s14 + $0x18] sm:$0xff]   ;;  %v7438_v9 = vld [vmem:[%s7653_s14 + $0x20] sm:$0xff]   ;;  %v7439_v10 = vld [vmem:[%s7653_s14 + $0x28] sm:$0xff]   ;;  %v7703_v28 = vmul.u32.u64.low 3817748708, %v708_v27  ;;  %v7704_v29 = vmul.u32.u64.high 3817748708, %v708_v27, %v7703_v28  ;;  %v7735_v47 = vadd.s32 56, %v7700_v26 }
  0x13   : > { %v7440_v11 = vld [vmem:[%s7653_s14 + $0x30] sm:$0xff]   ;;  %v7441_v12 = vld [vmem:[%s7653_s14 + $0x38] sm:$0xff]   ;;  %v7442_v13 = vld [vmem:[%s7653_s14 + $0x40] sm:$0xff]   ;;  %7347 = vmatpush3.bf16.msra.mxu1 %v7453_v24  ;;  %v7712_v34 = vmul.u32.u64.low 3817748708, %v709_v30  ;;  %v7713_v35 = vmul.u32.u64.high 3817748708, %v709_v30, %v7712_v34  ;;  %v748_v41 = vshrl.u32 %v7710_v33, 4 }
  0x14   : > { %v7443_v14 = vld [vmem:[%s7653_s14 + $0x48] sm:$0xff]   ;;  %v7444_v15 = vld [vmem:[%s7653_s14 + $0x50] sm:$0xff]   ;;  %v7445_v16 = vld [vmem:[%s7653_s14 + $0x58] sm:$0xff]   ;;  %v7720_v37 = vmul.u32.u64.low 3817748708, %v707_v31  ;;  %v7721_v38 = vmul.u32.u64.high 3817748708, %v707_v31, %v7720_v37  ;;  %v770_v39 = vshrl.u32 %v7704_v29, 4 }
  0x15   : > { %6907 = vmatpush3.bf16.msra.mxu0 %v7433_v3  ;;  %v7446_v17 = vld [vmem:[%s7653_s14 + $0x60] sm:$0xff]   ;;  %v7447_v18 = vld [vmem:[%s7653_s14 + $0x68] sm:$0xff]   ;;  %v7448_v19 = vld [vmem:[%s7653_s14 + $0x70] sm:$0xff]   ;;  %v781_v44 = vshrl.u32 %v7713_v35, 4  ;;  %v7731_v45 = vmul.u32.u64.low 3817748708, %v712_v40  ;;  %v7732_v46 = vmul.u32.u64.high 3817748708, %v712_v40, %v7731_v45 }
  0x16   : > { %6944 = vmatprep.subr.bf16.mxu0 %v7452_v4  ;;  %v7449_v20 = vld [vmem:[%s7653_s14 + $0x78] sm:$0xff]   ;;  %v7450_v21 = vld [vmem:[%s7653_s14 + $0x80] sm:$0xff]   ;;  %v7451_v22 = vld [vmem:[%s7653_s14 + $0x88] sm:$0xff]   ;;  %v771_v43 = vmul.u32 18, %v770_v39  ;;  %v7738_v48 = vadd.s32 40, %v7700_v26  ;;  %v759_v49 = vshrl.u32 %v7721_v38, 4 }
  0x17   : > { %v7742_v50 = vadd.s32 80, %v7700_v26  ;;  %v749_v51 = vmul.u32 18, %v748_v41  ;;  %v7745_v52 = vmul.u32.u64.low 3817748708, %v7728_v42  ;;  %v7746_v53 = vmul.u32.u64.high 3817748708, %v7728_v42, %v7745_v52 }
  0x18   : > { %6909 = vmatmul.mubr.msk.bf16.vlgmr.msra.gmra.mxu0 %vm433_vm1, %v7435_v6  ;;  %v7748_v54 = vsub.s32 %v708_v27, %v771_v43  ;;  %v782_v55 = vmul.u32 18, %v781_v44  ;;  %v7751_v56 = vmul.u32.u64.low 3817748708, %v7735_v47  ;;  %v7752_v57 = vmul.u32.u64.high 3817748708, %v7735_v47, %v7751_v56 }
  0x19   : > { %6912 = vmatprep.mubr.msk.bf16.mxu0 %vm433_vm1, %v7436_v7  ;;  %6945 = vmatpush3.bf16.msra.mxu0 %v7452_v4  ;;  %v7755_v58 = vmul.u32.u64.low 3817748708, %v7738_v48  ;;  %v7756_v59 = vmul.u32.u64.high 3817748708, %v7738_v48, %v7755_v58  ;;  %v760_v60 = vmul.u32 18, %v759_v49  ;;  %v7763_v63 = vadd.s32 64, %v7700_v26 }
  0x1a   : > { %6946 = vmatprep.subr.bf16.mxu0 %v7453_v24  ;;  %v7759_v61 = vmul.u32.u64.low 3817748708, %v7742_v50  ;;  %v7760_v62 = vmul.u32.u64.high 3817748708, %v7742_v50, %v7759_v61  ;;  %v7766_v0 = vsub.s32 %v7700_v26, %v749_v51  ;;  %v7768_v1 = vsub.s32 %v709_v30, %v782_v55 }
  0x1b   : > { %v7771_v2 = vadd.s32 88, %v7700_v26  ;;  %vm1140_vm3 = vcmp.ne.s32.totalorder %v7748_v54, 0  ;;  %v814_v3 = vshrl.u32 %v7732_v46, 4  ;;  %vm1176_vm4 = vcmp.lt.s32.totalorder %v7748_v54, 0 }
  0x1c   : > { %v7776_v4 = vsub.s32 %v707_v31, %v760_v60  ;;  %v7779_v5 = vmul.u32.u64.low 3817748708, %v7763_v63  ;;  %v7780_v6 = vmul.u32.u64.high 3817748708, %v7763_v63, %v7779_v5  ;;  %v7783_v7 = vadd.s32 18, %v7748_v54  ;;  %vm7806_vm9 = vmand %vm1176_vm4, %vm1140_vm3 }
  0x1d   : > { %6947 = vmatpush3.bf16.msra.mxu0 %v7453_v24  ;;  %vm1138_vm5 = vcmp.ne.s32.totalorder %v7766_v0, 0  ;;  %vm1174_vm6 = vcmp.lt.s32.totalorder %v7766_v0, 0  ;;  %vm1141_vm7 = vcmp.ne.s32.totalorder %v7768_v1, 0  ;;  %vm1177_vm8 = vcmp.lt.s32.totalorder %v7768_v1, 0 }
  0x1e   : > { %7024 = vmatprep.subr.bf16.mxu0 %v7718_v36  ;;  %vm1139_vm10 = vcmp.ne.s32.totalorder %v7776_v4, 0  ;;  %vm7820_vm11 = vmand %vm1174_vm6, %vm1138_vm5  ;;  %vm1175_vm12 = vcmp.lt.s32.totalorder %v7776_v4, 0  ;;  %v7838_v25 = vadd.s32 112, %v7700_v26  ;;  %v7841_v27 = vadd.s32 18, %v7776_v4 }
  0x1f   : > { %vm7833_vm13 = vmand %vm1177_vm8, %vm1141_vm7  ;;  %v836_v33 = vshrl.u32 %v7780_v6, 4  ;;  %v7871_v43 = vadd.s32 96, %v7700_v26  ;;  %v7902_v56 = vadd.s32 104, %v7700_v26  ;;  %v7922_v58 = vadd.s32 144, %v7700_v26 }
  0x20   : > { %6913 = vmatmul.mubr.msk.bf16.gmra.mxu0 %vm433_vm1, %v7437_v8  ;;  %v792_v8 = vshrl.u32 %v7746_v53, 4  ;;  %vm7845_vm14 = vmand %vm1175_vm12, %vm1139_vm10  ;;  %v8100_v34 = vadd.s32 184, %v7700_v26 }
  0x21   : > { %6916 = vmatprep.mubr.msk.bf16.mxu0 %vm433_vm1, %v7438_v9  ;;  %v7788_v9 = vadd.s32 72, %v7700_v26  ;;  %v837_v51 = vmul.u32 18, %v836_v33  ;;  %v7898_v53 = vmul.u32.u64.low 3817748708, %v7871_v43  ;;  %v7899_v55 = vmul.u32.u64.high 3817748708, %v7871_v43, %v7898_v53  ;;  %v1620_v33 = vld [vmem:[#allocation2 + $0x4] sm:$0x8] }
  0x28   : > { %6917 = vmatmul.mubr.msk.bf16.gmra.mxu0 %vm433_vm1, %v7439_v10  ;;  %v7466_v10 = vld [vmem:[%s11265_s3 + $0x8] sm:$0xff]  }
  0x29   : > { %6920 = vmatprep.mubr.msk.bf16.mxu0 %vm433_vm1, %v7440_v11  ;;  %6984 = vmatprep.subr.bf16.mxu1 %v7466_v10 }
  0x30   : > { %6921 = vmatmul.mubr.msk.bf16.gmra.mxu0 %vm433_vm1, %v7441_v12  ;;  %v7796_v11 = vmul.u32.u64.low 3817748708, %v7771_v2  ;;  %v7797_v12 = vmul.u32.u64.high 3817748708, %v7771_v2, %v7796_v11 }
  0x31   : > { %6924 = vmatprep.mubr.msk.bf16.mxu0 %vm433_vm1, %v7442_v13  ;;  %v815_v13 = vmul.u32 18, %v814_v3  ;;  %v11382_v3 = vmov 0 }
  0x32   : > { %v869_v39 = vshrl.u32 %v7797_v12, 4 }
  0x33   : > { %v7843_v28 = vsub.s32 %v712_v40, %v815_v13  ;;  %v7867_v40 = vmul.u32.u64.low 3817748708, %v7838_v25  ;;  %v7868_v41 = vmul.u32.u64.high 3817748708, %v7838_v25, %v7867_v40 }
  0x34   : > { %v880_v40 = vshrl.u32 %v7899_v55, 4  ;;  %v11395_v55 = vmov 0 }
  0x35   : > { %vm1144_vm15 = vcmp.ne.s32.totalorder %v7843_v28, 0  ;;  %vm1180_vm0 = vcmp.lt.s32.totalorder %v7843_v28, 0  ;;  %v7886_v46 = vadd.s32 18, %v7843_v28  ;;  %v902_v5 = vshrl.u32 %v7868_v41, 4 }
  0x36   : > { %vm7912_vm8 = vmand %vm1180_vm0, %vm1144_vm15  ;;  %v881_v53 = vmul.u32 18, %v880_v40  ;;  %v8060_v41 = vadd.s32 176, %v7700_v26 }
  0x38   : > { %6925 = vmatmul.mubr.msk.bf16.gmra.mxu0 %vm433_vm1, %v7443_v14  ;;  %v825_v14 = vshrl.u32 %v7752_v57, 4  ;;  %v7919_v57 = vsub.s32 %v7763_v63, %v837_v51  ;;  %v8014_v51 = vadd.s32 152, %v7700_v26 }
  0x39   : > { %6928 = vmatprep.mubr.msk.bf16.mxu0 %vm433_vm1, %v7444_v15  ;;  %v803_v15 = vshrl.u32 %v7756_v59, 4 }
  0x3a   : > { %v826_v29 = vmul.u32 18, %v825_v14  ;;  %11381 = vst [vmem:[#allocation6_spill] sm:$0xff] %v7919_v57  ;;  %v11387_v14 = vmov 0 }
  0x3b   : > { %v804_v30 = vmul.u32 18, %v803_v15 }
  0x3c   : > { %v7879_v45 = vsub.s32 %v7735_v47, %v826_v29  ;;  %v7895_v47 = vadd.s32 120, %v7700_v26  ;;  %v7996_v29 = vld [vmem:[#allocation2 + $0x8] sm:$0xf] }
  0x3d   : > { %11394 = vst [vmem:[#allocation11_spill] sm:$0xff] %v7996_v29 }
  0x3e   : > { %vm1145_vm4 = vcmp.ne.s32.totalorder %v7879_v45, 0  ;;  %vm1181_vm5 = vcmp.lt.s32.totalorder %v7879_v45, 0  ;;  %v7925_v60 = vmul.u32.u64.low 3817748708, %v7895_v47  ;;  %v7926_v61 = vmul.u32.u64.high 3817748708, %v7895_v47, %v7925_v60 }
  0x3f   : > { %vm7958_vm0 = vmand %vm1181_vm5, %vm1145_vm4  ;;  %v7963_v12 = vadd.s32 18, %v7879_v45  ;;  %vm1182_vm5 = vcmp.lt.s32.totalorder %v7919_v57, 0 }
  0x40   : > { %6929 = vmatmul.mubr.msk.bf16.gmra.mxu0 %vm433_vm1, %v7445_v16 }
  0x41   : > { %6932 = vmatprep.mubr.msk.bf16.mxu0 %vm433_vm1, %v7446_v17  ;;  %v7811_v17 = vadd.s32 18, %v7766_v0 }
  0x48   : > { %6933 = vmatmul.mubr.msk.bf16.gmra.mxu0 %vm433_vm1, %v7447_v18  ;;  %v7814_v18 = vadd.s32 18, %v7768_v1 }
  0x49   : > { %6936 = vmatprep.mubr.msk.bf16.mxu0 %vm433_vm1, %v7448_v19  ;;  %v858_v19 = vshrl.u32 %v7760_v62, 4  ;;  %v7929_v62 = vadd.s32 128, %v7700_v26 }
  0x4b   : > { %v859_v32 = vmul.u32 18, %v858_v19 }
  0x4d   : > { %v7889_v49 = vsub.s32 %v7742_v50, %v859_v32  ;;  %v11379_v50 = vmov 0 }
  0x4e   : > { %v11380_v50 = vsel %vm7912_vm8, 4294967295, %v11379_v50 }
  0x4f   : > { %11378 = vst [vmem:[#allocation5_spill] sm:$0xff] %v7889_v49  ;;  %vm1148_vm10 = vcmp.ne.s32.totalorder %v7889_v49, 0  ;;  %vm1184_vm12 = vcmp.lt.s32.totalorder %v7889_v49, 0  ;;  %v7977_v15 = vadd.s32 18, %v7889_v49 }
  0x50   : > { %6937 = vmatmul.mubr.msk.bf16.gmra.mxu0 %vm433_vm1, %v7449_v20  ;;  %vm7988_vm4 = vmand %vm1184_vm12, %vm1148_vm10 }
  0x51   : > { %6940 = vmatprep.mubr.msk.bf16.mxu0 %vm433_vm1, %v7450_v21  ;;  %v793_v21 = vmul.u32 18, %v792_v8  ;;  %v7944_v6 = vmul.u32.u64.low 3817748708, %v7902_v56  ;;  %v7945_v8 = vmul.u32.u64.high 3817748708, %v7902_v56, %v7944_v6  ;;  %11389 = vst [vmem:[#allocation8_spill] sm:$0xff] %v7977_v15 }
  0x52   : > { %v8052_v6 = vcombine.low %v1620_v33, %v7996_v29  ;;  %v8080_v33 = vadd.s32 160, %v7700_v26 }
  0x53   : > { %v7863_v38 = vsub.s32 %v7728_v42, %v793_v21  ;;  %v7882_v42 = vsub.s32 %v7738_v48, %v804_v30  ;;  %v870_v48 = vmul.u32 18, %v869_v39  ;;  %v903_v39 = vmul.u32 18, %v902_v5 }
  0x54   : > { %v7981_v19 = vmul.u32.u64.low 3817748708, %v7922_v58  ;;  %v7982_v21 = vmul.u32.u64.high 3817748708, %v7922_v58, %v7981_v19  ;;  %v7999_v30 = vmul.u32.u64.low 3817748708, %v7929_v62  ;;  %v8000_v32 = vmul.u32.u64.high 3817748708, %v7929_v62, %v7999_v30 }
  0x55   : > { %11377 = vst [vmem:[#allocation4_spill] sm:$0xff] %v7882_v42  ;;  %vm1178_vm3 = vcmp.lt.s32.totalorder %v7863_v38, 0  ;;  %vm1143_vm6 = vcmp.ne.s32.totalorder %v7882_v42, 0  ;;  %vm1179_vm7 = vcmp.lt.s32.totalorder %v7882_v42, 0  ;;  %v7940_v63 = vsub.s32 %v7771_v2, %v870_v48 }
  0x56   : > { %v7952_v11 = vadd.s32 18, %v7863_v38  ;;  %v11385_v2 = vmov 0  ;;  %v7966_v13 = vadd.s32 18, %v7882_v42  ;;  %v11400_v5 = vmov 0 }
  0x57   : > { %11384 = vst [vmem:[#allocation7_spill] sm:$0xff] %v7940_v63  ;;  %v11386_v2 = vsel %vm7958_vm0, 4294967295, %v11385_v2  ;;  %v8039_v60 = vadd.s32 18, %v7940_v63  ;;  %v913_v19 = vshrl.u32 %v7926_v61, 4  ;;  %v8056_v30 = vsub.s32 %v7838_v25, %v903_v39 }
  0x58   : > { %6941 = vmatmul.mubr.msk.bf16.gmra.mxu0 %vm433_vm1, %v7451_v22  ;;  %v7826_v22 = vmul.u32.u64.low 3817748708, %v7788_v9  ;;  %v7827_v23 = vmul.u32.u64.high 3817748708, %v7788_v9, %v7826_v22  ;;  %vm1142_vm1 = vcmp.ne.s32.totalorder %v7863_v38, 0  ;;  %v891_v48 = vshrl.u32 %v7945_v8, 4 }
  0x59   : > { %vm7935_vm15 = vmand %vm1178_vm3, %vm1142_vm1  ;;  %vm1146_vm3 = vcmp.ne.s32.totalorder %v7919_v57, 0  ;;  %v11390_v22 = vmov 0  ;;  %11399 = vst [vmem:[#allocation14_spill] sm:$0xff] %v8039_v60  ;;  %v946_v8 = vshrl.u32 %v7982_v21, 4  ;;  %v914_v40 = vmul.u32 18, %v913_v19 }
  0x5a   : > { %v847_v52 = vshrl.u32 %v7827_v23, 4  ;;  %v11383_v3 = vsel %vm7935_vm15, 4294967295, %v11382_v3  ;;  %vm7972_vm1 = vmand %vm1179_vm7, %vm1143_vm6  ;;  %v11391_v22 = vsel %vm7988_vm4, 4294967295, %v11390_v22  ;;  %vm1149_vm6 = vcmp.ne.s32.totalorder %v7940_v63, 0  ;;  %11403 = vst [vmem:[#allocation16_spill] sm:$0xff] %v8056_v30 }
  0x5b   : > { %v11388_v14 = vsel %vm7972_vm1, 4294967295, %v11387_v14  ;;  %11392 = vst [vmem:[#allocation9_spill] sm:$0xff] %v11391_v22  ;;  %vm1185_vm7 = vcmp.lt.s32.totalorder %v7940_v63, 0  ;;  %vm8031_vm10 = vmand %vm1182_vm5, %vm1146_vm3  ;;  %v11405_v25 = vmov 0  ;;  %v892_v21 = vmul.u32 18, %v891_v48 }
  0x5c   : > { %v848_v59 = vmul.u32 18, %v847_v52  ;;  %v8017_v52 = vadd.s32 136, %v7700_v26  ;;  %v11396_v55 = vsel %vm8031_vm10, 4294967295, %v11395_v55  ;;  %vm8045_vm12 = vmand %vm1185_vm7, %vm1149_vm6  ;;  %vm1152_vm6 = vcmp.ne.s32.totalorder %v8056_v30, 0 }
  0x5d   : > { %11397 = vst [vmem:[#allocation12_spill] sm:$0xff] %v11396_v55  ;;  %v11401_v5 = vsel %vm8045_vm12, 4294967295, %v11400_v5  ;;  %v8096_v61 = vmul.u32.u64.low 3817748708, %v8060_v41  ;;  %v8097_v35 = vmul.u32.u64.high 3817748708, %v8060_v41, %v8096_v61  ;;  %vm1188_vm7 = vcmp.lt.s32.totalorder %v8056_v30, 0 }
  0x5e   : > { %v7994_v23 = vsub.s32 %v7788_v9, %v848_v59  ;;  %v8036_v59 = vadd.s32 18, %v7919_v57  ;;  %11402 = vst [vmem:[#allocation15_spill] sm:$0xff] %v11401_v5  ;;  %v8063_v9 = vmul.u32.u64.low 3817748708, %v8014_v51  ;;  %v8064_v10 = vmul.u32.u64.high 3817748708, %v8014_v51, %v8063_v9 }
  0x5f   : > { %v8067_v44 = vmul.u32.u64.low 3817748708, %v8017_v52  ;;  %v8068_v37 = vmul.u32.u64.high 3817748708, %v8017_v52, %v8067_v44  ;;  %v924_v9 = vshrl.u32 %v8000_v32, 4  ;;  %v8105_v32 = vsub.s32 %v7871_v43, %v881_v53 }
  0x60   : > { %11393 = vst [vmem:[#allocation10_spill] sm:$0xff] %v7994_v23  ;;  %11398 = vst [vmem:[#allocation13_spill] sm:$0xff] %v8036_v59  ;;  %vm1147_vm2 = vcmp.ne.s32.totalorder %v7994_v23, 0  ;;  %vm1183_vm3 = vcmp.lt.s32.totalorder %v7994_v23, 0  ;;  %v8083_v39 = vadd.s32 18, %v7994_v23  ;;  %v8108_v19 = vadd.s32 168, %v7700_v26 }
  0x61   : > { %vm8091_vm5 = vmand %vm1183_vm3, %vm1147_vm2  ;;  %v947_v44 = vmul.u32 18, %v946_v8  ;;  %v8111_v48 = vmul.u32.u64.low 3817748708, %v8080_v33  ;;  %v8112_v36 = vmul.u32.u64.high 3817748708, %v8080_v33, %v8111_v48  ;;  %v8115_v61 = vadd.s32 208, %v7700_v26 }
  0x62   : > { %11404 = vst [vmem:[#allocation17_spill] sm:$0xff] %v8083_v39  ;;  %v11406_v25 = vsel %vm8091_vm5, 4294967295, %v11405_v25  ;;  %v8122_v60 = vadd.s32 18, %v8056_v30  ;;  %v925_v43 = vmul.u32 18, %v924_v9  ;;  %v8125_v53 = vadd.s32 192, %v7700_v26  ;;  %vm8141_vm2 = vmand %vm1188_vm7, %vm1152_vm6 }
  0x63   : > { %11407 = vst [vmem:[#allocation18_spill] sm:$0xff] %v11406_v25  ;;  %v8128_v8 = vsub.s32 %v7895_v47, %v914_v40  ;;  %v8131_v48 = vsub.s32 %v7902_v56, %v892_v21  ;;  %v8134_v5 = vmul.u32.u64.low 3817748708, %v8100_v34  ;;  %v8135_v57 = vmul.u32.u64.high 3817748708, %v8100_v34, %v8134_v5 }
  0x64   : > { %11408 = vst [vmem:[#allocation19_spill] sm:$0xff] %v8122_v60  ;;  %v11411_v63 = vmov 0  ;;  %v957_v9 = vshrl.u32 %v8064_v10, 4  ;;  %v935_v47 = vshrl.u32 %v8068_v37, 4  ;;  %v8153_v5 = vsub.s32 %v7922_v58, %v947_v44 }
  0x65   : > { %11409 = vst [vmem:[#allocation20_spill] sm:$0xff] %v8128_v8  ;;  %11410 = vst [vmem:[#allocation21_spill] sm:$0xff] %v8131_v48  ;;  %v11412_v63 = vsel %vm8141_vm2, 4294967295, %v11411_v63  ;;  %v8148_v40 = vmul.u32.u64.low 3817748708, %v8108_v19  ;;  %v8149_v56 = vmul.u32.u64.high 3817748708, %v8108_v19, %v8148_v40  ;;  %vm1186_vm6 = vcmp.lt.s32.totalorder %v8105_v32, 0 }
  0x66   : > { %11413 = vst [vmem:[#allocation22_spill] sm:$0xff] %v11412_v63  ;;  %11414 = vst [vmem:[#allocation23_spill] sm:$0xff] %v8153_v5  ;;  %v8156_v21 = vmul.u32.u64.low 3817748708, %v8115_v61  ;;  %v8157_v23 = vmul.u32.u64.high 3817748708, %v8115_v61, %v8156_v21  ;;  %v8161_v39 = vsub.s32 %v7929_v62, %v925_v43  ;;  %vm1189_vm3 = vcmp.lt.s32.totalorder %v8128_v8, 0 }
  0x67   : > { %v8164_v37 = vmul.u32.u64.low 3817748708, %v8125_v53  ;;  %v8165_v10 = vmul.u32.u64.high 3817748708, %v8125_v53, %v8164_v37  ;;  %v990_v58 = vshrl.u32 %v8097_v35, 4  ;;  %vm1151_vm5 = vcmp.ne.s32.totalorder %v8131_v48, 0 }
  0x68   : > { %11415 = vst [vmem:[#allocation24_spill] sm:$0xff] %v8161_v39  ;;  %v958_v62 = vmul.u32 18, %v957_v9  ;;  %v936_v44 = vmul.u32 18, %v935_v47  ;;  %vm11416_vm10 = vcmp.ne.s32.totalorder %v8105_v32, 0  ;;  %v11417_v43 = vmov 0 }
  0x69   : > { %vm8178_vm4 = vmand %vm1186_vm6, %vm11416_vm10  ;;  %v968_v21 = vshrl.u32 %v8112_v36, 4  ;;  %v8186_v35 = vadd.s32 216, %v7700_v26  ;;  %v8189_v37 = vadd.s32 18, %v8105_v32  ;;  %vm11419_vm12 = vcmp.ne.s32.totalorder %v8128_v8, 0 }
  0x6a   : > { %v11418_v43 = vsel %vm8178_vm4, 4294967295, %v11417_v43  ;;  %vm8195_vm10 = vmand %vm1189_vm3, %vm11419_vm12  ;;  %v11420_v9 = vmov 0  ;;  %v8200_v47 = vadd.s32 18, %v8128_v8  ;;  %vm1154_vm6 = vcmp.ne.s32.totalorder %v8161_v39, 0 }
  0x6b   : > { %v11421_v9 = vsel %vm8195_vm10, 4294967295, %v11420_v9  ;;  %vm1190_vm7 = vcmp.lt.s32.totalorder %v8161_v39, 0  ;;  %vm11423_vm2 = vcmp.lt.s32.totalorder %v8131_v48, 0  ;;  %v11424_v36 = vmov 0 }
  0x6c   : > { %11422 = vst [vmem:[#allocation25_spill] sm:$0xff] %v8200_v47  ;;  %vm8208_vm1 = vmand %vm11423_vm2, %vm1151_vm5  ;;  %v8213_v40 = vadd.s32 18, %v8131_v48  ;;  %v8216_v30 = vadd.s32 18, %v8153_v5  ;;  %v991_v60 = vmul.u32 18, %v990_v58  ;;  %v1001_v63 = vshrl.u32 %v8135_v57, 4 }
  0x6d   : > { %v11425_v36 = vsel %vm8208_vm1, 4294967295, %v11424_v36  ;;  %vm11429_vm12 = vcmp.ne.s32.totalorder %v8153_v5, 0  ;;  %vm11430_vm3 = vcmp.lt.s32.totalorder %v8153_v5, 0  ;;  %v11431_v25 = vmov 0  ;;  %vm8237_vm5 = vmand %vm1190_vm7, %vm1154_vm6 }
  0x6e   : > { %11426 = vst [vmem:[#allocation26_spill] sm:$0xff] %v11425_v36  ;;  %11427 = vst [vmem:[#allocation27_spill] sm:$0xff] %v8213_v40  ;;  %v8228_v59 = vadd.s32 18, %v8161_v39  ;;  %v8231_v55 = vsub.s32 %v8014_v51, %v958_v62  ;;  %v8234_v49 = vsub.s32 %v8017_v52, %v936_v44  ;;  %v979_v58 = vshrl.u32 %v8149_v56, 4 }
  0x6f   : > { %11428 = vst [vmem:[#allocation28_spill] sm:$0xff] %v8216_v30  ;;  %vm8223_vm0 = vmand %vm11430_vm3, %vm11429_vm12  ;;  %v11435_v57 = vmov 0  ;;  %v969_v15 = vmul.u32 18, %v968_v21  ;;  %v1034_v22 = vshrl.u32 %v8157_v23, 4  ;;  %v1012_v56 = vshrl.u32 %v8165_v10, 4 }
  0x70   : > { %v11432_v25 = vsel %vm8223_vm0, 4294967295, %v11431_v25  ;;  %11434 = vst [vmem:[#allocation30_spill] sm:$0xff] %v8228_v59  ;;  %v11436_v57 = vsel %vm8237_vm5, 4294967295, %v11435_v57  ;;  %v8243_v29 = vmul.u32.u64.low 3817748708, %v8186_v35  ;;  %v8244_v42 = vmul.u32.u64.high 3817748708, %v8186_v35, %v8243_v29 }
  0x71   : > { %11433 = vst [vmem:[#allocation29_spill] sm:$0xff] %v11432_v25  ;;  %11437 = vst [vmem:[#allocation31_spill] sm:$0xff] %v11436_v57  ;;  %v8256_v62 = vadd.s32 200, %v7700_v26  ;;  %v8267_v44 = vsub.s32 %v8060_v41, %v991_v60  ;;  %v1002_v21 = vmul.u32 18, %v1001_v63  ;;  %vm1157_vm2 = vcmp.ne.s32.totalorder %v8231_v55, 0 }
  0x72   : > { %v980_v52 = vmul.u32 18, %v979_v58  ;;  %v8276_v23 = vadd.s32 18, %v8231_v55  ;;  %v8280_v29 = vsub.s32 %v8080_v33, %v969_v15  ;;  %v1035_v41 = vmul.u32 18, %v1034_v22 }
  0x73   : > { %v1013_v63 = vmul.u32 18, %v1012_v56  ;;  %v8283_v60 = vmul.u32.u64.low 3817748708, %v8256_v62  ;;  %v8284_v51 = vmul.u32.u64.high 3817748708, %v8256_v62, %v8283_v60  ;;  %v8287_v10 = vadd.s32 240, %v7700_v26 }
  0x74   : > { %11438 = vst [vmem:[#allocation32_spill] sm:$0xff] %v8280_v29  ;;  %v8291_v58 = vadd.s32 18, %v8234_v49  ;;  %v8295_v39 = vsub.s32 %v8100_v34, %v1002_v21  ;;  %v8299_v15 = vadd.s32 18, %v8267_v44  ;;  %v8302_v22 = vsub.s32 %v8108_v19, %v980_v52 }
  0x75   : > { %v8305_v33 = vadd.s32 224, %v7700_v26  ;;  %v8310_v56 = vsub.s32 %v8115_v61, %v1035_v41  ;;  %v1045_v34 = vshrl.u32 %v8244_v42, 4  ;;  %vm11440_vm6 = vcmp.lt.s32.totalorder %v8231_v55, 0 }
  0x76   : > { %vm8317_vm3 = vmand %vm11440_vm6, %vm1157_vm2  ;;  %v8322_v19 = vadd.s32 18, %v8280_v29  ;;  %v8325_v52 = vsub.s32 %v8125_v53, %v1013_v63  ;;  %v8328_v60 = vmul.u32.u64.low 3817748708, %v8287_v10  ;;  %v8329_v61 = vmul.u32.u64.high 3817748708, %v8287_v10, %v8328_v60 }
  0x77   : > { %11439 = vst [vmem:[#allocation33_spill] sm:$0xff] %v8310_v56  ;;  %vm11445_vm7 = vcmp.ne.s32.totalorder %v8234_v49, 0  ;;  %vm11446_vm12 = vcmp.lt.s32.totalorder %v8234_v49, 0  ;;  %vm1161_vm2 = vcmp.ne.s32.totalorder %v8295_v39, 0  ;;  %vm1197_vm6 = vcmp.lt.s32.totalorder %v8295_v39, 0 }
  0x78   : > { %11443 = vst [vmem:[#allocation34_spill] sm:$0xff] %v8322_v19  ;;  %11444 = vst [vmem:[#allocation35_spill] sm:$0xff] %v8325_v52  ;;  %v2427_v41 = vshrl.u32 %v8052_v6, 16  ;;  %v2430_v53 = vshll.u32 %v8052_v6, 16  ;;  %vm11449_vm0 = vcmp.ne.s32.totalorder %v8267_v44, 0  ;;  %vm11450_vm1 = vcmp.lt.s32.totalorder %v8267_v44, 0 }
  0x79   : > { %vm8335_vm5 = vmand %vm11446_vm12, %vm11445_vm7  ;;  %vm1195_vm12 = vcmp.lt.s32.totalorder %v8302_v22, 0  ;;  %v8354_v60 = vmul.u32.u64.low 3817748708, %v8305_v33  ;;  %v8355_v59 = vmul.u32.u64.high 3817748708, %v8305_v33, %v8354_v60  ;;  %vm11453_vm4 = vcmp.ne.s32.totalorder %v8280_v29, 0 }
  0x7a   : > { %vm8347_vm10 = vmand %vm11450_vm1, %vm11449_vm0  ;;  %vm11454_vm15 = vcmp.lt.s32.totalorder %v8280_v29, 0  ;;  %v11455_v57 = vmov 0  ;;  %v1046_v5 = vmul.u32 18, %v1045_v34  ;;  %v8368_v30 = vadd.s32 248, %v7700_v26  ;;  %v11515_v29 = vld [vmem:[#allocation8_spill] sm:$0xff] }
  0x7b   : > { %vm8361_vm8 = vmand %vm11454_vm15, %vm11453_vm4  ;;  %v11458_v60 = vsel %vm7806_vm9, %v7783_v7, %v7748_v54  ;;  %v11461_v48 = vmov 0  ;;  %v8384_v40 = vadd.s32 18, %v8295_v39  ;;  %vm1162_vm4 = vcmp.ne.s32.totalorder %v8325_v52, 0 }
  0x7c   : > { %v11456_v57 = vsel %vm8361_vm8, 4294967295, %v11455_v57  ;;  %vm8375_vm7 = vcmp.lt.s32.totalorder %v11458_v60, 16  ;;  %vm8379_vm15 = vmand %vm1197_vm6, %vm1161_vm2  ;;  %vm1198_vm1 = vcmp.lt.s32.totalorder %v8325_v52, 0  ;;  %v1023_v16 = vshrl.u32 %v8284_v51, 4 }
  0x7d   : > { %11457 = vst [vmem:[#allocation36_spill] sm:$0xff] %v11456_v57  ;;  %v11462_v48 = vsel %vm8379_vm15, 4294967295, %v11461_v48  ;;  %vm11463_vm0 = vcmp.ne.s32.totalorder %v8302_v22, 0  ;;  %v11464_v54 = vmov 0  ;;  %v8396_v7 = vadd.s32 18, %v8302_v22 }
  0x7e   : > { %vm8391_vm9 = vmand %vm1195_vm12, %vm11463_vm0  ;;  %v8399_v34 = vadd.s32 18, %v8310_v56  ;;  %v8401_v60 = vrot.slane %v2427_v41, 3  ;;  %v8403_v36 = vrot.slane %v2430_v53, 4  ;;  %v11469_v51 = vsel %vm7820_vm11, %v7811_v17, %v7766_v0  ;;  %v8459_v57 = vld [vmem:[%s11264_s2] ss:$0 sm:$0xff] }
  0x7f   : > { %v11465_v54 = vsel %vm8391_vm9, 4294967295, %v11464_v54  ;;  %vm8410_vm2 = vcmp.lt.s32.totalorder %v11469_v51, 16  ;;  %vm11472_vm11 = vcmp.ne.s32.totalorder %v8310_v56, 0  ;;  %vm11473_vm6 = vcmp.lt.s32.totalorder %v8310_v56, 0  ;;  %vm8445_vm0 = vmand %vm1198_vm1, %vm1162_vm4 }
  0x80   : > { %11466 = vst [vmem:[#allocation37_spill] sm:$0xff] %v8399_v34  ;;  %11467 = vst [vmem:[#allocation38_spill] sm:$0xff] %v8401_v60  ;;  %v11474_v0 = vmov 0  ;;  %v8435_v17 = vadd.s32 18, %v8325_v52  ;;  %v11477_v51 = vmov 0  ;;  %v8450_v20 = vsub.s32 %v8186_v35, %v1046_v5 }
  0x81   : > { %11468 = vst [vmem:[#allocation39_spill] sm:$0xff] %v8403_v36  ;;  %vm8430_vm12 = vmand %vm11473_vm6, %vm11472_vm11  ;;  %v11478_v51 = vsel %vm8445_vm0, 4294967295, %v11477_v51  ;;  %v8453_v41 = vmul.u32.u64.low 3817748708, %v8368_v30  ;;  %v8454_v47 = vmul.u32.u64.high 3817748708, %v8368_v30, %v8453_v41  ;;  %v11480_v53 = vsel %vm7833_vm13, %v7814_v18, %v7768_v1 }
  0x82   : > { %v11475_v0 = vsel %vm8430_vm12, 4294967295, %v11474_v0  ;;  %11476 = vst [vmem:[#allocation40_spill] sm:$0xff] %v8435_v17  ;;  %11479 = vst [vmem:[#allocation41_spill] sm:$0xff] %v11478_v51  ;;  %vm8466_vm1 = vcmp.lt.s32.totalorder %v11480_v53, 16  ;;  %v1024_v35 = vmul.u32 18, %v1023_v16  ;;  %v1078_v41 = vshrl.u32 %v8329_v61, 4 }
  0x83   : > { %v8476_v19 = vadd.s32 232, %v7700_v26  ;;  %v8489_v16 = vadd.s32 272, %v7700_v26  ;;  %v11483_v53 = vsel %vm7845_vm14, %v7841_v27, %v7776_v4  ;;  %v1056_v24 = vshrl.u32 %v8355_v59, 4 }
  0x84   : > { %vm8496_vm13 = vcmp.lt.s32.totalorder %v11483_v53, 16  ;;  %v8506_v1 = vadd.s32 256, %v7700_v26  ;;  %v8509_v60 = vadd.s32 280, %v7700_v26  ;;  %vm1165_vm14 = vcmp.ne.s32.totalorder %v8450_v20, 0  ;;  %v11535_v53 = vld [vmem:[#allocation14_spill] sm:$0xff] }
  0x85   : > { %vm1201_vm4 = vcmp.lt.s32.totalorder %v8450_v20, 0  ;;  %v8515_v4 = vadd.s32 18, %v8450_v20  ;;  %vm11486_vm11 = vnez %v11380_v50  ;;  %v8527_v18 = vsub.s32 %v8256_v62, %v1024_v35  ;;  %v11552_v62 = vld [vmem:[#allocation16_spill] sm:$0xff] }
  0x86   : > { %v11487_v59 = vsel %vm11486_vm11, %v7886_v46, %v7843_v28  ;;  %v8530_v36 = vmul.u32.u64.low 3817748708, %v8476_v19  ;;  %v8531_v52 = vmul.u32.u64.high 3817748708, %v8476_v19, %v8530_v36  ;;  %vm11490_vm11 = vnez %v11383_v3  ;;  %vm8547_vm12 = vmand %vm1201_vm4, %vm1165_vm14 }
  0x87   : > { %vm8522_vm6 = vcmp.lt.s32.totalorder %v11487_v59, 16  ;;  %v8535_v50 = vmul.u32.u64.low 3817748708, %v8489_v16  ;;  %v8536_v56 = vmul.u32.u64.high 3817748708, %v8489_v16, %v8535_v50  ;;  %v11491_v46 = vsel %vm11490_vm11, %v7952_v11, %v7863_v38 }
  0x88   : > { %vm8543_vm0 = vcmp.lt.s32.totalorder %v11491_v46, 16  ;;  %v11494_v35 = vmov 0  ;;  %v1057_v36 = vmul.u32 18, %v1056_v24  ;;  %v1089_v59 = vshrl.u32 %v8454_v47, 4  ;;  %v1579_v50 = vld [vmem:[#allocation2 + $0x4] sm:$0xc] }
  0x89   : > { %v11495_v35 = vsel %vm8547_vm12, 4294967295, %v11494_v35  ;;  %vm11496_vm14 = vnez %v11386_v2  ;;  %vm11512_vm12 = vcmask 257024   ;;  %vm11574_vm8 = vnez %v11421_v9 }
  0x8a   : > { %v11497_v24 = vsel %vm11496_vm14, %v7963_v12, %v7879_v45  ;;  %vm11500_vm14 = vcmask 257024  }
  0x8b   : > { %vm8567_vm4 = vcmp.lt.s32.totalorder %v11497_v24, 16  ;;  %v11516_v24 = vld [vmem:[#allocation5_spill] sm:$0xff] }
  0xd8   : > { %v6910_v61 = vpop.f32.mrf.mxu0 }
  0xd9   : > { %v535_v31 = vadd.f32 %v6910_v61, %v8459_v57  ;;  %v1079_v61 = vmul.u32 18, %v1078_v41 }
  0xda   : > { %v526_v27 = vpop.f32.mrf.mxu0 }
  0xdb   : > { %v671_v17 = vmax.f32 %v535_v31, 0.0  ;;  %v527_v51 = vadd.f32 %v8459_v57, %v526_v27  ;;  %v8552_v41 = vmul.u32.u64.low 3817748708, %v8506_v1  ;;  %v8553_v31 = vmul.u32.u64.high 3817748708, %v8506_v1, %v8552_v41 }
  0xdc   : > { %v6911_v28 = vpop.f32.mrf.mxu0  ;;  %v8556_v27 = vadd.s32 264, %v7700_v26  ;;  %v8574_v26 = vsub.s32 %v8287_v10, %v1079_v61  ;;  %v11502_v10 = vld [vmem:[#allocation4_spill] sm:$0xff]  ;;  %v8597_v61 = vsub.s32 %v8305_v33, %v1057_v36 }
  0xdd   : > { %v1356_v3 = vsel %vm8375_vm7, %v671_v17, 0.0  ;;  %v669_v38 = vmax.f32 %v527_v51, 0.0  ;;  %v538_v11 = vadd.f32 %v6911_v28, %v8459_v57  ;;  %vm11501_vm7 = vnez %v11388_v14  ;;  %v11506_v28 = vld [vmem:[#allocation11_spill] sm:$0xff] }
  0xde   : > { %v6504_v46 = vpack.c.bf16 %v1356_v3, %v1356_v3  ;;  %v529_v34 = vpop.f32.mrf.mxu0  ;;  %v11503_v51 = vsel %vm11501_vm7, %v7966_v13, %v11502_v10  ;;  %v8600_v3 = vcombine.low %v1579_v50, %v11506_v28  ;;  %vm11509_vm7 = vcmp.lt.s32.totalorder %v8527_v18, 0  ;;  %v11513_v50 = vld [vmem:[#allocation9_spill] sm:$0xff] }
  0xdf   : > { %v1354_v25 = vsel %vm8410_vm2, %v669_v38, 0.0  ;;  %v672_v47 = vmax.f32 %v538_v11, 0.0  ;;  %v530_v2 = vadd.f32 %v8459_v57, %v529_v34  ;;  %vm8589_vm11 = vcmp.lt.s32.totalorder %v11503_v51, 16 }
  0xe0   : > { %1545 = vst.msk [vmem:[#allocation2 + $0x18] sm:$0xf] %vm11500_vm14, %v6504_v46  ;;  %v6502_v12 = vpack.c.bf16 %v1354_v25, %v1354_v25  ;;  %v6914_v17 = vpop.f32.mrf.mxu0  ;;  %v8594_v34 = vadd.s32 18, %v8527_v18  ;;  %11507 = vst [vmem:[#allocation4_spill] sm:$0xff] %v8600_v3  ;;  %vm11508_vm2 = vcmp.ne.s32.totalorder %v8527_v18, 0  ;;  %v11510_v13 = vmov 0 }
  0xe1   : > { %v1357_v38 = vsel %vm8466_vm1, %v672_v47, 0.0  ;;  %v670_v14 = vmax.f32 %v530_v2, 0.0  ;;  %v551_v11 = vadd.f32 %v6914_v17, %v8459_v57  ;;  %vm8609_vm14 = vmand %vm11509_vm7, %vm11508_vm2  ;;  %v1090_v46 = vmul.u32 18, %v1089_v59  ;;  %v11549_v3 = vld [vmem:[#allocation22_spill] sm:$0xff] }
  0xe2   : > { %v11511_v13 = vsel %vm8609_vm14, 4294967295, %v11510_v13  ;;  %1543 = vst.msk [vmem:[#allocation2 + $0x10] sm:$0xf] %vm11512_vm12, %v6502_v12  ;;  %v6505_v33 = vpack.c.bf16 %v1357_v38, %v1357_v38  ;;  %v542_v36 = vpop.f32.mrf.mxu0  ;;  %vm11514_vm9 = vnez %v11513_v50  ;;  %vm1168_vm2 = vcmp.ne.s32.totalorder %v8574_v26, 0  ;;  %v11521_v38 = vld [vmem:[#allocation12_spill] sm:$0xff]  ;;  %v11523_v50 = vld [vmem:[#allocation13_spill] sm:$0xff] }
  0xe3   : > { %v11517_v25 = vsel %vm11514_vm9, %v11515_v29, %v11516_v24  ;;  %v1067_v59 = vshrl.u32 %v8531_v52, 4  ;;  %v1355_v2 = vsel %vm8496_vm13, %v670_v14, 0.0  ;;  %v675_v12 = vmax.f32 %v551_v11, 0.0  ;;  %vm11520_vm9 = vmmov %vm11512_vm12  ;;  %v11524_v29 = vld [vmem:[#allocation6_spill] sm:$0xff]  ;;  %v7465_v52 = vld [vmem:[%s11265_s3 + $0x20] sm:$0xff]  }
  0xe4   : > { %vm8619_vm1 = vcmp.lt.s32.totalorder %v11517_v25, 16  ;;  %v543_v17 = vadd.f32 %v8459_v57, %v542_v36  ;;  %v1122_v10 = vshrl.u32 %v8536_v56, 4  ;;  %1546 = vst.msk [vmem:[#allocation2 + $0x1c] sm:$0xf] %vm11520_vm9, %v6505_v33  ;;  %v6503_v51 = vpack.c.bf16 %v1355_v2, %v1355_v2  ;;  %v6915_v28 = vpop.f32.mrf.mxu0 }
  0xe5   : > { %vm11522_vm15 = vnez %v11521_v38  ;;  %v8645_v56 = vadd.s32 18, %v8574_v26  ;;  %v1360_v14 = vsel %vm8522_vm6, %v675_v12, 0.0  ;;  %v554_v33 = vadd.f32 %v6915_v28, %v8459_v57  ;;  %v11533_v38 = vld [vmem:[#allocation15_spill] sm:$0xff] }
  0xe6   : > { %v11525_v24 = vsel %vm11522_vm15, %v11523_v50, %v11524_v29  ;;  %v673_v11 = vmax.f32 %v543_v17, 0.0  ;;  %vm11528_vm15 = vcmp.lt.s32.totalorder %v8574_v26, 0  ;;  %v11529_v36 = vmov 0  ;;  %v545_v2 = vpop.f32.mrf.mxu0  ;;  %v11536_v12 = vld [vmem:[#allocation7_spill] sm:$0xff] }
  0xe7   : > { %vm8636_vm7 = vcmp.lt.s32.totalorder %v11525_v24, 16  ;;  %vm8655_vm9 = vmand %vm11528_vm15, %vm1168_vm2  ;;  %vm1202_vm12 = vcmp.lt.s32.totalorder %v8597_v61, 0  ;;  %vm11532_vm14 = vcmask 257024   ;;  %v6508_v25 = vpack.c.bf16 %v1360_v14, %v1360_v14 }
  0xe8   : > { %v11530_v36 = vsel %vm8655_vm9, 4294967295, %v11529_v36  ;;  %1544 = vst.msk [vmem:[#allocation2 + $0x14] sm:$0xf] %vm11532_vm14, %v6503_v51  ;;  %vm11534_vm13 = vnez %v11533_v38  ;;  %v8671_v50 = vsub.s32 %v8368_v30, %v1090_v46  ;;  %v1358_v51 = vsel %vm8543_vm0, %v673_v11, 0.0  ;;  %v11543_v30 = vld [vmem:[#allocation17_spill] sm:$0xff]  ;;  %v11544_v46 = vld [vmem:[#allocation10_spill] sm:$0xff]  ;;  %vm11548_vm0 = vmmov %vm11532_vm14 }
  0xe9   : > { %11531 = vst [vmem:[#allocation11_spill] sm:$0xff] %v11530_v36  ;;  %v11537_v17 = vsel %vm11534_vm13, %v11535_v53, %v11536_v12  ;;  %v8674_v29 = vmul.u32.u64.low 3817748708, %v8509_v60  ;;  %v8675_v24 = vmul.u32.u64.high 3817748708, %v8509_v60, %v8674_v29  ;;  %v676_v14 = vmax.f32 %v554_v33, 0.0  ;;  %1549 = vst.msk [vmem:[#allocation2 + $0x28] sm:$0xf] %vm11532_vm14, %v6508_v25  ;;  %v6918_v12 = vpop.f32.mrf.mxu0 }
  0xea   : > { %vm8666_vm6 = vcmp.lt.s32.totalorder %v11537_v17, 16  ;;  %11540 = vst [vmem:[#allocation9_spill] sm:$0xff] %v8671_v50  ;;  %v546_v38 = vadd.f32 %v8459_v57, %v545_v2  ;;  %v8681_v5 = vadd.s32 18, %v8597_v61  ;;  %v6506_v53 = vpack.c.bf16 %v1358_v51, %v1358_v51  ;;  %v11541_v17 = vld [vmem:[#allocation18_spill] sm:$0xff]  ;;  %v11551_v36 = vld [vmem:[#allocation19_spill] sm:$0xff] }
  0xeb   : > { %vm11542_vm2 = vnez %v11541_v17  ;;  %v1068_v11 = vmul.u32 18, %v1067_v59  ;;  %v1123_v33 = vmul.u32 18, %v1122_v10  ;;  %v1361_v25 = vsel %vm8567_vm4, %v676_v14, 0.0  ;;  %v8700_v17 = vld [vmem:[#allocation2 + $0xc] sm:$0xff]  }
  0xec   : > { %v11545_v45 = vsel %vm11542_vm2, %v11543_v30, %v11544_v46  ;;  %v674_v2 = vmax.f32 %v546_v38, 0.0  ;;  %v567_v51 = vadd.f32 %v6918_v12, %v8459_v57  ;;  %1547 = vst.msk [vmem:[#allocation2 + $0x20] sm:$0xf] %vm11548_vm0, %v6506_v53  ;;  %v6509_v30 = vpack.c.bf16 %v1361_v25, %v1361_v25  ;;  %v558_v46 = vpop.f32.mrf.mxu0 }
  0xed   : > { %vm8689_vm13 = vcmp.lt.s32.totalorder %v11545_v45, 16  ;;  %v1100_v45 = vshrl.u32 %v8553_v31, 4  ;;  %vm11550_vm15 = vnez %v11549_v3  ;;  %v8716_v41 = vadd.s32 18, %v8671_v50 }
  0xee   : > { %v11553_v59 = vsel %vm11550_vm15, %v11551_v36, %v11552_v62  ;;  %v1359_v31 = vsel %vm8589_vm11, %v674_v2, 0.0  ;;  %v679_v14 = vmax.f32 %v567_v51, 0.0  ;;  %v559_v3 = vadd.f32 %v8459_v57, %v558_v46  ;;  %v6919_v12 = vpop.f32.mrf.mxu0 }
  0xef   : > { %vm8709_vm14 = vcmp.lt.s32.totalorder %v11553_v59, 16  ;;  %11556 = vst [vmem:[#allocation8_spill] sm:$0xff] %v8716_v41  ;;  %v1720_v38 = vrot.slane %v8700_v17, 3  ;;  %vm11557_vm0 = vcmp.ne.s32.totalorder %v8597_v61, 0  ;;  %vm11560_vm2 = vcmask 257024   ;;  %v11603_v41 = vld [vmem:[#allocation24_spill] sm:$0xff] }
  0xf0   : > { %vm8726_vm15 = vmand %vm1202_vm12, %vm11557_vm0  ;;  %1550 = vst.msk [vmem:[#allocation2 + $0x2c] sm:$0xf] %vm11560_vm2, %v6509_v30  ;;  %v6507_v53 = vpack.c.bf16 %v1359_v31, %v1359_v31  ;;  %vm11561_vm4 = vnez %v11418_v43  ;;  %v8741_v25 = vsub.s32 %v8476_v19, %v1068_v11  ;;  %v1364_v30 = vsel %vm8619_vm1, %v679_v14, 0.0  ;;  %v561_v11 = vpop.f32.mrf.mxu0  ;;  %v11576_v31 = vld [vmem:[#allocation20_spill] sm:$0xff] }
  0xf1   : > { %v11562_v8 = vsel %vm11561_vm4, %v8189_v37, %v8105_v32  ;;  %v8744_v2 = vmul.u32.u64.low 3817748708, %v8556_v27  ;;  %v8745_v51 = vmul.u32.u64.high 3817748708, %v8556_v27, %v8744_v2  ;;  %v677_v46 = vmax.f32 %v559_v3, 0.0  ;;  %v8753_v37 = vld [vmem:[#allocation2 + $0x14] sm:$0xff]  }
  0xf2   : > { %vm8736_vm11 = vcmp.lt.s32.totalorder %v11562_v8, 16  ;;  %v570_v43 = vadd.f32 %v6919_v12, %v8459_v57  ;;  %v11565_v59 = vrot.slane %v8052_v6, 3  ;;  %vm11566_vm12 = vcmask 1044480   ;;  %v11575_v6 = vld [vmem:[#allocation25_spill] sm:$0xff] }
  0xf3   : > { %vm11567_vm4 = vcmp.ne.s32.totalorder %v8671_v50, 0  ;;  %vm11568_vm2 = vcmp.lt.s32.totalorder %v8671_v50, 0  ;;  %v11569_v19 = vmov 0  ;;  %vm11572_vm9 = vcmask 257024   ;;  %v11584_v12 = vld [vmem:[#allocation21_spill] sm:$0xff] }
  0xf4   : > { %v1721_v32 = vsel %vm11566_vm12, %v11565_v59, %v1720_v38  ;;  %vm8759_vm0 = vmand %vm11568_vm2, %vm11567_vm4  ;;  %1548 = vst.msk [vmem:[#allocation2 + $0x24] sm:$0xf] %vm11572_vm9, %v6507_v53  ;;  %v6512_v47 = vpack.c.bf16 %v1364_v30, %v1364_v30  ;;  %vm11573_vm1 = vcmask 261120   ;;  %v11577_v14 = vsel %vm11574_vm8, %v11575_v6, %v11576_v31  ;;  %v6922_v6 = vpop.f32.mrf.mxu0  ;;  %v11581_v31 = vld [vmem:[#allocation26_spill] sm:$0xff] }
  0xf5   : > { %v11570_v19 = vsel %vm8759_vm0, 4294967295, %v11569_v19  ;;  %6948 = vmatprep.mubr.msk.bf16.mxu0 %vm11573_vm1, %v1721_v32  ;;  %vm8770_vm12 = vcmp.lt.s32.totalorder %v11577_v14, 16  ;;  %v8779_v53 = vsub.s32 %v8489_v16, %v1123_v33  ;;  %v1133_v8 = vshrl.u32 %v8675_v24, 4  ;;  %vm11580_vm8 = vmmov %vm11572_vm9  ;;  %v11583_v14 = vld [vmem:[#allocation27_spill] sm:$0xff]  ;;  %v11593_v24 = vld [vmem:[#allocation28_spill] sm:$0xff] }
  0xf6   : > { %11571 = vst [vmem:[#allocation5_spill] sm:$0xff] %v11570_v19  ;;  %v1362_v9 = vsel %vm8636_vm7, %v677_v46, 0.0  ;;  %v680_v2 = vmax.f32 %v570_v43, 0.0  ;;  %v562_v30 = vadd.f32 %v8459_v57, %v561_v11  ;;  %v1722_v59 = vrot.slane %v8753_v37, 3  ;;  %1553 = vst.msk [vmem:[#allocation2 + $0x38] sm:$0xf] %vm11580_vm8, %v6512_v47 }
  0xf7   : > { %v6510_v32 = vpack.c.bf16 %v1362_v9, %v1362_v9  ;;  %vm11582_vm9 = vnez %v11581_v31  ;;  %v1101_v46 = vmul.u32 18, %v1100_v45  ;;  %v583_v11 = vadd.f32 %v6922_v6, %v8459_v57  ;;  %v8808_v9 = vld [vmem:[#allocation2 + $0x1c] sm:$0xff]   ;;  %vm11589_vm1 = vmmov %vm11580_vm8  ;;  %v11594_v45 = vld [vmem:[#allocation23_spill] sm:$0xff] }
  0xf8   : > { %v11585_v16 = vsel %vm11582_vm9, %v11583_v14, %v11584_v12  ;;  %v1365_v43 = vsel %vm8666_vm6, %v680_v2, 0.0  ;;  %v678_v47 = vmax.f32 %v562_v30, 0.0  ;;  %vm11588_vm2 = vcmask 1044480   ;;  %v574_v14 = vpop.f32.mrf.mxu0  ;;  %v11630_v33 = vld [vmem:[#allocation34_spill] sm:$0xff] }
  0xf9   : > { %vm8792_vm4 = vcmp.lt.s32.totalorder %v11585_v16, 16  ;;  %v1723_v12 = vsel %vm11588_vm2, %v1720_v38, %v1722_v59  ;;  %1551 = vst.msk [vmem:[#allocation2 + $0x30] sm:$0xf] %vm11589_vm1, %v6510_v32  ;;  %v6513_v31 = vpack.c.bf16 %v1365_v43, %v1365_v43  ;;  %vm11590_vm8 = vcmask 261120   ;;  %v11591_v16 = vld [vmem:[#allocation29_spill] sm:$0xff]  ;;  %vm11599_vm2 = vmmov %vm11589_vm1 }
  0xfa   : > { %6949 = vmatmul.mubr.msk.bf16.vlgmr.msra.gmra.mxu0 %vm11590_vm8, %v1723_v12  ;;  %vm11592_vm9 = vnez %v11591_v16  ;;  %vm1203_vm6 = vcmp.lt.s32.totalorder %v8741_v25, 0  ;;  %v8823_v38 = vadd.s32 18, %v8741_v25  ;;  %v1134_v2 = vmul.u32 18, %v1133_v8  ;;  %v11598_v12 = vld [vmem:[#allocation3_spill] sm:$0xff] }
  0xfb   : > { %v11595_v50 = vsel %vm11592_vm9, %v11593_v24, %v11594_v45  ;;  %v1363_v30 = vsel %vm8689_vm13, %v678_v47, 0.0  ;;  %v683_v32 = vmax.f32 %v583_v11, 0.0  ;;  %v575_v6 = vadd.f32 %v8459_v57, %v574_v14  ;;  %7025 = vmatpush3.bf16.msra.mxu0 %v11598_v12  ;;  %1554 = vst.msk [vmem:[#allocation2 + $0x3c] sm:$0xf] %vm11599_vm2, %v6513_v31  ;;  %v6923_v24 = vpop.f32.mrf.mxu0  ;;  %v11600_v16 = vld [vmem:[#allocation31_spill] sm:$0xff]  ;;  %v11602_v45 = vld [vmem:[#allocation30_spill] sm:$0xff] }
  0xfc   : > { %vm8817_vm7 = vcmp.lt.s32.totalorder %v11595_v50, 16  ;;  %v1724_v43 = vrot.slane %v8808_v9, 3  ;;  %v6511_v50 = vpack.c.bf16 %v1363_v30, %v1363_v30  ;;  %vm11601_vm1 = vnez %v11600_v16  ;;  %7026 = vmatprep.subr.bf16.mxu0 %v7465_v52  ;;  %v8848_v11 = vld [vmem:[%s11265_s3 + $0x48] sm:$0xff]  }
  0xfd   : > { %v11604_v19 = vsel %vm11601_vm1, %v11602_v45, %v11603_v41  ;;  %v8842_v29 = vsub.s32 %v8506_v1, %v1101_v46  ;;  %v1111_v47 = vshrl.u32 %v8745_v51, 4  ;;  %v1368_v41 = vsel %vm8709_vm14, %v683_v32, 0.0  ;;  %v8854_v30 = vld [vmem:[#allocation2 + $0x24] sm:$0xff]   ;;  %v577_v46 = vpop.f32.mrf.mxu0 }
  0xfe   : > { %vm8836_vm8 = vcmp.lt.s32.totalorder %v11604_v19, 16  ;;  %v681_v19 = vmax.f32 %v575_v6, 0.0  ;;  %v586_v31 = vadd.f32 %v6923_v24, %v8459_v57  ;;  %vm11607_vm9 = vcmask 1044480   ;;  %1552 = vst.msk [vmem:[#allocation2 + $0x34] sm:$0xf] %vm11599_vm2, %v6511_v50 }
  0xff   : > { %v1725_v14 = vsel %vm11607_vm9, %v1722_v59, %v1724_v43  ;;  %v6516_v1 = vpack.c.bf16 %v1368_v41, %v1368_v41  ;;  %vm11608_vm1 = vcmask 261120   ;;  %v11609_v51 = vsel %vm8317_vm3, %v8276_v23, %v8231_v55  ;;  %7027 = vmatpush3.bf16.msra.mxu0 %v7465_v52 }
 0x100   : > { %6952 = vmatprep.mubr.msk.bf16.mxu0 %vm11608_vm1, %v1725_v14  ;;  %vm8863_vm13 = vcmp.lt.s32.totalorder %v11609_v51, 16  ;;  %vm1208_vm14 = vcmp.lt.s32.totalorder %v8779_v53, 0  ;;  %v8869_v59 = vadd.s32 18, %v8779_v53  ;;  %v8872_v32 = vsub.s32 %v8509_v60, %v1134_v2  ;;  %v6926_v2 = vpop.f32.mrf.mxu0  ;;  %7104 = vmatprep.subr.bf16.mxu0 %v8848_v11  ;;  %v11631_v51 = vld [vmem:[#allocation32_spill] sm:$0xff] }
 0x101   : > { %v1366_v6 = vsel %vm8736_vm11, %v681_v19, 0.0  ;;  %v684_v12 = vmax.f32 %v586_v31, 0.0  ;;  %v578_v21 = vadd.f32 %v8459_v57, %v577_v46  ;;  %v1726_v55 = vrot.slane %v8854_v30, 3  ;;  %1557 = vst.msk [vmem:[#allocation2 + $0x48] sm:$0xf] %vm11599_vm2, %v6516_v1  ;;  %v11628_v46 = vld [vmem:[#allocation36_spill] sm:$0xff] }
 0x102   : > { %vm11612_vm3 = vcmp.ne.s32.totalorder %v8741_v25, 0  ;;  %v6514_v60 = vpack.c.bf16 %v1366_v6, %v1366_v6  ;;  %v11615_v62 = vsel %vm8335_vm5, %v8291_v58, %v8234_v49  ;;  %vm1170_vm1 = vcmp.ne.s32.totalorder %v8842_v29, 0  ;;  %v8903_v49 = vld [vmem:[#allocation2 + $0x2c] sm:$0xff]   ;;  %vm11619_vm5 = vmmov %vm11599_vm2  ;;  %v590_v41 = vpop.f32.mrf.mxu0 }
 0x103   : > { %vm8882_vm9 = vmand %vm1203_vm6, %vm11612_vm3  ;;  %vm8892_vm11 = vcmp.lt.s32.totalorder %v11615_v62, 16  ;;  %v1112_v52 = vmul.u32 18, %v1111_v47  ;;  %v1369_v24 = vsel %vm8770_vm12, %v684_v12, 0.0  ;;  %v682_v16 = vmax.f32 %v578_v21, 0.0 }
 0x104   : > { %v599_v42 = vadd.f32 %v6926_v2, %v8459_v57  ;;  %vm11618_vm3 = vcmask 1044480   ;;  %1555 = vst.msk [vmem:[#allocation2 + $0x40] sm:$0xf] %vm11619_vm5, %v6514_v60  ;;  %v6517_v58 = vpack.c.bf16 %v1369_v24, %v1369_v24  ;;  %vm11620_vm2 = vcmask 261120   ;;  %v6927_v1 = vpop.f32.mrf.mxu0 }
 0x105   : > { %v1727_v45 = vsel %vm11618_vm3, %v1724_v43, %v1726_v55  ;;  %v11621_v47 = vsel %vm8347_vm10, %v8299_v15, %v8267_v44  ;;  %v1311_v43 = vsel %vm8882_vm9, %v8823_v38, %v8741_v25  ;;  %vm1173_vm12 = vcmp.ne.s32.totalorder %v8872_v32, 0 }
 0x106   : > { %6953 = vmatmul.mubr.msk.bf16.gmra.mxu0 %vm11620_vm2, %v1727_v45  ;;  %vm8912_vm6 = vcmp.lt.s32.totalorder %v11621_v47, 16  ;;  %v1367_v19 = vsel %vm8792_vm4, %v682_v16, 0.0  ;;  %v687_v63 = vmax.f32 %v599_v42, 0.0  ;;  %v591_v31 = vadd.f32 %v8459_v57, %v590_v41  ;;  %v593_v28 = vpop.f32.mrf.mxu0 }
 0x107   : > { %v1728_v44 = vrot.slane %v8903_v49, 3  ;;  %vm11624_vm10 = vcmp.ne.s32.totalorder %v8779_v53, 0  ;;  %vm11627_vm2 = vcmask 257024   ;;  %v6515_v14 = vpack.c.bf16 %v1367_v19, %v1367_v19 }
 0x108   : > { %vm8930_vm5 = vmand %vm1208_vm14, %vm11624_vm10  ;;  %1558 = vst.msk [vmem:[#allocation2 + $0x4c] sm:$0xf] %vm11627_vm2, %v6517_v58  ;;  %vm11629_vm3 = vnez %v11628_v46  ;;  %vm11635_vm14 = vcmp.lt.s32.totalorder %v8842_v29, 0  ;;  %v8953_v60 = vadd.s32 18, %v8842_v29  ;;  %v8956_v2 = vadd.s32 18, %v8872_v32  ;;  %v8965_v58 = vld [vmem:[#allocation2 + $0x34] sm:$0xff]  }
 0x109   : > { %v11632_v6 = vsel %vm11629_vm3, %v11630_v33, %v11631_v51  ;;  %vm8948_vm10 = vmand %vm11635_vm14, %vm1170_vm1  ;;  %v8959_v62 = vsub.s32 %v8556_v27, %v1112_v52  ;;  %v1372_v24 = vsel %vm8817_vm7, %v687_v63, 0.0  ;;  %v685_v16 = vmax.f32 %v591_v31, 0.0  ;;  %v11689_v52 = vld [vmem:[#allocation11_spill] sm:$0xff] }
 0x10a   : > { %vm8940_vm4 = vcmp.lt.s32.totalorder %v11632_v6, 16  ;;  %v602_v42 = vadd.f32 %v6927_v1, %v8459_v57  ;;  %vm11638_vm3 = vcmask 1044480   ;;  %vm11639_vm1 = vcmp.lt.s32.totalorder %v8872_v32, 0  ;;  %v6930_v1 = vpop.f32.mrf.mxu0 }
 0x10b   : > { %v1729_v45 = vsel %vm11638_vm3, %v1726_v55, %v1728_v44  ;;  %vm8971_vm2 = vmand %vm11639_vm1, %vm1173_vm12  ;;  %vm11642_vm14 = vcmask 257024   ;;  %v6520_v27 = vpack.c.bf16 %v1372_v24, %v1372_v24  ;;  %vm11643_vm7 = vcmask 261120   ;;  %v9019_v24 = vld [vmem:[#allocation2 + $0x3c] sm:$0xff]  }
 0x10c   : > { %1556 = vst.msk [vmem:[#allocation2 + $0x44] sm:$0xf] %vm11642_vm14, %v6515_v14  ;;  %6956 = vmatprep.mubr.msk.bf16.mxu0 %vm11643_vm7, %v1729_v45  ;;  %vm11644_vm9 = vnez %v11462_v48  ;;  %v2013_v47 = vshrl.u32 %v8700_v17, 16  ;;  %v11341_v19 = vshll.u32 %v8700_v17, 16  ;;  %v1316_v63 = vsel %vm8930_vm5, %v8869_v59, %v8779_v53  ;;  %vm11648_vm12 = vmmov %vm11642_vm14  ;;  %v11656_v45 = vld [vmem:[#allocation37_spill] sm:$0xff]  ;;  %v7569_v53 = vld [vmem:[%s11265_s3 + $0x8] sm:$0xff]  }
 0x10d   : > { %v11645_v55 = vsel %vm11644_vm9, %v8384_v40, %v8295_v39  ;;  %v1370_v31 = vsel %vm8836_vm8, %v685_v16, 0.0  ;;  %v688_v48 = vmax.f32 %v602_v42, 0.0  ;;  %v594_v14 = vadd.f32 %v8459_v57, %v593_v28  ;;  %1561 = vst.msk [vmem:[#allocation2 + $0x58] sm:$0xf] %vm11648_vm12, %v6520_v27  ;;  %v606_v42 = vpop.f32.mrf.mxu0  ;;  %v11657_v27 = vld [vmem:[#allocation33_spill] sm:$0xff] }
 0x10e   : > { %vm8982_vm3 = vcmp.lt.s32.totalorder %v11645_v55, 16  ;;  %v1730_v39 = vrot.slane %v8965_v58, 3  ;;  %v6518_v40 = vpack.c.bf16 %v1370_v31, %v1370_v31  ;;  %vm11649_vm1 = vnez %v11465_v54 }
 0x10f   : > { %v11650_v46 = vsel %vm11649_vm1, %v8396_v7, %v8302_v22  ;;  %v1314_v8 = vsel %vm8948_vm10, %v8953_v60, %v8842_v29  ;;  %v1317_v51 = vsel %vm8971_vm2, %v8956_v2, %v8872_v32  ;;  %v1373_v54 = vsel %vm8863_vm13, %v688_v48, 0.0 }
 0x110   : > { %vm9002_vm14 = vcmp.lt.s32.totalorder %v11650_v46, 16  ;;  %v686_v22 = vmax.f32 %v594_v14, 0.0  ;;  %v615_v7 = vadd.f32 %v6930_v1, %v8459_v57  ;;  %vm11653_vm7 = vcmask 1044480   ;;  %1559 = vst.msk [vmem:[#allocation2 + $0x50] sm:$0xf] %vm11648_vm12, %v6518_v40  ;;  %v6931_v1 = vpop.f32.mrf.mxu0  ;;  %v11662_v46 = vld [vmem:[#allocation41_spill] sm:$0xff] }
 0x111   : > { %v1731_v6 = vsel %vm11653_vm7, %v1728_v44, %v1730_v39  ;;  %v6521_v16 = vpack.c.bf16 %v1373_v54, %v1373_v54  ;;  %vm11654_vm1 = vcmask 261120   ;;  %vm11655_vm9 = vnez %v11475_v0  ;;  %v11664_v54 = vld [vmem:[#allocation40_spill] sm:$0xff] }
 0x112   : > { %6957 = vmatmul.mubr.msk.bf16.gmra.mxu0 %vm11654_vm1, %v1731_v6  ;;  %v11658_v28 = vsel %vm11655_vm9, %v11656_v45, %v11657_v27  ;;  %v2434_v44 = vrot.slane %v2013_v47, 3  ;;  %v2435_v55 = vrot.slane %v11341_v19, 4  ;;  %vm1207_vm13 = vcmp.lt.s32.totalorder %v8959_v62, 0  ;;  %vm11661_vm9 = vmmov %vm11648_vm12  ;;  %v11665_v6 = vld [vmem:[#allocation35_spill] sm:$0xff]  ;;  %v609_v3 = vpop.f32.mrf.mxu0 }
 0x113   : > { %vm9028_vm8 = vcmp.lt.s32.totalorder %v11658_v28, 16  ;;  %v1371_v31 = vsel %vm8892_vm11, %v686_v22, 0.0  ;;  %v691_v48 = vmax.f32 %v615_v7, 0.0  ;;  %v607_v0 = vadd.f32 %v8459_v57, %v606_v42  ;;  %1562 = vst.msk [vmem:[#allocation2 + $0x5c] sm:$0xf] %vm11661_vm9, %v6521_v16 }
 0x114   : > { %v1732_v14 = vrot.slane %v9019_v24, 3  ;;  %v6519_v40 = vpack.c.bf16 %v1371_v31, %v1371_v31  ;;  %vm11663_vm7 = vnez %v11662_v46  ;;  %v11340_v50 = vshrl.u32 %v8753_v37, 16  ;;  %v9060_v46 = vld [vmem:[#allocation2 + $0x44] sm:$0xff]  }
 0x115   : > { %v11666_v45 = vsel %vm11663_vm7, %v11664_v54, %v11665_v6  ;;  %v11339_v22 = vshll.u32 %v8753_v37, 16  ;;  %v9054_v7 = vadd.s32 18, %v8959_v62  ;;  %v1376_v16 = vsel %vm8912_vm6, %v691_v48, 0.0 }
 0x116   : > { %vm9047_vm12 = vcmp.lt.s32.totalorder %v11666_v45, 16  ;;  %v689_v42 = vmax.f32 %v607_v0, 0.0  ;;  %v618_v28 = vadd.f32 %v6931_v1, %v8459_v57  ;;  %vm11669_vm11 = vcmask 1044480  }
 0x117   : > { %v1733_v31 = vsel %vm11669_vm11, %v1730_v39, %v1732_v14  ;;  %vm11670_vm1 = vcmp.ne.s32.totalorder %v8959_v62, 0  ;;  %vm11673_vm7 = vcmask 257024   ;;  %v6524_v6 = vpack.c.bf16 %v1376_v16, %v1376_v16 }
 0x118   : > { %vm9066_vm9 = vmand %vm1207_vm13, %vm11670_vm1  ;;  %1560 = vst.msk [vmem:[#allocation2 + $0x54] sm:$0xf] %vm11673_vm7, %v6519_v40  ;;  %vm11674_vm6 = vcmask 261120   ;;  %vm11675_vm2 = vnez %v11495_v35  ;;  %v2436_v0 = vor.u32 %v2435_v55, %v2434_v44  ;;  %v2031_v1 = vshrl.u32 %v8808_v9, 16 }
 0x119   : > { %6960 = vmatprep.mubr.msk.bf16.mxu0 %vm11674_vm6, %v1733_v31  ;;  %v11676_v39 = vsel %vm11675_vm2, %v8515_v4, %v8450_v20  ;;  %v2034_v45 = vshll.u32 %v8808_v9, 16  ;;  %v1374_v40 = vsel %vm8940_vm4, %v689_v42, 0.0  ;;  %v692_v16 = vmax.f32 %v618_v28, 0.0  ;;  %vm11679_vm13 = vmmov %vm11673_vm7  ;;  %v6934_v4 = vpop.f32.mrf.mxu0 }
 0x11a   : > { %vm9077_vm11 = vcmp.lt.s32.totalorder %v11676_v39, 16  ;;  %v610_v31 = vadd.f32 %v8459_v57, %v609_v3  ;;  %v1734_v35 = vrot.slane %v9060_v46, 3  ;;  %1565 = vst.msk [vmem:[#allocation2 + $0x68] sm:$0xf] %vm11679_vm13, %v6524_v6  ;;  %v6522_v20 = vpack.c.bf16 %v1374_v40, %v1374_v40  ;;  %v9109_v3 = vld [vmem:[#allocation2 + $0x4c] sm:$0xff]  }
 0x11b   : > { %vm11680_vm2 = vnez %v11511_v13  ;;  %v2438_v12 = vrot.slane %v11340_v50, 3  ;;  %v2439_v42 = vrot.slane %v11339_v22, 4  ;;  %v1315_v28 = vsel %vm9066_vm9, %v9054_v7, %v8959_v62  ;;  %v622_v40 = vpop.f32.mrf.mxu0  ;;  %v11686_v22 = vld [vmem:[#allocation38_spill] sm:$0xff] }
 0x11c   : > { %v11681_v44 = vsel %vm11680_vm2, %v8594_v34, %v8527_v18  ;;  %v1377_v13 = vsel %vm8982_vm3, %v692_v16, 0.0  ;;  %v690_v6 = vmax.f32 %v610_v31, 0.0  ;;  %v631_v18 = vadd.f32 %v6934_v4, %v8459_v57  ;;  %1563 = vst.msk [vmem:[#allocation2 + $0x60] sm:$0xf] %vm11673_vm7, %v6522_v20 }
 0x11d   : > { %vm9093_vm1 = vcmp.lt.s32.totalorder %v11681_v44, 16  ;;  %vm11684_vm4 = vcmask 1044480   ;;  %v6525_v39 = vpack.c.bf16 %v1377_v13, %v1377_v13  ;;  %v11685_v44 = vld [vmem:[#allocation39_spill] sm:$0xff]  ;;  %vm11688_vm13 = vsmask.f32 4352  ;;  %v6935_v13 = vpop.f32.mrf.mxu0 }
 0x11e   : > { %v1735_v34 = vsel %vm11684_vm4, %v1732_v14, %v1734_v35  ;;  %v11687_v50 = vor.u32 %v11685_v44, %v11686_v22  ;;  %vm11690_vm3 = vnez %v11689_v52  ;;  %v2442_v31 = vrot.slane %v2031_v1, 3  ;;  %vm11694_vm4 = vmmov %vm11674_vm6 }
 0x11f   : > { %6961 = vmatmul.mubr.msk.bf16.gmra.mxu0 %vm11674_vm6, %v1735_v34  ;;  %v11691_v16 = vsel %vm11690_vm3, %v8645_v56, %v8574_v26  ;;  %v2443_v20 = vrot.slane %v2034_v45, 4  ;;  %v1375_v22 = vsel %vm9002_vm14, %v690_v6, 0.0  ;;  %v695_v4 = vmax.f32 %v631_v18, 0.0  ;;  %1566 = vst.msk [vmem:[#allocation2 + $0x6c] sm:$0xf] %vm11673_vm7, %v6525_v39  ;;  %v9151_v52 = vld [vmem:[#allocation2 + $0x54] sm:$0xff]  }
 0x120   : > { %v2437_v19 = vsel %vm11688_vm13, %v11687_v50, %v2436_v0  ;;  %vm9122_vm2 = vcmp.lt.s32.totalorder %v11691_v16, 16  ;;  %v623_v50 = vadd.f32 %v8459_v57, %v622_v40  ;;  %v1736_v26 = vrot.slane %v9109_v3, 3  ;;  %vm11700_vm13 = vmmov %vm11694_vm4  ;;  %v11703_v16 = vld [vmem:[#allocation9_spill] sm:$0xff] }
 0x121   : > { %7028 = vmatprep.mubr.msk.bf16.mxu0 %vm11694_vm4, %v2437_v19  ;;  %v6523_v56 = vpack.c.bf16 %v1375_v22, %v1375_v22  ;;  %v11695_v34 = vsel %vm8726_vm15, %v8681_v5, %v8597_v61  ;;  %v2440_v33 = vor.u32 %v2439_v42, %v2438_v12  ;;  %v2040_v6 = vshrl.u32 %v8854_v30, 16  ;;  %vm11699_vm15 = vmmov %vm11673_vm7  ;;  %v625_v5 = vpop.f32.mrf.mxu0  ;;  %v11702_v42 = vld [vmem:[#allocation8_spill] sm:$0xff] }
 0x122   : > { %vm9141_vm6 = vcmp.lt.s32.totalorder %v11695_v34, 16  ;;  %v2043_v19 = vshll.u32 %v8854_v30, 16  ;;  %v1380_v18 = vsel %vm9028_vm8, %v695_v4, 0.0  ;;  %v693_v39 = vmax.f32 %v623_v50, 0.0  ;;  %vm11707_vm8 = vmmov %vm11673_vm7 }
 0x123   : > { %v634_v40 = vadd.f32 %v6935_v13, %v8459_v57  ;;  %vm11698_vm14 = vcmask 1044480   ;;  %1564 = vst.msk [vmem:[#allocation2 + $0x64] sm:$0xf] %vm11699_vm15, %v6523_v56  ;;  %v6528_v61 = vpack.c.bf16 %v1380_v18, %v1380_v18  ;;  %v11704_v22 = vsel %vm8759_vm0, %v11702_v42, %v11703_v16  ;;  %v6938_v12 = vpop.f32.mrf.mxu0  ;;  %vm11714_vm15 = vmmov %vm11700_vm13 }
 0x124   : > { %v1737_v36 = vsel %vm11698_vm14, %v1734_v35, %v1736_v26  ;;  %vm9160_vm3 = vcmp.lt.s32.totalorder %v11704_v22, 16  ;;  %v9164_v4 = vor.u32 %v2443_v20, %v2442_v31  ;;  %v2049_v35 = vshrl.u32 %v8903_v49, 16  ;;  %vm11718_vm5 = vmmov %vm11700_vm13 }
 0x125   : > { %6964 = vmatprep.mubr.msk.bf16.mxu1 %vm11700_vm13, %v1737_v36  ;;  %v2052_v50 = vshll.u32 %v8903_v49, 16  ;;  %v1378_v56 = vsel %vm9047_vm12, %v693_v39, 0.0  ;;  %v696_v13 = vmax.f32 %v634_v40, 0.0  ;;  %v626_v34 = vadd.f32 %v8459_v57, %v625_v5  ;;  %1569 = vst.msk [vmem:[#allocation2 + $0x78] sm:$0xf] %vm11707_vm8, %v6528_v61  ;;  %v7472_v39 = vld [vmem:[%s11265_s3] sm:$0xff]   ;;  %vm11712_vm12 = vmmov %vm11698_vm14  ;;  %v638_v5 = vpop.f32.mrf.mxu0 }
 0x126   : > { %v1738_v18 = vrot.slane %v9151_v52, 3  ;;  %v6526_v36 = vpack.c.bf16 %v1378_v56, %v1378_v56  ;;  %vm11708_vm0 = vsmask.f32 4352  ;;  %vm9179_vm7 = vcmp.lt.s32.totalorder %v1311_v43, 16  ;;  %v9194_v43 = vld [vmem:[#allocation2 + $0x5c] sm:$0xff]   ;;  %vm11713_vm14 = vmmov %vm11707_vm8 }
 0x127   : > { %v2441_v42 = vsel %vm11708_vm0, %v2436_v0, %v2440_v33  ;;  %v2446_v27 = vrot.slane %v2040_v6, 3  ;;  %v2447_v20 = vrot.slane %v2043_v19, 4  ;;  %v1381_v23 = vsel %vm9077_vm11, %v696_v13, 0.0  ;;  %v7484_v40 = vld [vmem:[%s11265_s3 + $0x40] sm:$0xff]   ;;  %vm11715_vm11 = vmmov %vm11708_vm0 }
 0x128   : > { %v694_v0 = vmax.f32 %v626_v34, 0.0  ;;  %v647_v25 = vadd.f32 %v6938_v12, %v8459_v57  ;;  %v1739_v38 = vsel %vm11712_vm12, %v1736_v26, %v1738_v18  ;;  %1567 = vst.msk [vmem:[#allocation2 + $0x70] sm:$0xf] %vm11713_vm14, %v6526_v36  ;;  %v6529_v61 = vpack.c.bf16 %v1381_v23, %v1381_v23  ;;  %7029 = vmatmul.mubr.msk.bf16.vlgmr.msra.gmra.mxu0 %vm11700_vm13, %v2441_v42  ;;  %vm11719_vm0 = vmmov %vm11713_vm14  ;;  %v9240_v42 = vld [vmem:[%s11265_s3 + $0x38] sm:$0xff]  }
 0x129   : > { %6965 = vmatmul.mubr.msk.bf16.vlgmr.msra.gmra.mxu1 %vm11714_vm15, %v1739_v38  ;;  %v2445_v48 = vsel %vm11715_vm11, %v2440_v33, %v9164_v4  ;;  %vm9209_vm8 = vcmp.lt.s32.totalorder %v1316_v63, 16  ;;  %v2450_v16 = vrot.slane %v2049_v35, 3  ;;  %v2451_v22 = vrot.slane %v2052_v50, 4  ;;  %v6939_v63 = vpop.f32.mrf.mxu0  ;;  %7105 = vmatpush3.bf16.msra.mxu0 %v8848_v11  ;;  %vm11722_vm10 = vmmov %vm11712_vm12 }
 0x12a   : > { %v1379_v56 = vsel %vm9093_vm1, %v694_v0, 0.0  ;;  %v699_v13 = vmax.f32 %v647_v25, 0.0  ;;  %v639_v33 = vadd.f32 %v8459_v57, %v638_v5  ;;  %6985 = vmatpush3.bf16.msra.mxu1 %v7569_v53  ;;  %7032 = vmatprep.mubr.msk.bf16.mxu0 %vm11718_vm5, %v2445_v48  ;;  %v1740_v59 = vrot.slane %v9194_v43, 3  ;;  %1570 = vst.msk [vmem:[#allocation2 + $0x7c] sm:$0xf] %vm11719_vm0, %v6529_v61  ;;  %vm11723_vm4 = vmmov %vm11719_vm0 }
 0x12b   : > { %v6527_v15 = vpack.c.bf16 %v1379_v56, %v1379_v56  ;;  %vm9231_vm1 = vcmp.lt.s32.totalorder %v1314_v8, 16  ;;  %v2448_v34 = vor.u32 %v2447_v20, %v2446_v27  ;;  %v2058_v36 = vshrl.u32 %v8965_v58, 16  ;;  %6986 = vmatprep.subr.bf16.mxu1 %v7472_v39  ;;  %v9247_v27 = vld [vmem:[#allocation2 + $0x64] sm:$0xff]   ;;  %7106 = vmatprep.subr.bf16.mxu0 %v7484_v40  ;;  %v641_v11 = vpop.f32.mrf.mxu0  ;;  %vm11724_vm12 = vmmov %vm11718_vm5 }
 0x12c   : > { %v2061_v12 = vshll.u32 %v8965_v58, 16  ;;  %v1384_v29 = vsel %vm9122_vm2, %v699_v13, 0.0  ;;  %v697_v21 = vmax.f32 %v639_v33, 0.0  ;;  %v650_v60 = vadd.f32 %v6939_v63, %v8459_v57  ;;  %v9252_v20 = vld [vmem:[%s11265_s3 + $0x68] sm:$0xff]   ;;  %vm11728_vm15 = vmmov %vm11719_vm0 }
 0x12d   : > { %v1741_v8 = vsel %vm11722_vm10, %v1738_v18, %v1740_v59  ;;  %1568 = vst.msk [vmem:[#allocation2 + $0x74] sm:$0xf] %vm11723_vm4, %v6527_v15  ;;  %v6532_v23 = vpack.c.bf16 %v1384_v29, %v1384_v29  ;;  %vm9261_vm14 = vcmp.lt.s32.totalorder %v1317_v51, 16  ;;  %v2452_v18 = vor.u32 %v2451_v22, %v2450_v16  ;;  %v6942_v2 = vpop.f32.mrf.mxu0  ;;  %vm11729_vm13 = vmmov %vm11715_vm11  ;;  %7107 = vmatpush3.bf16.msra.mxu0 %v7484_v40 }
 0x12e   : > { %6968 = vmatprep.mubr.msk.bf16.mxu1 %vm11724_vm12, %v1741_v8  ;;  %v2067_v0 = vshrl.u32 %v9019_v24, 16  ;;  %v2070_v25 = vshll.u32 %v9019_v24, 16  ;;  %v1382_v38 = vsel %vm9141_vm6, %v697_v21, 0.0  ;;  %v700_v61 = vmax.f32 %v650_v60, 0.0  ;;  %6987 = vmatpush3.bf16.msra.mxu1 %v7472_v39  ;;  %vm11730_vm6 = vmmov %vm11722_vm10 }
 0x12f   : > { %v642_v5 = vadd.f32 %v8459_v57, %v641_v11  ;;  %v1742_v41 = vrot.slane %v9247_v27, 3  ;;  %1573 = vst.msk [vmem:[#allocation2 + $0x88] sm:$0xf] %vm11728_vm15, %v6532_v23  ;;  %v6530_v32 = vpack.c.bf16 %v1382_v38, %v1382_v38  ;;  %v2449_v51 = vsel %vm11729_vm13, %v9164_v4, %v2448_v34  ;;  %7064 = vmatprep.subr.bf16.mxu1 %v9240_v42  ;;  %v9283_v13 = vld [vmem:[#allocation2 + $0x6c] sm:$0xff]   ;;  %vm11731_vm11 = vmmov %vm11719_vm0  ;;  %v654_v33 = vpop.f32.mrf.mxu0 }
 0x130   : > { %v2454_v48 = vrot.slane %v2058_v36, 3  ;;  %v2455_v44 = vrot.slane %v2061_v12, 4  ;;  %v1385_v16 = vsel %vm9160_vm3, %v700_v61, 0.0  ;;  %v663_v22 = vadd.f32 %v6942_v2, %v8459_v57  ;;  %7184 = vmatprep.subr.bf16.mxu0 %v9252_v20  ;;  %vm11732_vm0 = vmmov %vm11718_vm5 }
 0x131   : > { %v698_v39 = vmax.f32 %v642_v5, 0.0  ;;  %v1743_v56 = vsel %vm11730_vm6, %v1740_v59, %v1742_v41  ;;  %1571 = vst.msk [vmem:[#allocation2 + $0x80] sm:$0xf] %vm11731_vm11, %v6530_v32  ;;  %v6533_v4 = vpack.c.bf16 %v1385_v16, %v1385_v16  ;;  %7033 = vmatmul.mubr.msk.bf16.gmra.mxu0 %vm11732_vm0, %v2449_v51  ;;  %vm11733_vm10 = vmmov %vm11729_vm13  ;;  %v2458_v40 = vrot.slane %v2067_v0, 3 }
 0x132   : > { %6969 = vmatmul.mubr.msk.bf16.gmra.mxu1 %vm11718_vm5, %v1743_v56  ;;  %v2453_v10 = vsel %vm11733_vm10, %v2448_v34, %v2452_v18  ;;  %v2459_v53 = vrot.slane %v2070_v25, 4  ;;  %v703_v15 = vmax.f32 %v663_v22, 0.0  ;;  %v655_v63 = vadd.f32 %v8459_v57, %v654_v33  ;;  %vm11734_vm3 = vmmov %vm11732_vm0  ;;  %v6943_v34 = vpop.f32.mrf.mxu0 }
 0x133   : > { %v1383_v59 = vsel %vm9179_vm7, %v698_v39, 0.0  ;;  %7036 = vmatprep.mubr.msk.bf16.mxu0 %vm11734_vm3, %v2453_v10  ;;  %v1744_v29 = vrot.slane %v9283_v13, 3  ;;  %1574 = vst.msk [vmem:[#allocation2 + $0x8c] sm:$0xf] %vm11723_vm4, %v6533_v4  ;;  %v2456_v60 = vor.u32 %v2455_v44, %v2454_v48  ;;  %v2076_v8 = vshrl.u32 %v9060_v46, 16  ;;  %vm11735_vm7 = vmmov %vm11730_vm6 }
 0x134   : > { %v6531_v21 = vpack.c.bf16 %v1383_v59, %v1383_v59  ;;  %v2079_v23 = vshll.u32 %v9060_v46, 16  ;;  %v1388_v31 = vsel %vm9209_vm8, %v703_v15, 0.0  ;;  %v701_v11 = vmax.f32 %v655_v63, 0.0  ;;  %v9306_v5 = vld [vmem:[#allocation2 + $0x74] sm:$0xff]   ;;  %vm11736_vm12 = vmmov %vm11723_vm4  ;;  %v657_v2 = vpop.f32.mrf.mxu0 }
 0x135   : > { %v666_v38 = vadd.f32 %v6943_v34, %v8459_v57  ;;  %v1745_v61 = vsel %vm11735_vm7, %v1742_v41, %v1744_v29  ;;  %v6536_v32 = vpack.c.bf16 %v1388_v31, %v1388_v31  ;;  %vm11737_vm2 = vmmov %vm11732_vm0  ;;  %v2460_v51 = vor.u32 %v2459_v53, %v2458_v40  ;;  %v7570_v57 = vld [vmem:[%s11264_s2] ss:$0 sm:$0xff]  ;;  %v11746_v59 = vld [vmem:[#allocation4_spill] sm:$0xff] }
 0x136   : > { %1572 = vst.msk [vmem:[#allocation2 + $0x84] sm:$0xf] %vm11736_vm12, %v6531_v21  ;;  %6972 = vmatprep.mubr.msk.bf16.mxu1 %vm11737_vm2, %v1745_v61  ;;  %v2085_v48 = vshrl.u32 %v9109_v3, 16  ;;  %v2088_v44 = vshll.u32 %v9109_v3, 16  ;;  %v1386_v26 = vsel %vm9231_vm1, %v701_v11, 0.0  ;;  %v658_v41 = vadd.f32 %v7570_v57, %v657_v2  ;;  %vm11738_vm8 = vmmov %vm11723_vm4 }
 0x137   : > { %v704_v16 = vmax.f32 %v666_v38, 0.0  ;;  %v1746_v39 = vrot.slane %v9306_v5, 3  ;;  %1577 = vst.msk [vmem:[#allocation2 + $0x98] sm:$0xf] %vm11738_vm8, %v6536_v32  ;;  %v6534_v22 = vpack.c.bf16 %v1386_v26, %v1386_v26  ;;  %vm1351_vm15 = vcmp.lt.s32.totalorder %v1315_v28, 16  ;;  %vm11739_vm13 = vmmov %vm11733_vm10 }
 0x138   : > { %v2457_v55 = vsel %vm11739_vm13, %v2452_v18, %v2456_v60  ;;  %v2462_v56 = vrot.slane %v2076_v8, 3  ;;  %v702_v33 = vmax.f32 %v658_v41, 0.0  ;;  %vm11740_vm1 = vmmov %vm11730_vm6  ;;  %v9330_v40 = vld [vmem:[#allocation2 + $0x7c] sm:$0xff]   ;;  %v2463_v54 = vrot.slane %v2079_v23, 4 }
 0x139   : > { %v1389_v4 = vsel %vm9261_vm14, %v704_v16, 0.0  ;;  %v1747_v10 = vsel %vm11740_vm1, %v1744_v29, %v1746_v39  ;;  %vm11741_vm6 = vmmov %vm11723_vm4  ;;  %v2466_v28 = vrot.slane %v2085_v48, 3  ;;  %v2467_v14 = vrot.slane %v2088_v44, 4 }
 0x13a   : > { %1575 = vst.msk [vmem:[#allocation2 + $0x90] sm:$0xf] %vm11741_vm6, %v6534_v22  ;;  %v6537_v62 = vpack.c.bf16 %v1389_v4, %v1389_v4  ;;  %vm11742_vm9 = vmmov %vm11732_vm0  ;;  %v1387_v18 = vsel %vm1351_vm15, %v702_v33, 0.0  ;;  %v1748_v53 = vrot.slane %v9330_v40, 3  ;;  %v2005_v15 = vshrl.u32 %v11746_v59, 16 }
 0x13b   : > { %6973 = vmatmul.mubr.msk.bf16.gmra.mxu1 %vm11742_vm9, %v1747_v10  ;;  %vm11743_vm11 = vmmov %vm11732_vm0  ;;  %v6535_v63 = vpack.c.bf16 %v1387_v18, %v1387_v18  ;;  %v2008_v29 = vshll.u32 %v11746_v59, 16  ;;  %v2094_v31 = vshrl.u32 %v9151_v52, 16  ;;  %v2097_v11 = vshll.u32 %v9151_v52, 16  ;;  %v2794_v52 = vld [vmem:[#allocation2 + $0x1c] sm:$0xf] }
 0x13c   : > { %7037 = vmatmul.mubr.msk.bf16.gmra.mxu0 %vm11743_vm11, %v2457_v55  ;;  %vm11744_vm5 = vmmov %vm11733_vm10  ;;  %v2468_v38 = vor.u32 %v2467_v14, %v2466_v28  ;;  %v2103_v61 = vshrl.u32 %v9194_v43, 16  ;;  %v2106_v32 = vshll.u32 %v9194_v43, 16  ;;  %v2007_v26 = vrot.slane %v2005_v15, 2 }
 0x13d   : > { %v2461_v7 = vsel %vm11744_vm5, %v2456_v60, %v2460_v51  ;;  %vm11745_vm14 = vmmov %vm11732_vm0  ;;  %v9348_v34 = vld [vmem:[#allocation2 + $0x84] sm:$0xff]   ;;  %v2464_v60 = vor.u32 %v2463_v54, %v2462_v56  ;;  %v2010_v16 = vrot.slane %v2008_v29, 3  ;;  %v2015_v57 = vrot.slane %v2013_v47, 2 }
 0x13e   : > { %7040 = vmatprep.mubr.msk.bf16.mxu0 %vm11745_vm14, %v2461_v7  ;;  %vm11747_vm0 = vmmov %vm11723_vm4  ;;  %v1750_v2 = vrot.slane %v9348_v34, 3  ;;  %v2470_v55 = vrot.slane %v2094_v31, 3  ;;  %v2471_v56 = vrot.slane %v2097_v11, 4  ;;  %v11755_v47 = vshll.u32 %v8700_v17, 16 }
 0x13f   : > { %1578 = vst.msk [vmem:[#allocation2 + $0x9c] sm:$0xf] %vm11747_vm0, %v6537_v62  ;;  %vm11748_vm10 = vmmov %vm11740_vm1  ;;  %v2475_v10 = vrot.slane %v2106_v32, 4  ;;  %v2112_v62 = vshrl.u32 %v9247_v27, 16  ;;  %v2115_v7 = vshll.u32 %v9247_v27, 16  ;;  %v2011_v18 = vor.u32 %v2010_v16, %v2007_v26 }
 0x140   : > { %v1749_v21 = vsel %vm11748_vm10, %v1746_v39, %v1748_v53  ;;  %vm11749_vm3 = vmmov %vm11747_vm0  ;;  %v2018_v33 = vrot.slane %v11755_v47, 3  ;;  %v2472_v17 = vor.u32 %v2471_v56, %v2470_v55  ;;  %vm2003_vm9 = vsmask.f32 5376 }
 0x141   : > { %1576 = vst.msk [vmem:[#allocation2 + $0x94] sm:$0xf] %vm11749_vm3, %v6535_v63  ;;  %vm11750_vm4 = vmmov %vm11737_vm2  ;;  %v9361_v22 = vld [vmem:[#allocation2 + $0x8c] sm:$0xff]   ;;  %v2121_v63 = vshrl.u32 %v9283_v13, 16  ;;  %v2124_v29 = vshll.u32 %v9283_v13, 16  ;;  %v2479_v26 = vrot.slane %v2115_v7, 4 }
 0x142   : > { %6976 = vmatprep.mubr.msk.bf16.mxu1 %vm11750_vm4, %v1749_v21  ;;  %vm11751_vm7 = vmmov %vm11740_vm1  ;;  %v1752_v54 = vrot.slane %v9361_v22, 3  ;;  %v11758_v21 = vshrl.u32 %v8753_v37, 16  ;;  %v2096_v3 = vrot.slane %v2094_v31, 2  ;;  %v9518_v31 = vld [vmem:[#allocation2 + $0x28] sm:$0xff]   ;;  %v2114_v43 = vrot.slane %v2112_v62, 2 }
 0x143   : > { %v1751_v41 = vsel %vm11751_vm7, %v1748_v53, %v1750_v2  ;;  %vm11752_vm12 = vmmov %vm11744_vm5  ;;  %v2019_v53 = vor.u32 %v2018_v33, %v2015_v57  ;;  %v2473_v57 = vsel %vm11744_vm5, %v2468_v38, %v2472_v17  ;;  %v2483_v47 = vrot.slane %v2124_v29, 4  ;;  %v9547_v13 = vld [vmem:[%s11265_s3 + $0x88] sm:$0xff]  }
 0x144   : > { %v2465_v39 = vsel %vm11752_vm12, %v2460_v51, %v2464_v60  ;;  %6977 = vmatmul.mubr.msk.bf16.gmra.mxu1 %vm11737_vm2, %v1751_v41  ;;  %vm11753_vm8 = vmmov %vm11737_vm2  ;;  %v2474_v51 = vrot.slane %v2103_v61, 3  ;;  %v1753_v28 = vsel %vm11740_vm1, %v1750_v2, %v1752_v54  ;;  %v11759_v2 = vshll.u32 %v8753_v37, 16 }
 0x145   : > { %7041 = vmatmul.mubr.msk.bf16.gmra.mxu0 %vm11753_vm8, %v2465_v39  ;;  %vm11754_vm15 = vmmov %vm11744_vm5  ;;  %v2478_v39 = vrot.slane %v2112_v62, 3  ;;  %v2020_v55 = vsel %vm2003_vm9, %v2011_v18, %v2019_v53  ;;  %v2033_v37 = vrot.slane %v2031_v1, 2  ;;  %v2139_v1 = vshrl.u32 %v9330_v40, 16 }
 0x146   : > { %v2469_v4 = vsel %vm11754_vm15, %v2464_v60, %v2468_v38  ;;  %vm11756_vm13 = vmmov %vm11737_vm2  ;;  %v2476_v59 = vor.u32 %v2475_v10, %v2474_v51  ;;  %v2024_v60 = vrot.slane %v11758_v21, 2  ;;  %v2027_v41 = vrot.slane %v11759_v2, 3 }
 0x147   : > { %7044 = vmatprep.mubr.msk.bf16.mxu0 %vm11756_vm13, %v2469_v4  ;;  %vm11757_vm6 = vmmov %vm11737_vm2  ;;  %v2036_v4 = vrot.slane %v2034_v45, 3  ;;  %v2482_v38 = vrot.slane %v2121_v63, 3  ;;  %v2480_v51 = vor.u32 %v2479_v26, %v2478_v39  ;;  %v2130_v10 = vshrl.u32 %v9306_v5, 16 }
 0x148   : > { %v9381_v14 = vld [vmem:[#allocation2 + $0x94] ss:$0 sps:$4 sm:$0x77]   ;;  %6980 = vmatprep.mubr.msk.bf16.mxu1 %vm11757_vm6, %v1753_v28  ;;  %vm11760_vm11 = vmmov %vm11740_vm1  ;;  %v2028_v33 = vor.u32 %v2027_v41, %v2024_v60  ;;  %v2142_v45 = vshll.u32 %v9330_v40, 16  ;;  %v2042_v18 = vrot.slane %v2040_v6, 2  ;;  %v2051_v2 = vrot.slane %v2049_v35, 2 }
 0x149   : > { %v1754_v15 = vrot.slane %v9381_v14, 3  ;;  %vm11761_vm14 = vmmov %vm11737_vm2  ;;  %v2037_v9 = vor.u32 %v2036_v4, %v2033_v37  ;;  %v7487_v28 = vld [vmem:[%s11265_s3 + $0x30] sm:$0xff]   ;;  %v2054_v41 = vrot.slane %v2052_v50, 3  ;;  %v2486_v39 = vrot.slane %v2130_v10, 3  ;;  %v9444_v50 = vld [vmem:[%s11265_s3 + $0x58] sm:$0xff]  }
 0x14a   : > { %vm11762_vm0 = vmmov %vm11737_vm2  ;;  %v2029_v21 = vsel %vm2003_vm9, %v2019_v53, %v2028_v33  ;;  %v2490_v30 = vrot.slane %v2139_v1, 3  ;;  %v2148_v6 = vshrl.u32 %v9348_v34, 16  ;;  %v2491_v49 = vrot.slane %v2142_v45, 4 }
 0x14b   : > { %v1755_v16 = vsel %vm11760_vm11, %v1752_v54, %v1754_v15  ;;  %vm11763_vm10 = vmmov %vm11744_vm5  ;;  %v2133_v54 = vshll.u32 %v9306_v5, 16  ;;  %v2045_v15 = vrot.slane %v2043_v19, 3  ;;  %v2038_v19 = vsel %vm2003_vm9, %v2028_v33, %v2037_v9  ;;  %v2790_v5 = vld [vmem:[#allocation2 + $0xc] sm:$0x8] }
 0x14c   : > { %6981 = vmatmul.mubr.msk.bf16.gmra.mxu1 %vm11761_vm14, %v1755_v16  ;;  %v2477_v56 = vsel %vm11763_vm10, %v2472_v17, %v2476_v59  ;;  %vm11764_vm3 = vmmov %vm11762_vm0  ;;  %v2484_v17 = vor.u32 %v2483_v47, %v2482_v38  ;;  %v2151_v35 = vshll.u32 %v9348_v34, 16  ;;  %v2063_v16 = vrot.slane %v2061_v12, 3  ;;  %v7479_v47 = vld [vmem:[#allocation2 + $0x94] ss:$0 sps:$4 sm:$0xff]  }
 0x14d   : > { %7045 = vmatmul.mubr.msk.bf16.gmra.mxu0 %vm11762_vm0, %v2473_v57  ;;  %6988 = vmatprep.mubr.msk.bf16.mxu1 %vm11764_vm3, %v2020_v55  ;;  %vm11765_vm4 = vmmov %vm11762_vm0  ;;  %v2487_v26 = vrot.slane %v2133_v54, 4  ;;  %v2157_v57 = vshrl.u32 %v9361_v22, 16  ;;  %v2160_v55 = vshll.u32 %v9361_v22, 16  ;;  %v2069_v4 = vrot.slane %v2067_v0, 2 }
 0x14e   : > { %7048 = vmatprep.mubr.msk.bf16.mxu0 %vm11765_vm4, %v2477_v56  ;;  %vm11766_vm7 = vmmov %vm11744_vm5  ;;  %v2046_v56 = vor.u32 %v2045_v15, %v2042_v18  ;;  %v2055_v38 = vor.u32 %v2054_v41, %v2051_v2  ;;  %v2495_v58 = vrot.slane %v2151_v35, 4  ;;  %v2072_v12 = vrot.slane %v2070_v25, 3 }
 0x14f   : > { %v2481_v60 = vsel %vm11766_vm7, %v2476_v59, %v2480_v51  ;;  %vm11767_vm12 = vmmov %vm11762_vm0  ;;  %v2060_v59 = vrot.slane %v2058_v36, 2  ;;  %v2488_v37 = vor.u32 %v2487_v26, %v2486_v39  ;;  %v2492_v36 = vor.u32 %v2491_v49, %v2490_v30 }
 0x150   : > { %vm11768_vm2 = vmmov %vm11762_vm0  ;;  %v2159_v22 = vrot.slane %v2157_v57, 2  ;;  %v2162_v33 = vrot.slane %v2160_v55, 3  ;;  %v2166_v0 = vshrl.u32 %v9381_v14, 16  ;;  %v2169_v15 = vshll.u32 %v9381_v14, 16 }
 0x151   : > { %vm11769_vm8 = vmmov %vm11762_vm0  ;;  %v2056_v24 = vsel %vm2003_vm9, %v2046_v56, %v2055_v38  ;;  %v2503_v41 = vshrl.u32 %v7479_v47, 16  ;;  %v2506_v14 = vshll.u32 %v7479_v47, 16  ;;  %v2073_v30 = vor.u32 %v2072_v12, %v2069_v4 }
 0x152   : > { %vm11770_vm15 = vmmov %vm11744_vm5  ;;  %v9475_v39 = vor.u32 %v2162_v33, %v2159_v22  ;;  %v2087_v4 = vrot.slane %v2085_v48, 2  ;;  %v2105_v33 = vrot.slane %v2103_v61, 2  ;;  %v4390_v62 = vshrl.u32 %v9518_v31, 16 }
 0x153   : > { %v2485_v53 = vsel %vm11770_vm15, %v2480_v51, %v2484_v17  ;;  %vm11771_vm13 = vmmov %vm11762_vm0  ;;  %v2047_v51 = vsel %vm2003_vm9, %v2037_v9, %v2046_v56  ;;  %v2168_v9 = vrot.slane %v2166_v0, 2  ;;  %v2508_v56 = vrot.slane %v2506_v14, 4  ;;  %v2796_v0 = vld [vmem:[#allocation2 + $0x24] sm:$0xf]  ;;  %v2798_v14 = vld [vmem:[#allocation2 + $0x2c] sm:$0xf] }
 0x154   : > { %6989 = vmatmul.mubr.msk.bf16.vlgmr.msra.gmra.mxu1 %vm11767_vm12, %v2029_v21  ;;  %vm11772_vm1 = vmmov %vm11744_vm5  ;;  %v2499_v21 = vrot.slane %v2160_v55, 4  ;;  %v5143_v27 = vrot.slane %v4390_v62, 1 }
 0x155   : > { %7049 = vmatmul.mubr.msk.bf16.gmra.mxu0 %vm11768_vm2, %v2481_v60  ;;  %7065 = vmatpush3.bf16.msra.mxu1 %v9240_v42  ;;  %v2494_v42 = vrot.slane %v2148_v6, 3  ;;  %v2489_v18 = vsel %vm11772_vm1, %v2484_v17, %v2488_v37  ;;  %vm11773_vm6 = vmmov %vm11762_vm0  ;;  %v2171_v17 = vrot.slane %v2169_v15, 3  ;;  %v2064_v60 = vor.u32 %v2063_v16, %v2060_v59  ;;  %v2793_v15 = vld [vmem:[#allocation2 + $0x18] sm:$0xf] }
 0x156   : > { %6992 = vmatprep.mubr.msk.bf16.mxu1 %vm11769_vm8, %v2038_v19  ;;  %7052 = vmatprep.mubr.msk.bf16.mxu0 %vm11771_vm13, %v2485_v53  ;;  %vm11774_vm11 = vmmov %vm11762_vm0  ;;  %v2081_v59 = vrot.slane %v2079_v23, 3  ;;  %v2505_v16 = vrot.slane %v2503_v41, 3 }
 0x157   : > { %7066 = vmatprep.subr.bf16.mxu1 %v7487_v28  ;;  %vm11775_vm5 = vmmov %vm11772_vm1  ;;  %v2496_v2 = vor.u32 %v2495_v58, %v2494_v42  ;;  %v2172_v26 = vor.u32 %v2171_v17, %v2168_v9  ;;  %v2065_v53 = vsel %vm2003_vm9, %v2055_v38, %v2064_v60  ;;  %v9497_v38 = vld [vmem:[#allocation2 + $0x14] sm:$0xf]  ;;  %v9499_v58 = vld [vmem:[#allocation2 + $0x10] sm:$0xf] }
 0x158   : > { %v2493_v25 = vsel %vm11775_vm5, %v2488_v37, %v2492_v36  ;;  %vm11776_vm14 = vmmov %vm11762_vm0  ;;  %v2074_v37 = vsel %vm2003_vm9, %v2064_v60, %v2073_v30  ;;  %v2509_v23 = vor.u32 %v2508_v56, %v2505_v16  ;;  %v6284_v12 = vcombine.low %v9499_v58, %v9497_v38  ;;  %v7523_v9 = vld [vmem:[%s11265_s3 + $0x60] sm:$0xff]  }
 0x159   : > { %7067 = vmatpush3.bf16.msra.mxu1 %v7487_v28  ;;  %v2498_v28 = vrot.slane %v2157_v57, 3  ;;  %v9479_v49 = vsel %vm2003_vm9, %v9475_v39, %v2172_v26  ;;  %v2078_v57 = vrot.slane %v2076_v8, 2  ;;  %vm11777_vm10 = vmmov %vm11772_vm1  ;;  %v2090_v8 = vrot.slane %v2088_v44, 3 }
 0x15a   : > { %7144 = vmatprep.subr.bf16.mxu1 %v9444_v50  ;;  %v2497_v55 = vsel %vm11777_vm10, %v2492_v36, %v2496_v2  ;;  %vm11778_vm3 = vmmov %vm11762_vm0  ;;  %v2099_v44 = vrot.slane %v2097_v11, 3  ;;  %v2123_v60 = vrot.slane %v2121_v63, 2  ;;  %v2141_v56 = vrot.slane %v2139_v1, 2  ;;  %v2801_v1 = vld [vmem:[#allocation2 + $0x38] sm:$0xf] }
 0x15b   : > { %v2500_v19 = vor.u32 %v2499_v21, %v2498_v28  ;;  %vm11779_vm4 = vmmov %vm11762_vm0  ;;  %v2082_v46 = vor.u32 %v2081_v59, %v2078_v57  ;;  %v2091_v36 = vor.u32 %v2090_v8, %v2087_v4  ;;  %v4386_v28 = vshll.u32 %v9518_v31, 16  ;;  %v2802_v4 = vld [vmem:[#allocation2 + $0x3c] sm:$0xf]  ;;  %v2804_v8 = vld [vmem:[#allocation2 + $0x44] sm:$0xf] }
 0x15c   : > { %6993 = vmatmul.mubr.msk.bf16.gmra.mxu1 %vm11773_vm6, %v2047_v51  ;;  %vm11780_vm7 = vmmov %vm11772_vm1  ;;  %v2108_v51 = vrot.slane %v2106_v32, 3  ;;  %v2100_v11 = vor.u32 %v2099_v44, %v2096_v3  ;;  %v2117_v32 = vrot.slane %v2115_v7, 3  ;;  %v2135_v59 = vrot.slane %v2133_v54, 3 }
 0x15d   : > { %7053 = vmatmul.mubr.msk.bf16.gmra.mxu0 %vm11774_vm11, %v2489_v18  ;;  %6996 = vmatprep.mubr.msk.bf16.mxu1 %vm11776_vm14, %v2056_v24  ;;  %v2501_v42 = vsel %vm11780_vm7, %v2496_v2, %v2500_v19  ;;  %vm11781_vm12 = vmmov %vm11762_vm0  ;;  %v2083_v47 = vsel %vm2003_vm9, %v2073_v30, %v2082_v46  ;;  %v2092_v22 = vsel %vm2003_vm9, %v2082_v46, %v2091_v36  ;;  %v2126_v2 = vrot.slane %v2124_v29, 3  ;;  %v2800_v29 = vld [vmem:[#allocation2 + $0x34] sm:$0xf]  ;;  %v2797_v30 = vld [vmem:[#allocation2 + $0x28] sm:$0xf] }
 0x15e   : > { %7056 = vmatprep.mubr.msk.bf16.mxu0 %vm11762_vm0, %v2493_v25  ;;  %vm11782_vm2 = vmmov %vm11762_vm0  ;;  %v2109_v18 = vor.u32 %v2108_v51, %v2105_v33  ;;  %v6285_v24 = vcombine.low %v2793_v15, %v2794_v52  ;;  %v2795_v25 = vld [vmem:[#allocation2 + $0x20] sm:$0xf]  ;;  %v2101_v61 = vsel %vm2003_vm9, %v2091_v36, %v2100_v11  ;;  %v5144_v7 = vrot.slane %v4386_v28, 2 }
 0x15f   : > { %vm11783_vm8 = vmmov %vm11772_vm1  ;;  %v6286_v21 = vcombine.low %v2795_v25, %v2796_v0  ;;  %v2118_v41 = vor.u32 %v2117_v32, %v2114_v43  ;;  %v2127_v63 = vor.u32 %v2126_v2, %v2123_v60  ;;  %v6248_v40 = vcombine.low %v2796_v0, %v2797_v30 }
 0x160   : > { %v2510_v48 = vsel %vm11783_vm8, %v2500_v19, %v2509_v23  ;;  %vm11784_vm15 = vmmov %vm11762_vm0  ;;  %v2110_v17 = vsel %vm2003_vm9, %v2100_v11, %v2109_v18  ;;  %v9549_v26 = vor.u32 %v5144_v7, %v5143_v27  ;;  %v2799_v19 = vld [vmem:[#allocation2 + $0x30] sm:$0xf]  ;;  %v6245_v23 = vcombine.low %v2790_v5, %v9499_v58  ;;  %v9584_v27 = vld [vmem:[#allocation2 + $0x58] sm:$0xf] }
 0x161   : > { %vm11785_vm13 = vmmov %vm11762_vm0  ;;  %v6288_v57 = vcombine.low %v2799_v19, %v2800_v29  ;;  %v2128_v16 = vsel %vm2003_vm9, %v2118_v41, %v2127_v63  ;;  %v2150_v3 = vrot.slane %v2148_v6, 2  ;;  %v6249_v51 = vcombine.low %v2798_v14, %v2799_v19  ;;  %v2807_v6 = vld [vmem:[#allocation2 + $0x50] sm:$0xf]  ;;  %v9586_v7 = vld [vmem:[#allocation2 + $0x5c] sm:$0xf] }
 0x162   : > { %vm11786_vm1 = vmmov %vm11762_vm0  ;;  %v2925_v11 = vshrl.u32 %v6245_v23, 16  ;;  %v9602_v5 = vld [vmem:[#allocation2 + $0x70] sm:$0xf] }
 0x163   : > { %vm11787_vm6 = vmmov %vm11762_vm0 }
 0x164   : > { %6997 = vmatmul.mubr.msk.bf16.gmra.mxu1 %vm11778_vm3, %v2065_v53  ;;  %vm11788_vm11 = vmmov %vm11762_vm0  ;;  %v2119_v53 = vsel %vm2003_vm9, %v2109_v18, %v2118_v41  ;;  %v2928_v18 = vshll.u32 %v6245_v23, 16  ;;  %v2927_v41 = vrot.slane %v2925_v11, 3  ;;  %v9647_v11 = vld [vmem:[#allocation2 + $0x1c] sm:$0xf] }
 0x165   : > { %7057 = vmatmul.mubr.msk.bf16.gmra.mxu0 %vm11779_vm4, %v2497_v55  ;;  %7000 = vmatprep.mubr.msk.bf16.mxu1 %vm11781_vm12, %v2074_v37  ;;  %vm11789_vm5 = vmmov %vm11762_vm0  ;;  %v2132_v55 = vrot.slane %v2130_v10, 2  ;;  %v2144_v37 = vrot.slane %v2142_v45, 3  ;;  %v6246_v10 = vcombine.low %v9497_v38, %v2793_v15  ;;  %v6289_v45 = vcombine.low %v2801_v1, %v2802_v4 }
 0x166   : > { %7060 = vmatprep.mubr.msk.bf16.mxu0 %vm11782_vm2, %v2501_v42  ;;  %vm11790_vm14 = vmmov %vm11762_vm0  ;;  %v6247_v42 = vcombine.low %v2794_v52, %v2795_v25  ;;  %v2153_v38 = vrot.slane %v2151_v35, 3  ;;  %v2806_v52 = vld [vmem:[#allocation2 + $0x4c] sm:$0xf]  ;;  %v2951_v35 = vshrl.u32 %v6248_v40, 16  ;;  %v2954_v15 = vshll.u32 %v6248_v40, 16 }
 0x167   : > { %vm11791_vm10 = vmmov %vm11762_vm0  ;;  %v2136_v54 = vor.u32 %v2135_v59, %v2132_v55  ;;  %v2145_v46 = vor.u32 %v2144_v37, %v2141_v56  ;;  %v2936_v33 = vshll.u32 %v6246_v10, 16  ;;  %v9582_v2 = vcombine.low %v2806_v52, %v2807_v6  ;;  %v9620_v40 = vld [vmem:[#allocation2 + $0x80] sm:$0xf] }
 0x168   : > { %vm11792_vm3 = vmmov %vm11762_vm0  ;;  %v2942_v36 = vshrl.u32 %v6247_v42, 16  ;;  %v2154_v25 = vor.u32 %v2153_v38, %v2150_v3  ;;  %v2956_v55 = vrot.slane %v2954_v15, 4  ;;  %v6293_v56 = vcombine.low %v9584_v27, %v9586_v7 }
 0x169   : > { %vm11793_vm4 = vmmov %vm11762_vm0  ;;  %v2137_v44 = vsel %vm2003_vm9, %v2127_v63, %v2136_v54  ;;  %v2146_v58 = vsel %vm2003_vm9, %v2136_v54, %v2145_v46  ;;  %v2938_v32 = vrot.slane %v2936_v33, 4  ;;  %v9588_v63 = vld [vmem:[#allocation2 + $0x60] sm:$0xf] }
 0x16a   : > { %vm11794_vm7 = vmmov %vm11762_vm0  ;;  %v2944_v0 = vrot.slane %v2942_v36, 3  ;;  %v2155_v59 = vsel %vm2003_vm9, %v2145_v46, %v2154_v25 }
 0x16b   : > { %vm11795_vm12 = vmmov %vm11762_vm0 }
 0x16c   : > { %7001 = vmatmul.mubr.msk.bf16.gmra.mxu1 %vm11784_vm15, %v2083_v47  ;;  %v2803_v47 = vld [vmem:[#allocation2 + $0x40] sm:$0xf]  ;;  %vm11796_vm2 = vmmov %vm11762_vm0 }
 0x16d   : > { %7061 = vmatmul.mubr.msk.bf16.gmra.mxu0 %vm11785_vm13, %v2510_v48  ;;  %7004 = vmatprep.mubr.msk.bf16.mxu1 %vm11786_vm1, %v2092_v22  ;;  %v6290_v48 = vcombine.low %v2803_v47, %v2804_v8  ;;  %v2933_v22 = vshrl.u32 %v6246_v10, 16  ;;  %vm11797_vm8 = vmmov %vm11762_vm0  ;;  %v9608_v10 = vcombine.low %v9586_v7, %v9588_v63 }
 0x16e   : > { %7108 = vmatprep.mubr.msk.bf16.mxu0 %vm11787_vm6, %v6284_v12  ;;  %v2945_v12 = vshll.u32 %v6247_v42, 16  ;;  %vm11798_vm15 = vmmov %vm11762_vm0  ;;  %v9600_v42 = vld [vmem:[#allocation2 + $0x6c] sm:$0xf] }
 0x16f   : > { %v2935_v43 = vrot.slane %v2933_v22, 3  ;;  %vm11799_vm13 = vmmov %vm11762_vm0  ;;  %v9632_v38 = vcombine.low %v9600_v42, %v9602_v5  ;;  %v9634_v22 = vld [vmem:[#allocation2 + $0x84] sm:$0xf] }
 0x170   : > { %v2947_v34 = vrot.slane %v2945_v12, 4  ;;  %vm11800_vm1 = vmmov %vm11762_vm0  ;;  %v9618_v12 = vld [vmem:[#allocation2 + $0x68] sm:$0xf] }
 0x171   : > { %v2939_v37 = vor.u32 %v2938_v32, %v2935_v43  ;;  %vm11802_vm6 = vmmov %vm11762_vm0  ;;  %v4236_v32 = vld [vmem:[#allocation2 + $0x18] sm:$0xf] }
 0x172   : > { %v2948_v54 = vor.u32 %v2947_v34, %v2944_v0 }
 0x174   : > { %7005 = vmatmul.mubr.msk.bf16.gmra.mxu1 %vm11788_vm11, %v2101_v61  ;;  %v2805_v61 = vld [vmem:[#allocation2 + $0x48] sm:$0xf]  ;;  %vm11803_vm11 = vsmask.f32 4352 }
 0x175   : > { %7109 = vmatmul.mubr.msk.bf16.vlgmr.msra.gmra.mxu0 %vm11789_vm5, %v6285_v24  ;;  %7008 = vmatprep.mubr.msk.bf16.mxu1 %vm11790_vm14, %v2110_v17  ;;  %v6250_v24 = vcombine.low %v2800_v29, %v2801_v1  ;;  %v9580_v17 = vcombine.low %v2804_v8, %v2805_v61  ;;  %v6291_v60 = vcombine.low %v2805_v61, %v2806_v52  ;;  %v2960_v29 = vshrl.u32 %v6249_v51, 16  ;;  %vm11804_vm5 = vmmov %vm11803_vm11 }
 0x176   : > { %7112 = vmatprep.mubr.msk.bf16.mxu0 %vm11762_vm0, %v6286_v21  ;;  %7185 = vmatpush3.bf16.msra.mxu0 %v9252_v20  ;;  %v6287_v20 = vcombine.low %v2797_v30, %v2798_v14  ;;  %v2808_v21 = vld [vmem:[#allocation2 + $0x54] sm:$0xf]  ;;  %v2930_v14 = vrot.slane %v2928_v18, 4  ;;  %v2963_v30 = vshll.u32 %v6249_v51, 16  ;;  %v2949_v18 = vsel %vm11804_vm5, %v2939_v37, %v2948_v54  ;;  %vm11805_vm14 = vmmov %vm11804_vm5 }
 0x177   : > { %7186 = vmatprep.subr.bf16.mxu0 %v7523_v9  ;;  %v9591_v19 = vcombine.low %v2808_v21, %v9584_v27  ;;  %v2969_v8 = vshrl.u32 %v6250_v24, 16  ;;  %v2972_v46 = vshll.u32 %v6250_v24, 16  ;;  %v2962_v1 = vrot.slane %v2960_v29, 3  ;;  %v9656_v24 = vld [vmem:[#allocation2 + $0x20] sm:$0xff]  }
 0x178   : > { %v2931_v23 = vor.u32 %v2930_v14, %v2927_v41  ;;  %v9669_v41 = vld [vmem:[#allocation2 + $0x90] sm:$0xf]  ;;  %v9672_v14 = vcombine.low %v4236_v32, %v9647_v11  ;;  %v2990_v29 = vshll.u32 %v9580_v17, 16 }
 0x179   : > { %v2971_v0 = vrot.slane %v2969_v8, 3  ;;  %v2974_v34 = vrot.slane %v2972_v46, 4 }
 0x17a   : > { %7187 = vmatpush3.bf16.msra.mxu0 %v7523_v9  ;;  %v9578_v9 = vcombine.low %v2802_v4, %v2803_v47  ;;  %v9610_v4 = vld [vmem:[#allocation2 + $0x74] sm:$0xf]  ;;  %v2965_v47 = vrot.slane %v2963_v30, 4  ;;  %v2940_v33 = vsel %vm11803_vm11, %v2931_v23, %v2939_v37  ;;  %v4373_v46 = vshll.u32 %v9672_v14, 16 }
 0x17b   : > { %7264 = vmatprep.subr.bf16.mxu0 %v9547_v13  ;;  %v6296_v51 = vcombine.low %v9602_v5, %v9610_v4  ;;  %v9676_v30 = vld [vmem:[#allocation2 + $0x94] sm:$0xf] }
 0x17c   : > { %7009 = vmatmul.mubr.msk.bf16.gmra.mxu1 %vm11791_vm10, %v2119_v53  ;;  %v9593_v53 = vld [vmem:[#allocation2 + $0x64] sm:$0xf]  ;;  %v2978_v43 = vshrl.u32 %v9578_v9, 16  ;;  %v2981_v7 = vshll.u32 %v9578_v9, 16  ;;  %vm11806_vm10 = vmmov %vm11762_vm0  ;;  %v3005_v9 = vshrl.u32 %v9591_v19, 16  ;;  %v9695_v37 = vld [vmem:[#allocation2 + $0x30] sm:$0xff]  }
 0x17d   : > { %7113 = vmatmul.mubr.msk.bf16.gmra.mxu0 %vm11792_vm3, %v6287_v20  ;;  %7012 = vmatprep.mubr.msk.bf16.mxu1 %vm11793_vm4, %v2128_v16  ;;  %v6292_v20 = vcombine.low %v2807_v6, %v2808_v21  ;;  %v2164_v16 = vsel %vm2003_vm9, %v2154_v25, %v9475_v39  ;;  %v9612_v39 = vld [vmem:[#allocation2 + $0x7c] sm:$0xf]  ;;  %vm11801_vm9 = vmmov %vm11762_vm0  ;;  %v6294_v36 = vcombine.low %v9588_v63, %v9593_v53  ;;  %v9645_v6 = vld [vmem:[#allocation2 + $0x8c] sm:$0xf]  ;;  %v2987_v63 = vshrl.u32 %v9580_v17, 16 }
 0x17e   : > { %7116 = vmatprep.mubr.msk.bf16.mxu0 %vm11794_vm7, %v6288_v57  ;;  %v2953_v57 = vrot.slane %v2951_v35, 3  ;;  %v9650_v35 = vld [vmem:[#allocation2 + $0x88] sm:$0xf]  ;;  %v9654_v15 = vcombine.low %v9612_v39, %v9620_v40  ;;  %v2966_v25 = vor.u32 %v2965_v47, %v2962_v1  ;;  %v6298_v21 = vcombine.low %v9620_v40, %v9634_v22  ;;  %vm11807_vm3 = vmmov %vm11762_vm0  ;;  %v9809_v40 = vld [vmem:[#allocation2 + $0x58] sm:$0xff]  }
 0x17f   : > { %v9660_v61 = vcombine.low %v9634_v22, %v9650_v35  ;;  %vm11808_vm4 = vmmov %vm11762_vm0  ;;  %v2989_v23 = vrot.slane %v2987_v63, 3  ;;  %v4394_v27 = vshll.u32 %v9695_v37, 16 }
 0x180   : > { %v2957_v3 = vor.u32 %v2956_v55, %v2953_v57  ;;  %v3008_v57 = vshll.u32 %v9591_v19, 16  ;;  %v4378_v55 = vshll.u32 %v9656_v24, 16  ;;  %vm11809_vm7 = vmmov %vm11804_vm5  ;;  %v2983_v19 = vrot.slane %v2981_v7, 4 }
 0x182   : > { %v9690_v17 = vsel %vm11809_vm7, %v2957_v3, %v2966_v25  ;;  %vm11823_vm7 = vmmov %vm11762_vm0 }
 0x184   : > { %7013 = vmatmul.mubr.msk.bf16.gmra.mxu1 %vm11795_vm12, %v2137_v44  ;;  %v9628_v44 = vld [vmem:[#allocation2 + $0x78] sm:$0xf]  ;;  %vm3808_vm12 = vsmask.f32 7424 }
 0x185   : > { %7117 = vmatmul.mubr.msk.bf16.gmra.mxu0 %vm11796_vm2, %v6289_v45  ;;  %7016 = vmatprep.mubr.msk.bf16.mxu1 %vm11797_vm8, %v2146_v58  ;;  %v9624_v45 = vcombine.low %v9593_v53, %v9618_v12  ;;  %v9639_v58 = vcombine.low %v9610_v4, %v9628_v44  ;;  %v6297_v52 = vcombine.low %v9628_v44, %v9612_v39  ;;  %v2999_v53 = vshll.u32 %v9582_v2, 16  ;;  %vm11810_vm2 = vmmov %vm11804_vm5 }
 0x186   : > { %7120 = vmatprep.mubr.msk.bf16.mxu0 %vm11798_vm15, %v6290_v48  ;;  %v6295_v48 = vcombine.low %v9618_v12, %v9600_v42  ;;  %vm11811_vm8 = vmmov %vm11762_vm0  ;;  %v4396_v42 = vrot.slane %v4394_v27, 1  ;;  %v9734_v12 = vld [vmem:[#allocation2 + $0x38] sm:$0xff]  }
 0x187   : > { %v3001_v47 = vrot.slane %v2999_v53, 4  ;;  %v3023_v32 = vshrl.u32 %v9624_v45, 16  ;;  %v3026_v7 = vshll.u32 %v9624_v45, 16  ;;  %v4382_v53 = vshrl.u32 %v9656_v24, 16  ;;  %vm11812_vm15 = vmmov %vm11762_vm0 }
 0x188   : > { %v4388_v45 = vrot.slane %v4386_v28, 1  ;;  %vm11817_vm11 = vmmov %vm11810_vm2  ;;  %v3044_v39 = vshll.u32 %v9639_v58, 16 }
 0x189   : > { %vm11818_vm5 = vmmov %vm11810_vm2 }
 0x18a   : > { %v4392_v4 = vor.u32 %v4390_v62, %v4388_v45  ;;  %v4402_v62 = vshll.u32 %v9734_v12, 16 }
 0x18c   : > { %7017 = vmatmul.mubr.msk.bf16.gmra.mxu1 %vm11799_vm13, %v2155_v59  ;;  %v3014_v59 = vshrl.u32 %v9608_v10, 16  ;;  %vm11813_vm13 = vmmov %vm11762_vm0  ;;  %v9775_v31 = vsel %vm3808_vm12, %v4392_v4, %v4396_v42 }
 0x18d   : > { %7121 = vmatmul.mubr.msk.bf16.gmra.mxu0 %vm11800_vm1, %v6291_v60  ;;  %7020 = vmatprep.mubr.msk.bf16.mxu1 %vm11801_vm9, %v2164_v16  ;;  %v2958_v60 = vsel %vm11805_vm14, %v2948_v54, %v2957_v3  ;;  %v2980_v16 = vrot.slane %v2978_v43, 3  ;;  %v9699_v54 = vcombine.low %v9645_v6, %v9669_v41  ;;  %v3007_v3 = vrot.slane %v3005_v9, 3  ;;  %v7526_v9 = vld [vmem:[%s11265_s3 + $0x50] sm:$0xff]   ;;  %vm11814_vm1 = vmmov %vm11762_vm0 }
 0x18e   : > { %7124 = vmatprep.mubr.msk.bf16.mxu0 %vm11802_vm6, %v6292_v20  ;;  %v2996_v20 = vshrl.u32 %v9582_v2, 16  ;;  %v2975_v2 = vor.u32 %v2974_v34, %v2971_v0  ;;  %v3016_v0 = vrot.slane %v3014_v59, 3  ;;  %v9708_v34 = vld [vmem:[#allocation2 + $0x9c] sm:$0xf]  ;;  %v6300_v59 = vcombine.low %v9669_v41, %v9676_v30  ;;  %vm11815_vm9 = vmmov %vm11810_vm2 }
 0x18f   : > { %vm11816_vm6 = vmmov %vm11810_vm2 }
 0x190   : > { %v2998_v1 = vrot.slane %v2996_v20, 3  ;;  %v2976_v63 = vsel %vm11810_vm2, %v2966_v25, %v2975_v2  ;;  %v4375_v20 = vrot.slane %v4373_v46, 1  ;;  %vm11819_vm14 = vmmov %vm11810_vm2 }
 0x194   : > { %7021 = vmatmul.mubr.msk.bf16.gmra.mxu1 %vm11762_vm0, %v9479_v49  ;;  %v9692_v49 = vld [vmem:[#allocation2 + $0x98] sm:$0xf] }
 0x195   : > { %7125 = vmatmul.mubr.msk.bf16.gmra.mxu0 %vm11806_vm10, %v6293_v56  ;;  %7068 = vmatprep.mubr.msk.bf16.mxu1 %vm11807_vm3, %v2940_v33  ;;  %v3017_v56 = vshll.u32 %v9608_v10, 16  ;;  %v9703_v8 = vcombine.low %v9676_v30, %v9692_v49  ;;  %v3010_v10 = vrot.slane %v3008_v57, 4  ;;  %v4380_v33 = vrot.slane %v4378_v55, 1  ;;  %vm11821_vm10 = vmmov %vm11762_vm0 }
 0x196   : > { %7128 = vmatprep.mubr.msk.bf16.mxu0 %vm11808_vm4, %v6294_v36  ;;  %v2992_v36 = vrot.slane %v2990_v29, 4  ;;  %v2984_v29 = vor.u32 %v2983_v19, %v2980_v16  ;;  %v6301_v25 = vcombine.low %v9692_v49, %v9708_v34  ;;  %v4371_v19 = vshrl.u32 %v9672_v14, 16  ;;  %vm11822_vm4 = vmmov %vm11762_vm0 }
 0x197   : > { %v3019_v43 = vrot.slane %v3017_v56, 4  ;;  %v3002_v56 = vor.u32 %v3001_v47, %v2998_v1  ;;  %v3011_v16 = vor.u32 %v3010_v10, %v3007_v3  ;;  %v4384_v46 = vor.u32 %v4382_v53, %v4380_v33  ;;  %v9750_v1 = vld [vmem:[%s11265_s3 + $0x78] sm:$0xff]  }
 0x198   : > { %v2993_v57 = vor.u32 %v2992_v36, %v2989_v23  ;;  %v4797_v23 = vld [vmem:[#allocation2 + $0x18] sm:$0xe]  ;;  %v3025_v36 = vrot.slane %v3023_v32, 3  ;;  %v3032_v14 = vshrl.u32 %v9632_v38, 16  ;;  %v4398_v10 = vshrl.u32 %v9695_v37, 16 }
 0x199   : > { %v3020_v28 = vor.u32 %v3019_v43, %v3016_v0  ;;  %v9768_v3 = vsel %vm3808_vm12, %v4384_v46, %v4388_v45  ;;  %v5139_v45 = vrot.slane %v4382_v53, 1  ;;  %vm5130_vm3 = vsmask.f32 6400  ;;  %v9806_v53 = vld [vmem:[#allocation2 + $0x50] sm:$0xff]  }
 0x19a   : > { %v9753_v47 = vsel %vm11816_vm6, %v2984_v29, %v2993_v57  ;;  %v9756_v5 = vsel %vm11817_vm11, %v2993_v57, %v3002_v56  ;;  %v3034_v32 = vrot.slane %v3032_v14, 3  ;;  %v11348_v37 = vshrl.u32 %v9806_v53, 16  ;;  %vm11830_vm6 = vmmov %vm11762_vm0 }
 0x19b   : > { %v9772_v0 = vsel %vm11819_vm14, %v3011_v16, %v3020_v28  ;;  %vm11831_vm11 = vmmov %vm11762_vm0 }
 0x19c   : > { %7069 = vmatmul.mubr.msk.bf16.vlgmr.msra.gmra.mxu1 %vm11811_vm8, %v2949_v18  ;;  %v3028_v18 = vrot.slane %v3026_v7, 4  ;;  %v9778_v7 = vld [vmem:[#allocation2 + $0x40] sm:$0xff]   ;;  %vm11824_vm8 = vmmov %vm11762_vm0 }
 0x19d   : > { %7129 = vmatmul.mubr.msk.bf16.gmra.mxu0 %vm11812_vm15, %v6295_v48  ;;  %7145 = vmatpush3.bf16.msra.mxu1 %v9444_v50  ;;  %v9741_v48 = vsel %vm11815_vm9, %v2975_v2, %v2984_v29  ;;  %v4376_v50 = vor.u32 %v4375_v20, %v4371_v19  ;;  %vm11826_vm15 = vmmov %vm11762_vm0 }
 0x19e   : > { %7072 = vmatprep.mubr.msk.bf16.mxu1 %vm11813_vm13, %v2958_v60  ;;  %7132 = vmatprep.mubr.msk.bf16.mxu0 %vm11814_vm1, %v6296_v51  ;;  %v9744_v60 = vcombine.low %v4797_v23, %v9647_v11  ;;  %v3035_v51 = vshll.u32 %v9632_v38, 16  ;;  %v9762_v11 = vsel %vm11818_vm5, %v3002_v56, %v3011_v16  ;;  %v3029_v43 = vor.u32 %v3028_v18, %v3025_v36  ;;  %vm11827_vm13 = vmmov %vm11810_vm2 }
 0x19f   : > { %7146 = vmatprep.subr.bf16.mxu1 %v7526_v9  ;;  %v9765_v2 = vsel %vm3808_vm12, %v4376_v50, %v4380_v33  ;;  %v4400_v38 = vor.u32 %v4398_v10, %v4396_v42  ;;  %v9780_v33 = vld [vmem:[#allocation2 + $0x48] sm:$0xff]   ;;  %v4406_v56 = vshrl.u32 %v9734_v12, 16  ;;  %v3041_v16 = vshrl.u32 %v9639_v58, 16  ;;  %vm11828_vm1 = vmmov %vm11762_vm0 }
 0x1a0   : > { %11820 = vst [vmem:[#allocation12_spill] sm:$0xff] %v9780_v33  ;;  %v5132_v29 = vshrl.u32 %v9744_v60, 16  ;;  %v5135_v20 = vshll.u32 %v9744_v60, 16  ;;  %v3037_v57 = vrot.slane %v3035_v51, 4  ;;  %v9801_v24 = vsel %vm11810_vm2, %v3020_v28, %v3029_v43  ;;  %vm11829_vm9 = vmmov %vm11762_vm0 }
 0x1a1   : > { %7147 = vmatpush3.bf16.msra.mxu1 %v7526_v9  ;;  %v5140_v9 = vrot.slane %v4378_v55, 2  ;;  %v4404_v55 = vrot.slane %v4402_v62, 1  ;;  %v5151_v36 = vrot.slane %v4406_v56, 1  ;;  %v5148_v58 = vrot.slane %v4394_v27, 2  ;;  %vm11832_vm5 = vmmov %vm11762_vm0 }
 0x1a2   : > { %7224 = vmatprep.subr.bf16.mxu1 %v9750_v1  ;;  %v5134_v19 = vrot.slane %v5132_v29, 1  ;;  %v5137_v46 = vrot.slane %v5135_v20, 2  ;;  %v9817_v28 = vor.u32 %v3037_v57, %v3034_v32  ;;  %v3043_v18 = vrot.slane %v3041_v16, 3  ;;  %v9830_v32 = vld [vmem:[#allocation2 + $0x60] sm:$0xff]   ;;  %v9833_v20 = vld [vmem:[#allocation2 + $0x68] sm:$0xff]   ;;  %vm11833_vm14 = vmmov %vm11762_vm0 }
 0x1a3   : > { %v5141_v44 = vor.u32 %v5140_v9, %v5139_v45  ;;  %v3050_v42 = vshrl.u32 %v9654_v15, 16  ;;  %v9824_v50 = vsel %vm3808_vm12, %v4400_v38, %v4404_v55  ;;  %v4418_v14 = vshll.u32 %v9780_v33, 16 }
 0x1a4   : > { %7073 = vmatmul.mubr.msk.bf16.gmra.mxu1 %vm11762_vm0, %v9690_v17  ;;  %v4414_v17 = vshrl.u32 %v9778_v7, 16  ;;  %v5138_v23 = vor.u32 %v5137_v46, %v5134_v19  ;;  %v5152_v51 = vrot.slane %v4402_v62, 2  ;;  %v11345_v29 = vshrl.u32 %v9809_v40, 16  ;;  %vm11834_vm0 = vmmov %vm11810_vm2 }
 0x1a5   : > { %7133 = vmatmul.mubr.msk.bf16.gmra.mxu0 %vm11821_vm10, %v6297_v52  ;;  %7076 = vmatprep.mubr.msk.bf16.mxu1 %vm11822_vm4, %v2976_v63  ;;  %v4410_v52 = vshll.u32 %v9778_v7, 16  ;;  %v11353_v63 = vshrl.u32 %v9780_v33, 16  ;;  %v9813_v22 = vsel %vm5130_vm3, %v5141_v44, %v9549_v26  ;;  %v3046_v7 = vrot.slane %v3044_v39, 4  ;;  %vm11835_vm10 = vmmov %vm11828_vm1 }
 0x1a6   : > { %7136 = vmatprep.mubr.msk.bf16.mxu0 %vm11823_vm7, %v6298_v21  ;;  %v5147_v21 = vrot.slane %v4398_v10, 1  ;;  %v9821_v12 = vsel %vm5130_vm3, %v5138_v23, %v5141_v44  ;;  %v4408_v10 = vor.u32 %v4406_v56, %v4404_v55  ;;  %v5153_v57 = vor.u32 %v5152_v51, %v5151_v36  ;;  %vm11836_vm4 = vmmov %vm11828_vm1 }
 0x1a7   : > { %v5159_v27 = vrot.slane %v11353_v63, 1  ;;  %v5155_v45 = vrot.slane %v4414_v17, 1  ;;  %v11825_v62 = vcombine.low %v9650_v35, %v9645_v6  ;;  %v9847_v56 = vsel %vm11827_vm13, %v3029_v43, %v9817_v28  ;;  %vm11837_vm7 = vmmov %vm11828_vm1 }
 0x1a8   : > { %v5149_v4 = vor.u32 %v5148_v58, %v5147_v21  ;;  %v4412_v9 = vrot.slane %v4410_v52, 1  ;;  %v4426_v16 = vshll.u32 %v9806_v53, 16  ;;  %v5156_v19 = vrot.slane %v4410_v52, 2  ;;  %vm11838_vm2 = vmmov %vm11828_vm1 }
 0x1a9   : > { %v11351_v6 = vshll.u32 %v9809_v40, 16  ;;  %v9864_v43 = vor.u32 %v3046_v7, %v3043_v18  ;;  %v3053_v46 = vshll.u32 %v9654_v15, 16  ;;  %v5167_v41 = vrot.slane %v11345_v29, 1  ;;  %v9879_v15 = vld [vmem:[#allocation2 + $0x70] sm:$0xff]   ;;  %vm11846_vm13 = vmmov %vm11828_vm1 }
 0x1aa   : > { %v9837_v38 = vsel %vm5130_vm3, %v9549_v26, %v5149_v4  ;;  %v9856_v26 = vrot.slane %v3050_v42, 3  ;;  %v9860_v35 = vsel %vm5130_vm3, %v5149_v4, %v5153_v57  ;;  %v5157_v55 = vor.u32 %v5156_v19, %v5155_v45  ;;  %v9889_v42 = vld [vmem:[#allocation2 + $0x88] sm:$0xff]  }
 0x1ab   : > { %v11342_v30 = vshrl.u32 %v9833_v20, 16  ;;  %v5163_v44 = vrot.slane %v11348_v37, 1  ;;  %v9876_v52 = vsel %vm3808_vm12, %v4408_v10, %v4412_v9  ;;  %v11346_v23 = vshll.u32 %v9830_v32, 16 }
 0x1ac   : > { %7077 = vmatmul.mubr.msk.bf16.gmra.mxu1 %vm11824_vm8, %v9741_v48  ;;  %v5160_v48 = vrot.slane %v4418_v14, 2  ;;  %v9882_v36 = vsel %vm5130_vm3, %v5153_v57, %v5157_v55  ;;  %v5164_v21 = vrot.slane %v4426_v16, 2  ;;  %v9886_v58 = vor.u32 %v4414_v17, %v4412_v9  ;;  %v9900_v57 = vld [vmem:[#allocation2 + $0x80] sm:$0xff]  }
 0x1ad   : > { %7137 = vmatmul.mubr.msk.bf16.gmra.mxu0 %vm11826_vm15, %v11825_v62  ;;  %7080 = vmatprep.mubr.msk.bf16.mxu1 %vm11828_vm1, %v9753_v47  ;;  %v11343_v47 = vshrl.u32 %v9830_v32, 16  ;;  %v11344_v18 = vshll.u32 %v9833_v20, 16  ;;  %v5168_v51 = vrot.slane %v11351_v6, 2  ;;  %v9896_v7 = vrot.slane %v3053_v46, 4  ;;  %v9915_v46 = vld [vmem:[#allocation2 + $0x90] sm:$0xff]   ;;  %vm11845_vm15 = vmmov %vm11828_vm1 }
 0x1ae   : > { %7140 = vmatprep.mubr.msk.bf16.mxu0 %vm11829_vm9, %v6300_v59  ;;  %v9871_v59 = vld [vmem:[#allocation2 + $0x78] sm:$0xff]   ;;  %v5161_v39 = vor.u32 %v5160_v48, %v5159_v27  ;;  %v3059_v10 = vshrl.u32 %v9660_v61, 16  ;;  %v3062_v27 = vshll.u32 %v9660_v61, 16  ;;  %v5165_v17 = vor.u32 %v5164_v21, %v5163_v44  ;;  %vm11849_vm9 = vmmov %vm11828_vm1 }
 0x1af   : > { %v5175_v45 = vrot.slane %v11342_v30, 1  ;;  %v11347_v62 = vshrl.u32 %v9871_v59, 16  ;;  %v5169_v9 = vor.u32 %v5168_v51, %v5167_v41  ;;  %v5171_v19 = vrot.slane %v11343_v47, 1 }
 0x1b0   : > { %v9892_v4 = vsel %vm5130_vm3, %v5157_v55, %v5161_v39  ;;  %v11350_v61 = vshll.u32 %v9879_v15, 16  ;;  %v11349_v48 = vshrl.u32 %v9879_v15, 16  ;;  %v9918_v55 = vsel %vm5130_vm3, %v5161_v39, %v5165_v17 }
 0x1b1   : > { %v5172_v41 = vrot.slane %v11346_v23, 2  ;;  %v11354_v49 = vshll.u32 %v9871_v59, 16  ;;  %v9931_v44 = vsel %vm5130_vm3, %v5165_v17, %v5169_v9  ;;  %v5176_v39 = vrot.slane %v11344_v18, 2  ;;  %v9949_v18 = vld [vmem:[#allocation2 + $0xa0] sm:$0xff]  }
 0x1b2   : > { %v9938_v21 = vsel %vm11834_vm0, %v9817_v28, %v9864_v43  ;;  %v9944_v30 = vrot.slane %v4418_v14, 1  ;;  %v5183_v17 = vrot.slane %v11347_v62, 1  ;;  %v11365_v47 = vshll.u32 %v9889_v42, 16 }
 0x1b3   : > { %v5173_v51 = vor.u32 %v5172_v41, %v5171_v19  ;;  %v5177_v29 = vor.u32 %v5176_v39, %v5175_v45  ;;  %v11358_v28 = vshrl.u32 %v9915_v46, 16  ;;  %v5179_v19 = vrot.slane %v11349_v48, 1 }
 0x1b4   : > { %7081 = vmatmul.mubr.msk.bf16.gmra.mxu1 %vm11830_vm6, %v9756_v5  ;;  %v9928_v5 = vld [vmem:[#allocation2 + $0x98] sm:$0xff]   ;;  %v5180_v14 = vrot.slane %v11350_v61, 2  ;;  %v5184_v45 = vrot.slane %v11354_v49, 2  ;;  %v5192_v49 = vrot.slane %v11365_v47, 2  ;;  %vm4805_vm8 = vcmask 1046528   ;;  %vm11857_vm6 = vmmov %vm11834_vm0 }
 0x1b5   : > { %7141 = vmatmul.mubr.msk.bf16.gmra.mxu0 %vm11831_vm11, %v6301_v25  ;;  %7084 = vmatprep.mubr.msk.bf16.mxu1 %vm11832_vm5, %v9762_v11  ;;  %v11352_v25 = vshrl.u32 %v9889_v42, 16  ;;  %v11356_v11 = vshll.u32 %v9900_v57, 16  ;;  %v9953_v23 = vsel %vm5130_vm3, %v5169_v9, %v5173_v51  ;;  %v11357_v62 = vshrl.u32 %v9928_v5, 16  ;;  %vm11858_vm11 = vmmov %vm11828_vm1 }
 0x1b6   : > { %7188 = vmatprep.mubr.msk.bf16.mxu0 %vm11833_vm14, %v9765_v2  ;;  %v11355_v2 = vshrl.u32 %v9900_v57, 16  ;;  %v9963_v37 = vsel %vm5130_vm3, %v5173_v51, %v5177_v29  ;;  %v11363_v9 = vshll.u32 %v9915_v46, 16  ;;  %v5181_v39 = vor.u32 %v5180_v14, %v5179_v19  ;;  %v7555_v51 = vld [vmem:[%s11265_s3 + $0x80] sm:$0xff]   ;;  %vm11859_vm5 = vmmov %vm11828_vm1 }
 0x1b7   : > { %v5191_v41 = vrot.slane %v11352_v25, 1  ;;  %v5188_v61 = vrot.slane %v11356_v11, 2  ;;  %v11362_v6 = vshll.u32 %v9928_v5, 16  ;;  %v11359_v25 = vshrl.u32 %v9949_v18, 16  ;;  %vm11860_vm14 = vmmov %vm11834_vm0 }
 0x1b8   : > { %v5187_v48 = vrot.slane %v11355_v2, 1  ;;  %v5185_v63 = vor.u32 %v5184_v45, %v5183_v17  ;;  %v3061_v19 = vrot.slane %v3059_v10, 3  ;;  %v11361_v14 = vshll.u32 %v9949_v18, 16  ;;  %vm11861_vm0 = vmmov %vm11828_vm1 }
 0x1b9   : > { %v9985_v2 = vsel %vm5130_vm3, %v5177_v29, %v5181_v39  ;;  %v5199_v17 = vrot.slane %v11357_v62, 1  ;;  %v5195_v10 = vrot.slane %v11358_v28, 1  ;;  %v3064_v45 = vrot.slane %v3062_v27, 4 }
 0x1ba   : > { %v5189_v11 = vor.u32 %v5188_v61, %v5187_v48  ;;  %v5200_v48 = vrot.slane %v11362_v6, 2  ;;  %v5204_v27 = vrot.slane %v11361_v14, 2  ;;  %v4823_v62 = vrot.slane %v9830_v32, 1 }
 0x1bb   : > { %v4825_v28 = vrot.slane %v9833_v20, 1 }
 0x1bc   : > { %7085 = vmatmul.mubr.msk.bf16.gmra.mxu1 %vm11835_vm10, %v9772_v0  ;;  %v9994_v0 = vsel %vm5130_vm3, %v5181_v39, %v5185_v63  ;;  %v10000_v29 = vsel %vm5130_vm3, %v5185_v63, %v5189_v11  ;;  %v5201_v39 = vor.u32 %v5200_v48, %v5199_v17  ;;  %v4827_v17 = vrot.slane %v9879_v15, 1  ;;  %vm11862_vm10 = vmmov %vm11861_vm0 }
 0x1bd   : > { %7189 = vmatmul.mubr.msk.bf16.vlgmr.msra.gmra.mxu0 %vm11836_vm4, %v9768_v3  ;;  %7088 = vmatprep.mubr.msk.bf16.mxu1 %vm11837_vm7, %v9801_v24  ;;  %v5193_v3 = vor.u32 %v5192_v49, %v5191_v41  ;;  %v5196_v24 = vrot.slane %v11363_v9, 2  ;;  %v4819_v49 = vrot.slane %v9806_v53, 1  ;;  %v4821_v41 = vrot.slane %v9809_v40, 1  ;;  %vm11867_vm4 = vmmov %vm11857_vm6 }
 0x1be   : > { %7192 = vmatprep.mubr.msk.bf16.mxu0 %vm11838_vm2, %v9775_v31  ;;  %7265 = vmatpush3.bf16.msra.mxu0 %v9547_v13  ;;  %v11360_v31 = vrot.slane %v9780_v33, 1  ;;  %v5203_v13 = vrot.slane %v11359_v25, 1  ;;  %v10039_v14 = vsel %vm4805_vm8, %v4823_v62, %v4825_v28  ;;  %v3080_v9 = vshll.u32 %v9703_v8, 16  ;;  %vm11868_vm7 = vmmov %vm11861_vm0 }
 0x1bf   : > { %7266 = vmatprep.subr.bf16.mxu0 %v7555_v51  ;;  %v10006_v61 = vsel %vm5130_vm3, %v5189_v11, %v5193_v3  ;;  %v5197_v63 = vor.u32 %v5196_v24, %v5195_v10  ;;  %v10029_v24 = vsel %vm4805_vm8, %v4819_v49, %v4821_v41  ;;  %11844 = vst [vmem:[#allocation18_spill] sm:$0xff] %v10039_v14  ;;  %vm11869_vm2 = vmmov %vm11861_vm0 }
 0x1c0   : > { %v10019_v11 = vsel %vm4805_vm8, %v11360_v31, %v4819_v49  ;;  %v10026_v10 = vor.u32 %v5204_v27, %v5203_v13  ;;  %11841 = vst [vmem:[#allocation15_spill] sm:$0xff] %v10029_v24  ;;  %v10036_v31 = vsel %vm4805_vm8, %v4821_v41, %v4823_v62  ;;  %v10051_v49 = vsel %vm4805_vm8, %v4825_v28, %v4827_v17  ;;  %v7550_v24 = vld [vmem:[#allocation2 + $0x48] sm:$0xff]  }
 0x1c1   : > { %11839 = vst [vmem:[#allocation13_spill] sm:$0xff] %v10019_v11  ;;  %v10024_v25 = vsel %vm5130_vm3, %v5193_v3, %v5197_v63  ;;  %v10033_v48 = vsel %vm5130_vm3, %v5197_v63, %v5201_v39  ;;  %11843 = vst [vmem:[#allocation7_spill] sm:$0xff] %v10036_v31  ;;  %v4831_v13 = vrot.slane %v9900_v57, 1  ;;  %v4833_v62 = vrot.slane %v9889_v42, 1 }
 0x1c2   : > { %7267 = vmatpush3.bf16.msra.mxu0 %v7555_v51  ;;  %11840 = vst [vmem:[#allocation6_spill] sm:$0xff] %v10026_v10  ;;  %11842 = vst [vmem:[#allocation14_spill] sm:$0xff] %v10033_v48  ;;  %v4829_v51 = vrot.slane %v9871_v59, 1  ;;  %v10048_v3 = vsel %vm5130_vm3, %v5201_v39, %v10026_v10  ;;  %v4837_v63 = vrot.slane %v9928_v5, 1  ;;  %v11364_v28 = vrot.slane %v9949_v18, 1 }
 0x1c3   : > { %11847 = vst [vmem:[#allocation17_spill] sm:$0xff] %v10048_v3  ;;  %11848 = vst [vmem:[#allocation10_spill] sm:$0xff] %v10051_v49  ;;  %v3056_v27 = vor.u32 %v9896_v7, %v9856_v26  ;;  %v3068_v41 = vshrl.u32 %v9699_v54, 16  ;;  %v3065_v7 = vor.u32 %v3064_v45, %v3061_v19  ;;  %v10098_v45 = vpop.f32.mrf.mxu0  ;;  %v3082_v47 = vrot.slane %v3080_v9, 4 }
 0x1c4   : > { %7089 = vmatmul.mubr.msk.bf16.gmra.mxu1 %vm11845_vm15, %v9847_v56  ;;  %v10060_v56 = vsel %vm4805_vm8, %v4827_v17, %v4829_v51  ;;  %v10069_v39 = vsel %vm4805_vm8, %v4829_v51, %v4831_v13  ;;  %v10084_v26 = vsel %vm4805_vm8, %v4837_v63, %v11364_v28  ;;  %v4428_v51 = vrot.slane %v4426_v16, 1  ;;  %vm11870_vm15 = vmmov %vm11867_vm4 }
 0x1c5   : > { %7193 = vmatmul.mubr.msk.bf16.gmra.mxu0 %vm11846_vm13, %v9824_v50  ;;  %7092 = vmatprep.mubr.msk.bf16.mxu1 %vm11828_vm1, %v9938_v21  ;;  %11850 = vst [vmem:[#allocation22_spill] sm:$0xff] %v10060_v56  ;;  %v4835_v50 = vrot.slane %v9915_v46, 1  ;;  %11851 = vst [vmem:[#allocation19_spill] sm:$0xff] %v10069_v39  ;;  %v10072_v21 = vsel %vm4805_vm8, %v4831_v13, %v4833_v62  ;;  %v3077_v13 = vshrl.u32 %v9703_v8, 16  ;;  %v3070_v28 = vrot.slane %v3068_v41, 3  ;;  %v7536_v39 = vld [vmem:[#allocation2 + $0x18] sm:$0xff]  }
 0x1c6   : > { %7196 = vmatprep.mubr.msk.bf16.mxu0 %vm11849_vm9, %v9876_v52  ;;  %11852 = vst [vmem:[#allocation16_spill] sm:$0xff] %v10072_v21  ;;  %v3071_v52 = vshll.u32 %v9699_v54, 16  ;;  %11855 = vst [vmem:[#allocation26_spill] sm:$0xff] %v10084_v26  ;;  %v11856_v54 = vshrl.u32 %v9780_v33, 16  ;;  %v3066_v8 = vsel %vm11860_vm14, %v3056_v27, %v3065_v7  ;;  %v7535_v26 = vld [vmem:[#allocation2 + $0x10] sm:$0xff]   ;;  %v11876_v56 = vshrl.u32 %v9833_v20, 16 }
 0x1c7   : > { %v10076_v17 = vsel %vm4805_vm8, %v4833_v62, %v4835_v50  ;;  %v10079_v6 = vsel %vm4805_vm8, %v4835_v50, %v4837_v63  ;;  %v3057_v50 = vsel %vm11857_vm6, %v9864_v43, %v3056_v27  ;;  %v4421_v63 = vsel %vm3808_vm12, %v9886_v58, %v9944_v30  ;;  %vm11871_vm13 = vmmov %vm11861_vm0 }
 0x1c8   : > { %11853 = vst [vmem:[#allocation25_spill] sm:$0xff] %v10076_v17  ;;  %11854 = vst [vmem:[#allocation20_spill] sm:$0xff] %v10079_v6  ;;  %v4424_v62 = vor.u32 %v11856_v54, %v9944_v30  ;;  %v3073_v19 = vrot.slane %v3071_v52, 4  ;;  %v3079_v54 = vrot.slane %v3077_v13, 3  ;;  %v6263_v43 = vcombine.low %v9708_v34, %v9708_v34  ;;  %v10108_v30 = vpop.f32.mrf.mxu0 }
 0x1c9   : > { %v11863_v58 = vshll.u32 %v9809_v40, 16  ;;  %v11864_v52 = vshrl.u32 %v9806_v53, 16  ;;  %v11865_v13 = vshll.u32 %v9830_v32, 16  ;;  %v11866_v34 = vshrl.u32 %v9809_v40, 16  ;;  %vm11872_vm1 = vmmov %vm11861_vm0 }
 0x1ca   : > { %v4429_v16 = vsel %vm3808_vm12, %v4424_v62, %v4428_v51  ;;  %v10114_v62 = vpop.f32.mrf.mxu0  ;;  %v3083_v9 = vor.u32 %v3082_v47, %v3079_v54  ;;  %v3089_v6 = vshll.u32 %v6263_v43, 16  ;;  %v7539_v54 = vld [vmem:[#allocation2 + $0x20] sm:$0xff]   ;;  %vm11877_vm9 = vmmov %vm11867_vm4  ;;  %v11903_v10 = vshrl.u32 %v9928_v5, 16 }
 0x1cb   : > { %v4436_v41 = vrot.slane %v11863_v58, 1  ;;  %v4432_v27 = vor.u32 %v11864_v52, %v4428_v51  ;;  %vm11878_vm6 = vmmov %vm11861_vm0 }
 0x1cc   : > { %7093 = vmatmul.mubr.msk.bf16.gmra.mxu1 %vm11858_vm11, %v3057_v50  ;;  %v3074_v50 = vor.u32 %v3073_v19, %v3070_v28  ;;  %v10118_v17 = vpop.f32.mrf.mxu0  ;;  %vm11879_vm11 = vmmov %vm11861_vm0 }
 0x1cd   : > { %7197 = vmatmul.mubr.msk.bf16.gmra.mxu0 %vm11859_vm5, %v4421_v63  ;;  %7096 = vmatprep.mubr.msk.bf16.mxu1 %vm11861_vm0, %v3066_v8  ;;  %v4444_v63 = vrot.slane %v11865_v13, 1  ;;  %v3812_v8 = vshll.u32 %v7535_v26, 16  ;;  %v4440_v21 = vor.u32 %v11866_v34, %v4436_v41  ;;  %v4437_v53 = vsel %vm3808_vm12, %v4432_v27, %v4436_v41  ;;  %vm11880_vm5 = vmmov %vm11861_vm0 }
 0x1ce   : > { %7200 = vmatprep.mubr.msk.bf16.mxu0 %vm11862_vm10, %v4429_v16  ;;  %v3086_v16 = vshrl.u32 %v6263_v43, 16  ;;  %v3075_v58 = vsel %vm11867_vm4, %v3065_v7, %v3074_v50  ;;  %v10124_v28 = vpop.f32.mrf.mxu0  ;;  %v3084_v47 = vsel %vm11870_vm15, %v3074_v50, %v3083_v9  ;;  %v3091_v7 = vrot.slane %v3089_v6, 4  ;;  %vm11881_vm14 = vmmov %vm11861_vm0 }
 0x1cf   : > { %v4445_v51 = vsel %vm3808_vm12, %v4440_v21, %v4444_v63  ;;  %v3814_v19 = vrot.slane %v3812_v8, 1  ;;  %v11873_v41 = vshll.u32 %v9833_v20, 16  ;;  %v3810_v27 = vshrl.u32 %v7535_v26, 16  ;;  %vm11886_vm10 = vmmov %vm11861_vm0 }
 0x1d0   : > { %v3088_v40 = vrot.slane %v3086_v16, 3  ;;  %v10132_v43 = vpop.f32.mrf.mxu0  ;;  %v3817_v13 = vshll.u32 %v7536_v39, 16  ;;  %v11874_v34 = vshrl.u32 %v9830_v32, 16  ;;  %v11875_v8 = vshll.u32 %v9879_v15, 16  ;;  %vm11887_vm4 = vmmov %vm11861_vm0 }
 0x1d1   : > { %v4452_v52 = vrot.slane %v11873_v41, 1  ;;  %v3815_v21 = vor.u32 %v3814_v19, %v3810_v27  ;;  %v7541_v41 = vld [vmem:[#allocation2 + $0x28] sm:$0xff]   ;;  %v7544_v27 = vld [vmem:[#allocation2 + $0x30] sm:$0xff]   ;;  %vm11894_vm15 = vmmov %vm11861_vm0 }
 0x1d2   : > { %v4448_v50 = vor.u32 %v11874_v34, %v4444_v63  ;;  %v3819_v6 = vrot.slane %v3817_v13, 1  ;;  %v11882_v13 = vshrl.u32 %v9879_v15, 16  ;;  %v7558_v15 = vld [vmem:[%s11265_s3 + $0x70] sm:$0xff]  }
 0x1d3   : > { %v4456_v49 = vor.u32 %v11876_v56, %v4452_v52  ;;  %v3829_v56 = vshrl.u32 %v7539_v54, 16 }
 0x1d4   : > { %7097 = vmatmul.mubr.msk.bf16.gmra.mxu1 %vm11868_vm7, %v3075_v58  ;;  %v10138_v58 = vpop.f32.mrf.mxu0  ;;  %v4453_v32 = vsel %vm3808_vm12, %v4448_v50, %v4452_v52  ;;  %v3820_v19 = vsel %vm3808_vm12, %v3815_v21, %v3819_v6  ;;  %v3821_v52 = vshrl.u32 %v7536_v39, 16  ;;  %v11883_v50 = vshll.u32 %v9871_v59, 16  ;;  %vm11888_vm7 = vmmov %vm11861_vm0 }
 0x1d5   : > { %7201 = vmatmul.mubr.msk.bf16.gmra.mxu0 %vm11869_vm2, %v4437_v53  ;;  %7100 = vmatprep.mubr.msk.bf16.mxu1 %vm11871_vm13, %v3084_v47  ;;  %v4460_v53 = vrot.slane %v11875_v8, 1  ;;  %v3825_v47 = vshll.u32 %v7539_v54, 16  ;;  %v7546_v54 = vld [vmem:[#allocation2 + $0x38] sm:$0xff]   ;;  %vm11893_vm2 = vmmov %vm11861_vm0 }
 0x1d6   : > { %7204 = vmatprep.mubr.msk.bf16.mxu0 %vm11872_vm1, %v4445_v51  ;;  %v3092_v51 = vor.u32 %v3091_v7, %v3088_v40  ;;  %v10142_v16 = vpop.f32.mrf.mxu0  ;;  %v4468_v8 = vrot.slane %v11883_v50, 1  ;;  %vm11896_vm13 = vmmov %vm11861_vm0 }
 0x1d7   : > { %v4461_v40 = vsel %vm3808_vm12, %v4456_v49, %v4460_v53  ;;  %v3827_v7 = vrot.slane %v3825_v47, 1  ;;  %v4464_v34 = vor.u32 %v11882_v13, %v4460_v53  ;;  %v3841_v47 = vshll.u32 %v7544_v27, 16  ;;  %vm11897_vm1 = vmmov %vm11861_vm0 }
 0x1d8   : > { %v3093_v26 = vsel %vm11877_vm9, %v3083_v9, %v3092_v51  ;;  %v10148_v63 = vpop.f32.mrf.mxu0  ;;  %v3833_v9 = vshll.u32 %v7541_v41, 16  ;;  %v3823_v51 = vor.u32 %v3821_v52, %v3819_v6  ;;  %v11885_v13 = vshrl.u32 %v9871_v59, 16  ;;  %v7548_v52 = vld [vmem:[#allocation2 + $0x40] sm:$0xff]   ;;  %vm11907_vm9 = vmmov %vm11861_vm0 }
 0x1d9   : > { %v3831_v49 = vor.u32 %v3829_v56, %v3827_v7  ;;  %v4469_v53 = vsel %vm3808_vm12, %v4464_v34, %v4468_v8  ;;  %v11889_v34 = vshll.u32 %v9889_v42, 16 }
 0x1da   : > { %v10156_v20 = vpop.f32.mrf.mxu0  ;;  %v3828_v39 = vsel %vm3808_vm12, %v3823_v51, %v3827_v7  ;;  %v4472_v56 = vor.u32 %v11885_v13, %v4468_v8  ;;  %v3845_v51 = vshrl.u32 %v7544_v27, 16  ;;  %v11891_v13 = vshll.u32 %v9915_v46, 16 }
 0x1db   : > { %v4484_v8 = vrot.slane %v11889_v34, 1  ;;  %v11892_v27 = vshrl.u32 %v9889_v42, 16 }
 0x1dc   : > { %7101 = vmatmul.mubr.msk.bf16.gmra.mxu1 %vm11878_vm6, %v3093_v26  ;;  %v10162_v21 = vpop.f32.mrf.mxu0  ;;  %v11884_v26 = vshll.u32 %v9900_v57, 16  ;;  %vm11908_vm6 = vmmov %vm11861_vm0 }
 0x1dd   : > { %7205 = vmatmul.mubr.msk.bf16.gmra.mxu0 %vm11879_vm11, %v4453_v32  ;;  %7148 = vmatprep.mubr.msk.bf16.mxu1 %vm11880_vm5, %v3820_v19  ;;  %v4488_v34 = vor.u32 %v11892_v27, %v4484_v8  ;;  %v3865_v27 = vshll.u32 %v7550_v24, 16  ;;  %vm11909_vm11 = vmmov %vm11861_vm0 }
 0x1de   : > { %7208 = vmatprep.mubr.msk.bf16.mxu0 %vm11881_vm14, %v4461_v40  ;;  %v4476_v32 = vrot.slane %v11884_v26, 1  ;;  %v10166_v19 = vpop.f32.mrf.mxu0  ;;  %v3835_v40 = vrot.slane %v3833_v9, 1  ;;  %v3843_v9 = vrot.slane %v3841_v47, 1  ;;  %v3849_v26 = vshll.u32 %v7546_v54, 16  ;;  %vm11911_vm5 = vmmov %vm11861_vm0 }
 0x1df   : > { %vm11916_vm14 = vmmov %vm11861_vm0 }
 0x1e0   : > { %v10175_v50 = vpop.f32.mrf.mxu0  ;;  %v3836_v6 = vsel %vm3808_vm12, %v3831_v49, %v3835_v40  ;;  %v4477_v7 = vsel %vm3808_vm12, %v4472_v56, %v4476_v32  ;;  %v11890_v49 = vshrl.u32 %v9900_v57, 16  ;;  %v4492_v56 = vrot.slane %v11891_v13, 1 }
 0x1e1   : > { %v3851_v31 = vrot.slane %v3849_v26, 1  ;;  %v11895_v26 = vshll.u32 %v9928_v5, 16 }
 0x1e2   : > { %v10184_v59 = vpop.f32.mrf.mxu0  ;;  %v4480_v47 = vor.u32 %v11890_v49, %v4476_v32  ;;  %v7553_v32 = vld [vmem:[#allocation2 + $0xa8] ss:$0 sps:$4 sm:$0x11]  }
 0x1e4   : > { %7149 = vmatmul.mubr.msk.bf16.vlgmr.msra.gmra.mxu1 %vm11861_vm0, %v3828_v39  ;;  %v3837_v39 = vshrl.u32 %v7541_v41, 16  ;;  %v4485_v41 = vsel %vm3808_vm12, %v4480_v47, %v4484_v8  ;;  %v4841_v8 = vrot.slane %v7553_v32, 1 }
 0x1e5   : > { %7209 = vmatmul.mubr.msk.bf16.gmra.mxu0 %vm11886_vm10, %v4469_v53  ;;  %7225 = vmatpush3.bf16.msra.mxu1 %v9750_v1  ;;  %v10190_v53 = vpop.f32.mrf.mxu0  ;;  %v3847_v1 = vor.u32 %v3845_v51, %v3843_v9  ;;  %vm11917_vm10 = vmmov %vm11861_vm0 }
 0x1e6   : > { %7152 = vmatprep.mubr.msk.bf16.mxu1 %vm11887_vm4, %v3836_v6  ;;  %7212 = vmatprep.mubr.msk.bf16.mxu0 %vm11888_vm7, %v4477_v7  ;;  %v3857_v6 = vshll.u32 %v7548_v52, 16  ;;  %v3839_v7 = vor.u32 %v3837_v39, %v3835_v40  ;;  %v4500_v39 = vrot.slane %v11895_v26, 1  ;;  %vm11918_vm4 = vmmov %vm11861_vm0 }
 0x1e7   : > { %7226 = vmatprep.subr.bf16.mxu1 %v7558_v15  ;;  %v10194_v14 = vpop.f32.mrf.mxu0  ;;  %v3852_v40 = vsel %vm3808_vm12, %v3847_v1, %v3851_v31  ;;  %v11899_v1 = vshrl.u32 %v9915_v46, 16  ;;  %vm11923_vm7 = vmmov %vm11861_vm0 }
 0x1e8   : > { %v3844_v57 = vsel %vm3808_vm12, %v3839_v7, %v3843_v9  ;;  %v3859_v42 = vrot.slane %v3857_v6, 1  ;;  %v7552_v9 = vld [vmem:[#allocation2 + $0x50] sm:$0xff]   ;;  %v3861_v7 = vshrl.u32 %v7548_v52, 16  ;;  %v11900_v6 = vrot.slane %v9949_v18, 1 }
 0x1e9   : > { %7227 = vmatpush3.bf16.msra.mxu1 %v7558_v15  ;;  %v10200_v49 = vpop.f32.mrf.mxu1  ;;  %v10202_v51 = vpop.f32.mrf.mxu0  ;;  %v4493_v15 = vsel %vm3808_vm12, %v4488_v34, %v4492_v56  ;;  %v3853_v34 = vshrl.u32 %v7546_v54, 16  ;;  %v4504_v3 = vor.u32 %v11903_v10, %v4500_v39  ;;  %v11904_v52 = vshll.u32 %v9949_v18, 16 }
 0x1ea   : > { %v3873_v48 = vshll.u32 %v7552_v9, 16 }
 0x1eb   : > { %v10212_v47 = vpop.f32.mrf.mxu1  ;;  %v10214_v13 = vpop.f32.mrf.mxu0  ;;  %v4508_v11 = vrot.slane %v11904_v52, 1  ;;  %v3855_v46 = vor.u32 %v3853_v34, %v3851_v31  ;;  %v7556_v34 = vld [vmem:[#allocation2 + $0x60] sm:$0xff]  }
 0x1ec   : > { %7153 = vmatmul.mubr.msk.bf16.gmra.mxu1 %vm11893_vm2, %v3844_v57  ;;  %11898 = vst [vmem:[#allocation27_spill] sm:$0xff] %v10212_v47  ;;  %v4496_v57 = vor.u32 %v11899_v1, %v4492_v56  ;;  %v4514_v56 = vshll.u32 %v7553_v32, 16  ;;  %v3875_v32 = vrot.slane %v3873_v48, 1  ;;  %vm11924_vm2 = vmmov %vm11861_vm0 }
 0x1ed   : > { %7213 = vmatmul.mubr.msk.bf16.gmra.mxu0 %vm11894_vm15, %v4485_v41  ;;  %7156 = vmatprep.mubr.msk.bf16.mxu1 %vm11896_vm13, %v3852_v40  ;;  %v10221_v41 = vsel %vm4805_vm8, %v11900_v6, %v4841_v8  ;;  %v10223_v26 = vpop.f32.mrf.mxu1  ;;  %v10225_v40 = vpop.f32.mrf.mxu0  ;;  %v3867_v8 = vrot.slane %v3865_v27, 1  ;;  %v7554_v6 = vld [vmem:[#allocation2 + $0x58] sm:$0xff]   ;;  %v4509_v10 = vsel %vm3808_vm12, %v4504_v3, %v4508_v11  ;;  %vm11925_vm15 = vmmov %vm11861_vm0 }
 0x1ee   : > { %7216 = vmatprep.mubr.msk.bf16.mxu0 %vm11897_vm1, %v4493_v15  ;;  %11901 = vst [vmem:[#allocation21_spill] sm:$0xff] %v10221_v41  ;;  %11902 = vst [vmem:[#allocation29_spill] sm:$0xff] %v10223_v26  ;;  %v3863_v15 = vor.u32 %v3861_v7, %v3859_v42  ;;  %v3860_v41 = vsel %vm3808_vm12, %v3855_v46, %v3859_v42  ;;  %v4501_v33 = vsel %vm3808_vm12, %v4496_v57, %v4500_v39 }
 0x1ef   : > { %v10231_v54 = vpop.f32.mrf.mxu1  ;;  %v10233_v1 = vpop.f32.mrf.mxu0  ;;  %v11910_v42 = vshrl.u32 %v9949_v18, 16  ;;  %v4516_v39 = vrot.slane %v4514_v56, 1  ;;  %v3869_v46 = vshrl.u32 %v7550_v24, 16  ;;  %vm11926_vm13 = vmmov %vm11861_vm0 }
 0x1f0   : > { %11905 = vst [vmem:[#allocation28_spill] sm:$0xff] %v10231_v54  ;;  %v3868_v31 = vsel %vm3808_vm12, %v3863_v15, %v3867_v8  ;;  %vm11933_vm1 = vmmov %vm11861_vm0 }
 0x1f1   : > { %v10239_v5 = vpop.f32.mrf.mxu0  ;;  %v4512_v27 = vor.u32 %v11910_v42, %v4508_v11  ;;  %v7557_v42 = vld [vmem:[#allocation2 + $0x68] sm:$0xff]  }
 0x1f2   : > { %v10237_v7 = vpop.f32.mrf.mxu1 }
 0x1f3   : > { %11906 = vst [vmem:[#allocation23_spill] sm:$0xff] %v10237_v7  ;;  %v10251_v52 = vpop.f32.mrf.mxu0  ;;  %v3889_v7 = vshll.u32 %v7556_v34, 16  ;;  %v4517_v18 = vsel %vm3808_vm12, %v4512_v27, %v4516_v39  ;;  %v7559_v27 = vld [vmem:[#allocation2 + $0x70] sm:$0xff]  }
 0x1f4   : > { %7157 = vmatmul.mubr.msk.bf16.gmra.mxu1 %vm11907_vm9, %v3860_v41  ;;  %v10249_v57 = vpop.f32.mrf.mxu1  ;;  %v3877_v41 = vshrl.u32 %v7552_v9, 16  ;;  %vm11934_vm9 = vmmov %vm11861_vm0 }
 0x1f5   : > { %7217 = vmatmul.mubr.msk.bf16.gmra.mxu0 %vm11908_vm6, %v4501_v33  ;;  %7160 = vmatprep.mubr.msk.bf16.mxu1 %vm11909_vm11, %v3868_v31  ;;  %11912 = vst [vmem:[#allocation3_spill] sm:$0xff] %v10249_v57  ;;  %v3881_v33 = vshll.u32 %v7554_v6, 16  ;;  %v10255_v3 = vpop.f32.mrf.mxu0  ;;  %v3871_v31 = vor.u32 %v3869_v46, %v3867_v8  ;;  %v3897_v46 = vshll.u32 %v7557_v42, 16  ;;  %vm11935_vm6 = vmmov %vm11861_vm0 }
 0x1f6   : > { %7220 = vmatprep.mubr.msk.bf16.mxu0 %vm11911_vm5, %v4509_v10  ;;  %v10253_v15 = vpop.f32.mrf.mxu1  ;;  %v3879_v48 = vor.u32 %v3877_v41, %v3875_v32  ;;  %v3891_v41 = vrot.slane %v3889_v7, 1  ;;  %vm11936_vm11 = vmmov %vm11861_vm0 }
 0x1f7   : > { %11913 = vst [vmem:[#allocation31_spill] sm:$0xff] %v10253_v15  ;;  %v10260_v10 = vpop.f32.mrf.mxu0  ;;  %v3883_v56 = vrot.slane %v3881_v33, 1  ;;  %v3876_v57 = vsel %vm3808_vm12, %v3871_v31, %v3875_v32  ;;  %v3893_v33 = vshrl.u32 %v7556_v34, 16  ;;  %v3885_v31 = vshrl.u32 %v7554_v6, 16  ;;  %vm11941_vm5 = vmmov %vm11861_vm0 }
 0x1f8   : > { %v10258_v11 = vpop.f32.mrf.mxu1  ;;  %v3899_v15 = vrot.slane %v3897_v46, 1 }
 0x1f9   : > { %11914 = vst [vmem:[#allocation30_spill] sm:$0xff] %v10258_v11  ;;  %v3884_v8 = vsel %vm3808_vm12, %v3879_v48, %v3883_v56  ;;  %v3905_v48 = vshll.u32 %v7559_v27, 16  ;;  %v3887_v7 = vor.u32 %v3885_v31, %v3883_v56  ;;  %v3909_v31 = vshrl.u32 %v7559_v27, 16 }
 0x1fb   : > { %v10263_v9 = vpop.f32.mrf.mxu1  ;;  %v3907_v56 = vrot.slane %v3905_v48, 1 }
 0x1fc   : > { %11915 = vst [vmem:[#allocation24_spill] sm:$0xff] %v10263_v9  ;;  %v10265_v24 = vpop.f32.mrf.mxu0  ;;  %7161 = vmatmul.mubr.msk.bf16.gmra.mxu1 %vm11916_vm14, %v3876_v57  ;;  %vm11942_vm14 = vmmov %vm11861_vm0 }
 0x1fd   : > { %7221 = vmatmul.mubr.msk.bf16.gmra.mxu0 %vm11861_vm0, %v4517_v18  ;;  %7164 = vmatprep.mubr.msk.bf16.mxu1 %vm11917_vm10, %v3884_v8  ;;  %v10273_v39 = vpop.f32.mrf.mxu1  ;;  %v3895_v18 = vor.u32 %v3893_v33, %v3891_v41  ;;  %v7561_v33 = vld [vmem:[#allocation2 + $0x80] sm:$0xff]   ;;  %vm11943_vm10 = vmmov %vm11861_vm0 }
 0x1fe   : > { %7268 = vmatprep.mubr.msk.bf16.mxu0 %vm11918_vm4, %v9821_v12  ;;  %11919 = vst [vmem:[#allocation36_spill] sm:$0xff] %v10273_v39  ;;  %v10275_v32 = vpop.f32.mrf.mxu0  ;;  %v7560_v12 = vld [vmem:[#allocation2 + $0x78] sm:$0xff]   ;;  %v3892_v39 = vsel %vm3808_vm12, %v3887_v7, %v3891_v41  ;;  %vm11945_vm4 = vmmov %vm11861_vm0 }
 0x1ff   : > { %v10277_v9 = vpop.f32.mrf.mxu1  ;;  %v3900_v6 = vsel %vm3808_vm12, %v3895_v18, %v3899_v15  ;;  %v3913_v7 = vshll.u32 %v7560_v12, 16  ;;  %v3921_v18 = vshll.u32 %v7561_v33, 16 }
 0x200   : > { %11920 = vst [vmem:[#allocation34_spill] sm:$0xff] %v10277_v9  ;;  %v10279_v57 = vpop.f32.mrf.mxu0 }
 0x201   : > { %v10281_v11 = vpop.f32.mrf.mxu1  ;;  %v3915_v26 = vrot.slane %v3913_v7, 1  ;;  %v3925_v7 = vshrl.u32 %v7561_v33, 16 }
 0x202   : > { %11921 = vst [vmem:[#allocation32_spill] sm:$0xff] %v10281_v11  ;;  %v10283_v8 = vpop.f32.mrf.mxu0 }
 0x204   : > { %v10286_v54 = vpop.f32.mrf.mxu1  ;;  %7165 = vmatmul.mubr.msk.bf16.gmra.mxu1 %vm11923_vm7, %v3892_v39  ;;  %vm11946_vm7 = vmmov %vm11861_vm0 }
 0x205   : > { %11922 = vst [vmem:[#allocation37_spill] sm:$0xff] %v10286_v54  ;;  %v10288_v34 = vpop.f32.mrf.mxu0  ;;  %7269 = vmatmul.mubr.msk.bf16.vlgmr.msra.gmra.mxu0 %vm11924_vm2, %v9813_v22  ;;  %7168 = vmatprep.mubr.msk.bf16.mxu1 %vm11925_vm15, %v3900_v6  ;;  %v3901_v54 = vshrl.u32 %v7557_v42, 16  ;;  %v3911_v22 = vor.u32 %v3909_v31, %v3907_v56  ;;  %vm11947_vm2 = vmmov %vm11861_vm0 }
 0x206   : > { %7272 = vmatprep.mubr.msk.bf16.mxu0 %vm11926_vm13, %v9837_v38  ;;  %v10297_v46 = vpop.f32.mrf.mxu1  ;;  %v7562_v38 = vld [vmem:[#allocation2 + $0x88] sm:$0xff]   ;;  %vm11948_vm15 = vmmov %vm11861_vm0 }
 0x207   : > { %11927 = vst [vmem:[#allocation33_spill] sm:$0xff] %v10297_v46  ;;  %v10299_v41 = vpop.f32.mrf.mxu0  ;;  %v3903_v48 = vor.u32 %v3901_v54, %v3899_v15  ;;  %v3916_v42 = vsel %vm3808_vm12, %v3911_v22, %v3915_v26  ;;  %v3923_v54 = vrot.slane %v3921_v18, 1  ;;  %v7563_v15 = vld [vmem:[#allocation2 + $0x90] sm:$0xff]   ;;  %vm11949_vm13 = vmmov %vm11861_vm0 }
 0x208   : > { %v10301_v39 = vpop.f32.mrf.mxu1  ;;  %v3937_v22 = vshll.u32 %v7563_v15, 16 }
 0x209   : > { %11928 = vst [vmem:[#allocation41_spill] sm:$0xff] %v10301_v39  ;;  %v10303_v11 = vpop.f32.mrf.mxu0  ;;  %v3908_v46 = vsel %vm3808_vm12, %v3903_v48, %v3907_v56  ;;  %v3929_v48 = vshll.u32 %v7562_v38, 16 }
 0x20a   : > { %v10305_v9 = vpop.f32.mrf.mxu1  ;;  %v3939_v33 = vrot.slane %v3937_v22, 1 }
 0x20b   : > { %11929 = vst [vmem:[#allocation40_spill] sm:$0xff] %v10305_v9  ;;  %v10307_v6 = vpop.f32.mrf.mxu0 }
 0x20c   : > { %11930 = vst [vmem:[#allocation35_spill] sm:$0xff] %v10307_v6  ;;  %v10310_v47 = vpop.f32.mrf.mxu1  ;;  %7169 = vmatmul.mubr.msk.bf16.gmra.mxu1 %vm11933_vm1, %v3908_v46  ;;  %vm11950_vm1 = vmmov %vm11861_vm0 }
 0x20d   : > { %11931 = vst [vmem:[#allocation39_spill] sm:$0xff] %v10310_v47  ;;  %v10312_v27 = vpop.f32.mrf.mxu0  ;;  %7273 = vmatmul.mubr.msk.bf16.gmra.mxu0 %vm11934_vm9, %v9860_v35  ;;  %7172 = vmatprep.mubr.msk.bf16.mxu1 %vm11935_vm6, %v3916_v42  ;;  %v3917_v47 = vshrl.u32 %v7560_v12, 16  ;;  %v3927_v35 = vor.u32 %v3925_v7, %v3923_v54  ;;  %v3941_v7 = vshrl.u32 %v7563_v15, 16  ;;  %vm11951_vm9 = vmmov %vm11861_vm0 }
 0x20e   : > { %11932 = vst [vmem:[#allocation38_spill] sm:$0xff] %v10312_v27  ;;  %7276 = vmatprep.mubr.msk.bf16.mxu0 %vm11936_vm11, %v9882_v36  ;;  %v10321_v31 = vpop.f32.mrf.mxu1  ;;  %v3931_v27 = vrot.slane %v3929_v48, 1  ;;  %v7564_v36 = vld [vmem:[#allocation2 + $0x98] sm:$0xff]   ;;  %vm11952_vm6 = vmmov %vm11861_vm0 }
 0x20f   : > { %11937 = vst [vmem:[#allocation11_spill] sm:$0xff] %v10321_v31  ;;  %v10323_v56 = vpop.f32.mrf.mxu0  ;;  %v3919_v18 = vor.u32 %v3917_v47, %v3915_v26  ;;  %v3945_v48 = vshll.u32 %v7564_v36, 16  ;;  %vm11954_vm11 = vmmov %vm11861_vm0 }
 0x210   : > { %11938 = vst [vmem:[#allocation5_spill] sm:$0xff] %v10323_v56  ;;  %v10325_v46 = vpop.f32.mrf.mxu1  ;;  %v3932_v12 = vsel %vm3808_vm12, %v3927_v35, %v3931_v27 }
 0x211   : > { %11939 = vst [vmem:[#allocation8_spill] sm:$0xff] %v10325_v46  ;;  %v10327_v9 = vpop.f32.mrf.mxu0  ;;  %v3924_v31 = vsel %vm3808_vm12, %v3919_v18, %v3923_v54  ;;  %v3933_v18 = vshrl.u32 %v7562_v38, 16  ;;  %v3947_v38 = vrot.slane %v3945_v48, 1 }
 0x212   : > { %v10329_v39 = vpop.f32.mrf.mxu1 }
 0x213   : > { %11940 = vst [vmem:[#allocation9_spill] sm:$0xff] %v10329_v39  ;;  %v10331_v42 = vpop.f32.mrf.mxu0  ;;  %v7565_v39 = vld [vmem:[#allocation2 + $0xa0] ss:$0 sps:$4 sm:$0x11]  }
 0x214   : > { %v6990_v6 = vpop.f32.mrf.mxu1  ;;  %7173 = vmatmul.mubr.msk.bf16.gmra.mxu1 %vm11941_vm5, %v3924_v31  ;;  %vm11955_vm5 = vmmov %vm11861_vm0 }
 0x215   : > { %v10334_v56 = vpop.f32.mrf.mxu0  ;;  %7277 = vmatmul.mubr.msk.bf16.gmra.mxu0 %vm11942_vm14, %v9892_v4  ;;  %v2283_v47 = vadd.f32 %v6990_v6, %v10098_v45  ;;  %7176 = vmatprep.mubr.msk.bf16.mxu1 %vm11861_vm0, %v3932_v12  ;;  %v3943_v45 = vor.u32 %v3941_v7, %v3939_v33  ;;  %v3935_v6 = vor.u32 %v3933_v18, %v3931_v27  ;;  %v3949_v27 = vshrl.u32 %v7564_v36, 16  ;;  %v7571_v18 = vld [vmem:[#allocation2 + $0x20] sm:$0xff]   ;;  %vm11956_vm14 = vmmov %vm11861_vm0 }
 0x216   : > { %7280 = vmatprep.mubr.msk.bf16.mxu0 %vm11943_vm10, %v9918_v55  ;;  %v2274_v26 = vpop.f32.mrf.mxu1  ;;  %vm11958_vm10 = vmmov %vm11861_vm0 }
 0x217   : > { %v10344_v54 = vpop.f32.mrf.mxu0  ;;  %v2275_v31 = vadd.f32 %v2274_v26, %v10108_v30  ;;  %v10348_v4 = vadd.f32 %v10202_v51, %v2283_v47  ;;  %v3940_v26 = vsel %vm3808_vm12, %v3935_v6, %v3939_v33  ;;  %v3953_v51 = vshll.u32 %v7565_v39, 16 }
 0x218   : > { %v6991_v35 = vpop.f32.mrf.mxu1 }
 0x219   : > { %11944 = vst [vmem:[#allocation4_spill] sm:$0xff] %v10348_v4  ;;  %v10350_v22 = vpop.f32.mrf.mxu0  ;;  %v2286_v12 = vadd.f32 %v6991_v35, %v10114_v62  ;;  %v10354_v55 = vadd.f32 %v10214_v13, %v2275_v31  ;;  %v3948_v62 = vsel %vm3808_vm12, %v3943_v45, %v3947_v38  ;;  %v4807_v31 = vrot.slane %v7571_v18, 1 }
 0x21a   : > { %v2277_v46 = vpop.f32.mrf.mxu1  ;;  %v4806_v45 = vrot.slane %v9744_v60, 1 }
 0x21b   : > { %v10356_v15 = vpop.f32.mrf.mxu0  ;;  %v2278_v30 = vadd.f32 %v2277_v46, %v10118_v17  ;;  %v10361_v47 = vadd.f32 %v10225_v40, %v2286_v12  ;;  %v3951_v46 = vor.u32 %v3949_v27, %v3947_v38  ;;  %v7573_v27 = vld [vmem:[#allocation2 + $0x28] sm:$0xff]  }
 0x21c   : > { %v6994_v4 = vpop.f32.mrf.mxu1  ;;  %7177 = vmatmul.mubr.msk.bf16.gmra.mxu1 %vm11945_vm4, %v3940_v26  ;;  %vm11959_vm4 = vmmov %vm11861_vm0 }
 0x21d   : > { %v10363_v7 = vpop.f32.mrf.mxu0  ;;  %7281 = vmatmul.mubr.msk.bf16.gmra.mxu0 %vm11946_vm7, %v9931_v44  ;;  %v2299_v13 = vadd.f32 %v6994_v4, %v10124_v28  ;;  %7180 = vmatprep.mubr.msk.bf16.mxu1 %vm11947_vm2, %v3948_v62  ;;  %v10374_v17 = vadd.f32 %v10233_v1, %v2278_v30  ;;  %v3955_v44 = vrot.slane %v3953_v51, 1  ;;  %vm11960_vm7 = vmmov %vm11861_vm0 }
 0x21e   : > { %7284 = vmatprep.mubr.msk.bf16.mxu0 %vm11948_vm15, %v9953_v23  ;;  %v2290_v40 = vpop.f32.mrf.mxu1  ;;  %vm11969_vm2 = vmmov %vm11861_vm0 }
 0x21f   : > { %v10376_v39 = vpop.f32.mrf.mxu0  ;;  %v2291_v33 = vadd.f32 %v2290_v40, %v10132_v43  ;;  %v10380_v48 = vadd.f32 %v10239_v5, %v2299_v13  ;;  %v3956_v5 = vsel %vm3808_vm12, %v3951_v46, %v3955_v44  ;;  %vm11953_vm12 = vmmov %vm11861_vm0 }
 0x220   : > { %v6995_v28 = vpop.f32.mrf.mxu1  ;;  %vm11971_vm15 = vmmov %vm11861_vm0 }
 0x221   : > { %v10382_v36 = vpop.f32.mrf.mxu0  ;;  %v2302_v23 = vadd.f32 %v6995_v28, %v10138_v58  ;;  %v10386_v1 = vadd.f32 %v10251_v52, %v2291_v33  ;;  %v4808_v58 = vsel %vm4805_vm8, %v4806_v45, %v4807_v31 }
 0x222   : > { %v2293_v4 = vpop.f32.mrf.mxu1 }
 0x223   : > { %v10388_v35 = vpop.f32.mrf.mxu0  ;;  %v2294_v43 = vadd.f32 %v2293_v4, %v10142_v16  ;;  %v10394_v6 = vadd.f32 %v10255_v3, %v2302_v23 }
 0x224   : > { %v6998_v12 = vpop.f32.mrf.mxu1  ;;  %7181 = vmatmul.mubr.msk.bf16.gmra.mxu1 %vm11949_vm13, %v3956_v5  ;;  %v7575_v5 = vld [vmem:[#allocation2 + $0x38] sm:$0xff]   ;;  %vm11974_vm13 = vmmov %vm11861_vm0 }
 0x225   : > { %v10396_v38 = vpop.f32.mrf.mxu0  ;;  %7285 = vmatmul.mubr.msk.bf16.gmra.mxu0 %vm11950_vm1, %v9963_v37  ;;  %v2315_v52 = vadd.f32 %v6998_v12, %v10148_v63  ;;  %7228 = vmatprep.mubr.msk.bf16.mxu1 %vm11951_vm9, %v4808_v58  ;;  %v10407_v60 = vadd.f32 %v10260_v10, %v2294_v43  ;;  %v7572_v63 = vld [vmem:[#allocation2 + $0x30] sm:$0xff]   ;;  %v7566_v12 = vld [vmem:[#allocation2 + $0xa8] ss:$0 sps:$4 sm:$0x33]   ;;  %vm11976_vm1 = vmmov %vm11861_vm0 }
 0x226   : > { %7288 = vmatprep.mubr.msk.bf16.mxu0 %vm11952_vm6, %v9985_v2  ;;  %v2306_v16 = vpop.f32.mrf.mxu1  ;;  %v4811_v62 = vrot.slane %v7572_v63, 1  ;;  %v4809_v2 = vrot.slane %v7573_v27, 1  ;;  %v11961_v63 = vld [vmem:[#allocation35_spill] sm:$0xff]  ;;  %vm11983_vm9 = vmmov %vm11861_vm0 }
 0x227   : > { %v10409_v3 = vpop.f32.mrf.mxu0  ;;  %v2307_v30 = vadd.f32 %v2306_v16, %v10156_v20  ;;  %v10413_v26 = vadd.f32 %v10265_v24, %v2315_v52  ;;  %vm11991_vm6 = vmmov %vm11861_vm0 }
 0x228   : > { %v6999_v37 = vpop.f32.mrf.mxu1  ;;  %v4810_v24 = vsel %vm4805_vm8, %v4807_v31, %v4809_v2 }
 0x229   : > { %v10415_v51 = vpop.f32.mrf.mxu0  ;;  %v2318_v13 = vadd.f32 %v6999_v37, %v10162_v21  ;;  %v10419_v10 = vadd.f32 %v10275_v32, %v2307_v30  ;;  %v4812_v21 = vsel %vm4805_vm8, %v4809_v2, %v4811_v62  ;;  %v11962_v2 = vld [vmem:[#allocation27_spill] sm:$0xff] }
 0x22a   : > { %v2309_v40 = vpop.f32.mrf.mxu1 }
 0x22b   : > { %v10421_v46 = vpop.f32.mrf.mxu0  ;;  %v2310_v20 = vadd.f32 %v2309_v40, %v10166_v19  ;;  %v10426_v33 = vadd.f32 %v10279_v57, %v2318_v13  ;;  %v7567_v13 = vld [vmem:[%s11267_s5 + $0x8] sm:$0xff]  }
 0x22c   : > { %v7002_v44 = vpop.f32.mrf.mxu1  ;;  %7229 = vmatmul.mubr.msk.bf16.vlgmr.msra.gmra.mxu1 %vm11953_vm12, %v4810_v24  ;;  %7304 = vmatprep.subr.bf16.mxu1 %v7567_v13  ;;  %vm11994_vm12 = vmmov %vm11861_vm0 }
 0x22d   : > { %v10428_v28 = vpop.f32.mrf.mxu0  ;;  %7289 = vmatmul.mubr.msk.bf16.gmra.mxu0 %vm11954_vm11, %v9994_v0  ;;  %v2331_v32 = vadd.f32 %v7002_v44, %v10175_v50  ;;  %7232 = vmatprep.mubr.msk.bf16.mxu1 %vm11955_vm5, %v4812_v21  ;;  %v10439_v19 = vadd.f32 %v10283_v8, %v2310_v20  ;;  %v7574_v50 = vld [vmem:[#allocation2 + $0x40] sm:$0xff]   ;;  %vm12001_vm11 = vmmov %vm11861_vm0 }
 0x22e   : > { %7292 = vmatprep.mubr.msk.bf16.mxu0 %vm11956_vm14, %v10000_v29  ;;  %v2322_v57 = vpop.f32.mrf.mxu1  ;;  %v4815_v45 = vrot.slane %v7574_v50, 1  ;;  %v4813_v29 = vrot.slane %v7575_v5, 1  ;;  %7305 = vmatpush3.bf16.msra.mxu1 %v7567_v13  ;;  %v11964_v44 = vld [vmem:[#allocation29_spill] sm:$0xff]  ;;  %v11966_v5 = vld [vmem:[#allocation28_spill] sm:$0xff]  ;;  %vm12004_vm5 = vmmov %vm11861_vm0 }
 0x22f   : > { %v10441_v18 = vpop.f32.mrf.mxu0  ;;  %v2323_v31 = vadd.f32 %v2322_v57, %v10184_v59  ;;  %v10445_v23 = vadd.f32 %v10288_v34, %v2331_v32  ;;  %v11975_v13 = vld [vmem:[#allocation17_spill] sm:$0xff]  ;;  %vm12011_vm14 = vmmov %vm11861_vm0 }
 0x230   : > { %v7003_v0 = vpop.f32.mrf.mxu1  ;;  %v4814_v34 = vsel %vm4805_vm8, %v4811_v62, %v4813_v29 }
 0x231   : > { %v10447_v4 = vpop.f32.mrf.mxu0  ;;  %v2334_v43 = vadd.f32 %v7003_v0, %v10190_v53  ;;  %v10451_v8 = vadd.f32 %v10299_v41, %v2323_v31  ;;  %v4816_v53 = vsel %vm4805_vm8, %v4813_v29, %v4815_v45  ;;  %v11965_v31 = vld [vmem:[#allocation5_spill] sm:$0xff] }
 0x232   : > { %v2325_v58 = vpop.f32.mrf.mxu1 }
 0x233   : > { %v10453_v52 = vpop.f32.mrf.mxu0  ;;  %v2326_v59 = vadd.f32 %v2325_v58, %v10194_v14  ;;  %v10458_v16 = vadd.f32 %v10303_v11, %v2334_v43  ;;  %v5208_v14 = vshrl.u32 %v7566_v12, 16  ;;  %v5211_v11 = vshll.u32 %v7566_v12, 16  ;;  %v11967_v12 = vld [vmem:[#allocation12_spill] sm:$0xff] }
 0x234   : > { %11957 = vst [vmem:[#allocation42_spill] sm:$0xff] %v10453_v52  ;;  %v7006_v30 = vpop.f32.mrf.mxu1  ;;  %7233 = vmatmul.mubr.msk.bf16.gmra.mxu1 %vm11861_vm0, %v4814_v34  ;;  %v11968_v58 = vrot.slane %v11967_v12, 1 }
 0x235   : > { %v10460_v37 = vpop.f32.mrf.mxu0  ;;  %7293 = vmatmul.mubr.msk.bf16.gmra.mxu0 %vm11958_vm10, %v10006_v61  ;;  %v2347_v41 = vadd.f32 %v7006_v30, %v10200_v49  ;;  %7236 = vmatprep.mubr.msk.bf16.mxu1 %vm11959_vm4, %v4816_v53  ;;  %v10471_v62 = vadd.f32 %v11961_v63, %v2326_v59  ;;  %v11963_v49 = vld [vmem:[#allocation38_spill] sm:$0xff]  ;;  %v5210_v32 = vrot.slane %v5208_v14, 1  ;;  %v5213_v57 = vrot.slane %v5211_v11, 2  ;;  %v11972_v14 = vld [vmem:[#allocation23_spill] sm:$0xff]  ;;  %v11973_v63 = vld [vmem:[#allocation13_spill] sm:$0xff] }
 0x236   : > { %7296 = vmatprep.mubr.msk.bf16.mxu0 %vm11960_vm7, %v10024_v25  ;;  %v2338_v27 = vpop.f32.mrf.mxu1  ;;  %v4818_v59 = vsel %vm4805_vm8, %v4815_v45, %v11968_v58  ;;  %vm11982_vm8 = vmmov %vm11861_vm0 }
 0x237   : > { %v10476_v61 = vpop.f32.mrf.mxu0  ;;  %v2339_v40 = vadd.f32 %v2338_v27, %v11962_v2  ;;  %v10480_v20 = vadd.f32 %v11963_v49, %v2347_v41  ;;  %v11970_v41 = vld [vmem:[#allocation14_spill] sm:$0xff]  ;;  %v5214_v45 = vor.u32 %v5213_v57, %v5210_v32  ;;  %vm12015_vm10 = vmmov %vm11861_vm0 }
 0x238   : > { %v7007_v24 = vpop.f32.mrf.mxu1  ;;  %vm12017_vm4 = vmmov %vm11861_vm0 }
 0x239   : > { %v10482_v25 = vpop.f32.mrf.mxu0  ;;  %v2350_v21 = vadd.f32 %v7007_v24, %v11964_v44  ;;  %v10486_v0 = vadd.f32 %v11965_v31, %v2339_v40  ;;  %v11977_v40 = vld [vmem:[#allocation3_spill] sm:$0xff]  ;;  %vm12019_vm7 = vmmov %vm11861_vm0 }
 0x23a   : > { %v2341_v50 = vpop.f32.mrf.mxu1  ;;  %v11978_v31 = vld [vmem:[#allocation31_spill] sm:$0xff] }
 0x23b   : > { %v10488_v43 = vpop.f32.mrf.mxu0  ;;  %v2342_v29 = vadd.f32 %v2341_v50, %v11966_v5  ;;  %v10495_v34 = vadd.f32 %v10327_v9, %v2350_v21  ;;  %v11979_v5 = vld [vmem:[#allocation6_spill] sm:$0xff] }
 0x23c   : > { %v7010_v30 = vpop.f32.mrf.mxu1  ;;  %7237 = vmatmul.mubr.msk.bf16.gmra.mxu1 %vm11969_vm2, %v4818_v59  ;;  %v5215_v12 = vsel %vm5130_vm3, %v11979_v5, %v5214_v45  ;;  %vm11986_vm3 = vmmov %vm11861_vm0 }
 0x23d   : > { %v10497_v53 = vpop.f32.mrf.mxu0  ;;  %7297 = vmatmul.mubr.msk.bf16.gmra.mxu0 %vm11971_vm15, %v11970_v41  ;;  %v2363_v11 = vadd.f32 %v7010_v30, %v11972_v14  ;;  %7240 = vmatprep.mubr.msk.bf16.mxu1 %vm11974_vm13, %v11973_v63  ;;  %v10508_v9 = vadd.f32 %v10331_v42, %v2342_v29  ;;  %v11980_v29 = vld [vmem:[#allocation30_spill] sm:$0xff]  ;;  %v11981_v41 = vld [vmem:[#allocation15_spill] sm:$0xff]  ;;  %v11984_v14 = vld [vmem:[#allocation24_spill] sm:$0xff] }
 0x23e   : > { %7300 = vmatprep.mubr.msk.bf16.mxu0 %vm11976_vm1, %v11975_v13  ;;  %v2354_v27 = vpop.f32.mrf.mxu1  ;;  %vm12047_vm2 = vmmov %vm11861_vm0 }
 0x23f   : > { %v10510_v2 = vpop.f32.mrf.mxu0  ;;  %v2355_v49 = vadd.f32 %v2354_v27, %v11977_v40  ;;  %v10514_v24 = vadd.f32 %v10334_v56, %v2363_v11  ;;  %vm12048_vm15 = vmmov %vm11861_vm0 }
 0x240   : > { %v7011_v44 = vpop.f32.mrf.mxu1  ;;  %vm12049_vm13 = vmmov %vm11861_vm0 }
 0x241   : > { %v10516_v21 = vpop.f32.mrf.mxu0  ;;  %v2366_v50 = vadd.f32 %v7011_v44, %v11978_v31  ;;  %v10522_v32 = vadd.f32 %v10344_v54, %v2355_v49  ;;  %v11985_v54 = vld [vmem:[#allocation7_spill] sm:$0xff]  ;;  %v11988_v31 = vld [vmem:[#allocation34_spill] sm:$0xff]  ;;  %vm12050_vm1 = vmmov %vm11861_vm0 }
 0x242   : > { %v2357_v42 = vpop.f32.mrf.mxu1 }
 0x243   : > { %v10524_v57 = vpop.f32.mrf.mxu0  ;;  %v2358_v58 = vadd.f32 %v2357_v42, %v11980_v29  ;;  %v10528_v59 = vadd.f32 %v10350_v22, %v2366_v50  ;;  %v11987_v22 = vld [vmem:[#allocation36_spill] sm:$0xff] }
 0x244   : > { %v7014_v56 = vpop.f32.mrf.mxu1  ;;  %7241 = vmatmul.mubr.msk.bf16.gmra.mxu1 %vm11982_vm8, %v11981_v41  ;;  %vm12051_vm8 = vmmov %vm11861_vm0 }
 0x245   : > { %v10530_v30 = vpop.f32.mrf.mxu0  ;;  %7301 = vmatmul.mubr.msk.bf16.gmra.mxu0 %vm11983_vm9, %v5215_v12  ;;  %v2379_v11 = vadd.f32 %v7014_v56, %v11984_v14  ;;  %7244 = vmatprep.mubr.msk.bf16.mxu1 %vm11986_vm3, %v11985_v54  ;;  %v10539_v63 = vadd.f32 %v10356_v15, %v2358_v58  ;;  %v11989_v15 = vld [vmem:[#allocation32_spill] sm:$0xff]  ;;  %v11992_v14 = vld [vmem:[#allocation37_spill] sm:$0xff]  ;;  %v11993_v54 = vld [vmem:[#allocation10_spill] sm:$0xff] }
 0x246   : > { %v2370_v13 = vpop.f32.mrf.mxu1  ;;  %vm12052_vm9 = vmmov %vm11861_vm0 }
 0x247   : > { %v10541_v45 = vpop.f32.mrf.mxu0  ;;  %v2371_v27 = vadd.f32 %v2370_v13, %v11987_v22  ;;  %v10545_v40 = vadd.f32 %v10363_v7, %v2379_v11  ;;  %v11990_v7 = vld [vmem:[#allocation18_spill] sm:$0xff]  ;;  %vm12053_vm3 = vmmov %vm11861_vm0 }
 0x248   : > { %v7015_v49 = vpop.f32.mrf.mxu1 }
 0x249   : > { %v10547_v44 = vpop.f32.mrf.mxu0  ;;  %v2382_v50 = vadd.f32 %v7015_v49, %v11988_v31  ;;  %v10551_v5 = vadd.f32 %v10376_v39, %v2371_v27  ;;  %v11995_v27 = vld [vmem:[#allocation33_spill] sm:$0xff] }
 0x24a   : > { %v2373_v12 = vpop.f32.mrf.mxu1 }
 0x24b   : > { %v10553_v42 = vpop.f32.mrf.mxu0  ;;  %v2374_v29 = vadd.f32 %v2373_v12, %v11989_v15  ;;  %v10557_v58 = vadd.f32 %v10382_v36, %v2382_v50  ;;  %v11996_v12 = vld [vmem:[#allocation41_spill] sm:$0xff] }
 0x24c   : > { %v7018_v56 = vpop.f32.mrf.mxu1  ;;  %7245 = vmatmul.mubr.msk.bf16.gmra.mxu1 %vm11991_vm6, %v11990_v7  ;;  %vm12055_vm6 = vmmov %vm11861_vm0 }
 0x24d   : > { %v10559_v41 = vpop.f32.mrf.mxu0  ;;  %v2395_v11 = vadd.f32 %v7018_v56, %v11992_v14  ;;  %7248 = vmatprep.mubr.msk.bf16.mxu1 %vm11994_vm12, %v11993_v54  ;;  %v10567_v39 = vadd.f32 %v10388_v35, %v2374_v29  ;;  %v11998_v35 = vld [vmem:[#allocation40_spill] sm:$0xff]  ;;  %vm12059_vm12 = vmmov %vm11861_vm0 }
 0x24e   : > { %v2386_v13 = vpop.f32.mrf.mxu1 }
 0x24f   : > { %v10569_v22 = vpop.f32.mrf.mxu0  ;;  %v2387_v36 = vadd.f32 %v2386_v13, %v11995_v27  ;;  %v10573_v49 = vadd.f32 %v10396_v38, %v2395_v11  ;;  %v12000_v38 = vld [vmem:[#allocation22_spill] sm:$0xff]  ;;  %v12002_v11 = vld [vmem:[#allocation39_spill] sm:$0xff] }
 0x250   : > { %v7019_v31 = vpop.f32.mrf.mxu1 }
 0x251   : > { %v10575_v50 = vpop.f32.mrf.mxu0  ;;  %v2398_v15 = vadd.f32 %v7019_v31, %v11996_v12  ;;  %v10579_v56 = vadd.f32 %v10409_v3, %v2387_v36  ;;  %v12003_v31 = vld [vmem:[#allocation19_spill] sm:$0xff] }
 0x252   : > { %v2389_v7 = vpop.f32.mrf.mxu1 }
 0x253   : > { %11997 = vst [vmem:[#allocation35_spill] sm:$0xff] %v10579_v56  ;;  %v10581_v14 = vpop.f32.mrf.mxu0  ;;  %v2390_v29 = vadd.f32 %v2389_v7, %v11998_v35  ;;  %v10585_v54 = vadd.f32 %v10415_v51, %v2398_v15  ;;  %v12005_v7 = vld [vmem:[#allocation11_spill] sm:$0xff] }
 0x254   : > { %v7022_v13 = vpop.f32.mrf.mxu1  ;;  %7249 = vmatmul.mubr.msk.bf16.gmra.mxu1 %vm12001_vm11, %v12000_v38  ;;  %v12007_v38 = vld [vmem:[#allocation8_spill] sm:$0xff]  ;;  %vm12061_vm11 = vmmov %vm11861_vm0 }
 0x255   : > { %11999 = vst [vmem:[#allocation27_spill] sm:$0xff] %v10585_v54  ;;  %v10587_v27 = vpop.f32.mrf.mxu0  ;;  %v2411_v52 = vadd.f32 %v7022_v13, %v12002_v11  ;;  %7252 = vmatprep.mubr.msk.bf16.mxu1 %vm12004_vm5, %v12003_v31  ;;  %v10595_v3 = vadd.f32 %v10421_v46, %v2390_v29  ;;  %v7568_v46 = vld [vmem:[%s11267_s5] sm:$0xff]   ;;  %vm12063_vm5 = vmmov %vm11861_vm0 }
 0x256   : > { %v2402_v36 = vpop.f32.mrf.mxu1  ;;  %7306 = vmatprep.subr.bf16.mxu1 %v7568_v46 }
 0x257   : > { %v10597_v12 = vpop.f32.mrf.mxu0  ;;  %v2403_v51 = vadd.f32 %v2402_v36, %v12005_v7  ;;  %v10601_v15 = vadd.f32 %v10428_v28, %v2411_v52  ;;  %v12010_v36 = vld [vmem:[#allocation16_spill] sm:$0xff]  ;;  %7307 = vmatpush3.bf16.msra.mxu1 %v7568_v46 }
 0x258   : > { %v7023_v35 = vpop.f32.mrf.mxu1 }
 0x259   : > { %12006 = vst [vmem:[#allocation38_spill] sm:$0xff] %v10601_v15  ;;  %v10603_v54 = vpop.f32.mrf.mxu0  ;;  %v2414_v56 = vadd.f32 %v7023_v35, %v12007_v38  ;;  %v10607_v13 = vadd.f32 %v10441_v18, %v2403_v51  ;;  %v12012_v18 = vld [vmem:[#allocation4_spill] sm:$0xff]  ;;  %v12013_v51 = vld [vmem:[#allocation25_spill] sm:$0xff] }
 0x25a   : > { %v10612_v29 = vpop.f32.mrf.mxu1 }
 0x25b   : > { %12008 = vst [vmem:[#allocation29_spill] sm:$0xff] %v10607_v13  ;;  %v10614_v11 = vpop.f32.mrf.mxu0  ;;  %v10617_v31 = vadd.f32 %v10447_v4, %v2414_v56 }
 0x25c   : > { %v7070_v28 = vpop.f32.mrf.mxu1  ;;  %7253 = vmatmul.mubr.msk.bf16.gmra.mxu1 %vm12011_vm14, %v12010_v36  ;;  %vm12064_vm14 = vmmov %vm11861_vm0 }
 0x25d   : > { %12009 = vst [vmem:[#allocation5_spill] sm:$0xff] %v10617_v31  ;;  %v10619_v52 = vpop.f32.mrf.mxu0  ;;  %v3339_v7 = vadd.f32 %v7070_v28, %v12012_v18  ;;  %7256 = vmatprep.mubr.msk.bf16.mxu1 %vm11861_vm0, %v12013_v51 }
 0x25e   : > { %v3194_v35 = vpop.f32.mrf.mxu1 }
 0x25f   : > { %v10626_v38 = vpop.f32.mrf.mxu0  ;;  %v3337_v13 = vadd.f32 %v3194_v35, %v10354_v55  ;;  %v10630_v4 = vadd.f32 %v10460_v37, %v3339_v7  ;;  %v12014_v37 = vld [vmem:[#allocation20_spill] sm:$0xff] }
 0x260   : > { %v7071_v56 = vpop.f32.mrf.mxu1 }
 0x261   : > { %v10632_v31 = vpop.f32.mrf.mxu0  ;;  %v3340_v15 = vadd.f32 %v7071_v56, %v10361_v47  ;;  %v10636_v36 = vadd.f32 %v10476_v61, %v3337_v13  ;;  %v12016_v47 = vld [vmem:[#allocation26_spill] sm:$0xff] }
 0x262   : > { %v3197_v28 = vpop.f32.mrf.mxu1 }
 0x263   : > { %v10638_v18 = vpop.f32.mrf.mxu0  ;;  %v3338_v46 = vadd.f32 %v3197_v28, %v10374_v17  ;;  %v10642_v51 = vadd.f32 %v10482_v25, %v3340_v15 }
 0x264   : > { %v7074_v55 = vpop.f32.mrf.mxu1  ;;  %7257 = vmatmul.mubr.msk.bf16.gmra.mxu1 %vm12015_vm10, %v12014_v37  ;;  %vm12065_vm10 = vmmov %vm11861_vm0 }
 0x265   : > { %v10644_v35 = vpop.f32.mrf.mxu0  ;;  %v3343_v7 = vadd.f32 %v7074_v55, %v10380_v48  ;;  %7260 = vmatprep.mubr.msk.bf16.mxu1 %vm12017_vm4, %v12016_v47  ;;  %v10652_v61 = vadd.f32 %v10488_v43, %v3338_v46  ;;  %vm12066_vm4 = vmmov %vm11861_vm0 }
 0x266   : > { %v3210_v13 = vpop.f32.mrf.mxu1 }
 0x267   : > { %v10654_v56 = vpop.f32.mrf.mxu0  ;;  %v3341_v17 = vadd.f32 %v3210_v13, %v10386_v1  ;;  %v10658_v25 = vadd.f32 %v10497_v53, %v3343_v7  ;;  %v12018_v53 = vld [vmem:[#allocation21_spill] sm:$0xff] }
 0x268   : > { %v7075_v15 = vpop.f32.mrf.mxu1 }
 0x269   : > { %v10660_v28 = vpop.f32.mrf.mxu0  ;;  %v3344_v37 = vadd.f32 %v7075_v15, %v10394_v6  ;;  %v10664_v48 = vadd.f32 %v10510_v2, %v3341_v17 }
 0x26a   : > { %v3213_v55 = vpop.f32.mrf.mxu1 }
 0x26b   : > { %v10666_v47 = vpop.f32.mrf.mxu0  ;;  %v3342_v43 = vadd.f32 %v3213_v55, %v10407_v60  ;;  %v10670_v46 = vadd.f32 %v10516_v21, %v3344_v37 }
 0x26c   : > { %v7078_v1 = vpop.f32.mrf.mxu1  ;;  %7261 = vmatmul.mubr.msk.bf16.gmra.mxu1 %vm12019_vm7, %v12018_v53  ;;  %vm12067_vm7 = vmmov %vm11861_vm0 }
 0x26d   : > { %v10672_v13 = vpop.f32.mrf.mxu0  ;;  %v3347_v7 = vadd.f32 %v7078_v1, %v10413_v26  ;;  %v10678_v6 = vadd.f32 %v10524_v57, %v3342_v43 }
 0x26e   : > { %v3226_v2 = vpop.f32.mrf.mxu1 }
 0x26f   : > { %v10680_v17 = vpop.f32.mrf.mxu0  ;;  %v3345_v15 = vadd.f32 %v3226_v2, %v10419_v10  ;;  %v10684_v60 = vadd.f32 %v10530_v30, %v3347_v7 }
 0x270   : > { %v7079_v21 = vpop.f32.mrf.mxu1 }
 0x271   : > { %v10686_v37 = vpop.f32.mrf.mxu0  ;;  %v3348_v55 = vadd.f32 %v7079_v21, %v10426_v33  ;;  %v10690_v53 = vadd.f32 %v10541_v45, %v3345_v15 }
 0x272   : > { %v3229_v26 = vpop.f32.mrf.mxu1 }
 0x273   : > { %v10692_v1 = vpop.f32.mrf.mxu0  ;;  %v3346_v57 = vadd.f32 %v3229_v26, %v10439_v19  ;;  %v10696_v43 = vadd.f32 %v10547_v44, %v3348_v55 }
 0x274   : > { %v7082_v10 = vpop.f32.mrf.mxu1 }
 0x275   : > { %v10698_v2 = vpop.f32.mrf.mxu0  ;;  %v3351_v30 = vadd.f32 %v7082_v10, %v10445_v23  ;;  %v10702_v7 = vadd.f32 %v10553_v42, %v3346_v57 }
 0x276   : > { %v3242_v33 = vpop.f32.mrf.mxu1 }
 0x277   : > { %v10704_v21 = vpop.f32.mrf.mxu0  ;;  %v3349_v45 = vadd.f32 %v3242_v33, %v10451_v8  ;;  %v10708_v15 = vadd.f32 %v10559_v41, %v3351_v30 }
 0x278   : > { %v7083_v19 = vpop.f32.mrf.mxu1 }
 0x279   : > { %v10710_v26 = vpop.f32.mrf.mxu0  ;;  %v3352_v44 = vadd.f32 %v7083_v19, %v10458_v16  ;;  %v10714_v55 = vadd.f32 %v10569_v22, %v3349_v45 }
 0x27a   : > { %v3245_v23 = vpop.f32.mrf.mxu1 }
 0x27b   : > { %v10716_v10 = vpop.f32.mrf.mxu0  ;;  %v3350_v42 = vadd.f32 %v3245_v23, %v10471_v62  ;;  %v10720_v57 = vadd.f32 %v10575_v50, %v3352_v44 }
 0x27c   : > { %v7086_v8 = vpop.f32.mrf.mxu1 }
 0x27d   : > { %v10722_v33 = vpop.f32.mrf.mxu0  ;;  %v3355_v41 = vadd.f32 %v7086_v8, %v10480_v20  ;;  %v10726_v30 = vadd.f32 %v10581_v14, %v3350_v42 }
 0x27e   : > { %v3258_v16 = vpop.f32.mrf.mxu1 }
 0x27f   : > { %v10728_v19 = vpop.f32.mrf.mxu0  ;;  %v3353_v22 = vadd.f32 %v3258_v16, %v10486_v0  ;;  %v10732_v45 = vadd.f32 %v10587_v27, %v3355_v41 }
 0x280   : > { %v7087_v62 = vpop.f32.mrf.mxu1 }
 0x281   : > { %v10734_v23 = vpop.f32.mrf.mxu0  ;;  %v3356_v50 = vadd.f32 %v7087_v62, %v10495_v34  ;;  %v10738_v44 = vadd.f32 %v10597_v12, %v3353_v22 }
 0x282   : > { %v3261_v20 = vpop.f32.mrf.mxu1 }
 0x283   : > { %v10740_v8 = vpop.f32.mrf.mxu0  ;;  %v3354_v14 = vadd.f32 %v3261_v20, %v10508_v9  ;;  %v10744_v42 = vadd.f32 %v10603_v54, %v3356_v50 }
 0x284   : > { %v7090_v0 = vpop.f32.mrf.mxu1 }
 0x285   : > { %v10746_v16 = vpop.f32.mrf.mxu0  ;;  %v3359_v27 = vadd.f32 %v7090_v0, %v10514_v24  ;;  %v10750_v41 = vadd.f32 %v10614_v11, %v3354_v14 }
 0x286   : > { %v3274_v34 = vpop.f32.mrf.mxu1 }
 0x287   : > { %v10752_v62 = vpop.f32.mrf.mxu0  ;;  %v3357_v12 = vadd.f32 %v3274_v34, %v10522_v32  ;;  %v10756_v22 = vadd.f32 %v10619_v52, %v3359_v27 }
 0x288   : > { %v7091_v9 = vpop.f32.mrf.mxu1 }
 0x289   : > { %v10758_v20 = vpop.f32.mrf.mxu0  ;;  %v3360_v54 = vadd.f32 %v7091_v9, %v10528_v59  ;;  %v10762_v50 = vadd.f32 %v10626_v38, %v3357_v12 }
 0x28a   : > { %v3277_v24 = vpop.f32.mrf.mxu1 }
 0x28b   : > { %v10764_v0 = vpop.f32.mrf.mxu0  ;;  %v3358_v11 = vadd.f32 %v3277_v24, %v10539_v63  ;;  %v10768_v14 = vadd.f32 %v10632_v31, %v3360_v54 }
 0x28c   : > { %v7094_v32 = vpop.f32.mrf.mxu1 }
 0x28d   : > { %v10770_v34 = vpop.f32.mrf.mxu0  ;;  %v3363_v52 = vadd.f32 %v7094_v32, %v10545_v40  ;;  %v10774_v27 = vadd.f32 %v10638_v18, %v3358_v11 }
 0x28e   : > { %v3290_v59 = vpop.f32.mrf.mxu1 }
 0x28f   : > { %v10776_v9 = vpop.f32.mrf.mxu0  ;;  %v3361_v38 = vadd.f32 %v3290_v59, %v10551_v5  ;;  %v10780_v12 = vadd.f32 %v10644_v35, %v3363_v52 }
 0x290   : > { %v7095_v63 = vpop.f32.mrf.mxu1 }
 0x291   : > { %12020 = vst [vmem:[#allocation28_spill] sm:$0xff] %v10780_v12  ;;  %v10782_v24 = vpop.f32.mrf.mxu0  ;;  %v3364_v31 = vadd.f32 %v7095_v63, %v10557_v58  ;;  %v10786_v54 = vadd.f32 %v10654_v56, %v3361_v38  ;;  %v12024_v56 = vld [vmem:[#allocation35_spill] sm:$0xff]  ;;  %v12033_v12 = vld [vmem:[#allocation42_spill] sm:$0xff] }
 0x292   : > { %v3293_v40 = vpop.f32.mrf.mxu1 }
 0x293   : > { %12021 = vst [vmem:[#allocation12_spill] sm:$0xff] %v10786_v54  ;;  %v10788_v32 = vpop.f32.mrf.mxu0  ;;  %v3362_v18 = vadd.f32 %v3293_v40, %v10567_v39  ;;  %v10792_v11 = vadd.f32 %v10660_v28, %v3364_v31  ;;  %v12026_v28 = vld [vmem:[#allocation27_spill] sm:$0xff] }
 0x294   : > { %v7098_v5 = vpop.f32.mrf.mxu1 }
 0x295   : > { %12022 = vst [vmem:[#allocation14_spill] sm:$0xff] %v10792_v11  ;;  %v10794_v59 = vpop.f32.mrf.mxu0  ;;  %v3367_v35 = vadd.f32 %v7098_v5, %v10573_v49  ;;  %v10798_v52 = vadd.f32 %v10666_v47, %v3362_v18 }
 0x296   : > { %v3306_v58 = vpop.f32.mrf.mxu1 }
 0x297   : > { %12023 = vst [vmem:[#allocation23_spill] sm:$0xff] %v10798_v52  ;;  %v10800_v63 = vpop.f32.mrf.mxu0  ;;  %v3365_v38 = vadd.f32 %v3306_v58, %v12024_v56  ;;  %v10804_v54 = vadd.f32 %v10672_v13, %v3367_v35  ;;  %v12029_v13 = vld [vmem:[#allocation9_spill] sm:$0xff] }
 0x298   : > { %v7099_v39 = vpop.f32.mrf.mxu1  ;;  %v2406_v35 = vadd.f32 %v10612_v29, %v12029_v13 }
 0x299   : > { %12025 = vst [vmem:[#allocation13_spill] sm:$0xff] %v10804_v54  ;;  %v10806_v40 = vpop.f32.mrf.mxu0  ;;  %v3368_v31 = vadd.f32 %v7099_v39, %v12026_v28  ;;  %v10810_v11 = vadd.f32 %v10680_v17, %v3365_v38  ;;  %v12030_v54 = vld [vmem:[#allocation38_spill] sm:$0xff]  ;;  %v12031_v28 = vld [vmem:[#allocation29_spill] sm:$0xff] }
 0x29a   : > { %v3309_v49 = vpop.f32.mrf.mxu1  ;;  %v2787_v29 = vadd.f32 %v12033_v12, %v2406_v35 }
 0x29b   : > { %12027 = vst [vmem:[#allocation17_spill] sm:$0xff] %v10810_v11  ;;  %v10812_v5 = vpop.f32.mrf.mxu0  ;;  %v3366_v47 = vadd.f32 %v3309_v49, %v10595_v3  ;;  %v10816_v18 = vadd.f32 %v10686_v37, %v3368_v31  ;;  %v12032_v49 = vld [vmem:[#allocation5_spill] sm:$0xff] }
 0x29c   : > { %v7102_v58 = vpop.f32.mrf.mxu1 }
 0x29d   : > { %12028 = vst [vmem:[#allocation3_spill] sm:$0xff] %v10816_v18  ;;  %v10818_v56 = vpop.f32.mrf.mxu0  ;;  %v3371_v52 = vadd.f32 %v7102_v58, %v12030_v54  ;;  %v10824_v39 = vadd.f32 %v10692_v1, %v3366_v47 }
 0x29e   : > { %v3322_v17 = vpop.f32.mrf.mxu1 }
 0x29f   : > { %v10826_v38 = vpop.f32.mrf.mxu0  ;;  %v3369_v11 = vadd.f32 %v3322_v17, %v12031_v28  ;;  %v10830_v3 = vadd.f32 %v10698_v2, %v3371_v52 }
 0x2a0   : > { %v7103_v37 = vpop.f32.mrf.mxu1 }
 0x2a1   : > { %v10832_v31 = vpop.f32.mrf.mxu0  ;;  %v3372_v18 = vadd.f32 %v7103_v37, %v12032_v49  ;;  %v10837_v54 = vadd.f32 %v10704_v21, %v3369_v11 }
 0x2a2   : > { %v3325_v1 = vpop.f32.mrf.mxu1 }
 0x2a3   : > { %v10839_v47 = vpop.f32.mrf.mxu0  ;;  %v3370_v58 = vadd.f32 %v3325_v1, %v2787_v29  ;;  %v10842_v13 = vadd.f32 %v10710_v26, %v3372_v18 }
 0x2a4   : > { %v7150_v17 = vpop.f32.mrf.mxu1 }
 0x2a5   : > { %v10844_v2 = vpop.f32.mrf.mxu0  ;;  %v4202_v52 = vadd.f32 %v7150_v17, %v10630_v4  ;;  %v10848_v28 = vadd.f32 %v10716_v10, %v3370_v58 }
 0x2a6   : > { %v4057_v37 = vpop.f32.mrf.mxu1 }
 0x2a7   : > { %v10850_v12 = vpop.f32.mrf.mxu0  ;;  %v4200_v21 = vadd.f32 %v4057_v37, %v10636_v36  ;;  %v10854_v11 = vadd.f32 %v10722_v33, %v4202_v52 }
 0x2a8   : > { %v7151_v35 = vpop.f32.mrf.mxu1 }
 0x2a9   : > { %v10856_v49 = vpop.f32.mrf.mxu0  ;;  %v4203_v26 = vadd.f32 %v7151_v35, %v10642_v51  ;;  %v10860_v18 = vadd.f32 %v10728_v19, %v4200_v21 }
 0x2aa   : > { %v4060_v4 = vpop.f32.mrf.mxu1 }
 0x2ab   : > { %v10862_v29 = vpop.f32.mrf.mxu0  ;;  %v4201_v10 = vadd.f32 %v4060_v4, %v10652_v61  ;;  %v10866_v1 = vadd.f32 %v10734_v23, %v4203_v26 }
 0x2ac   : > { %v7154_v36 = vpop.f32.mrf.mxu1 }
 0x2ad   : > { %v10868_v58 = vpop.f32.mrf.mxu0  ;;  %v4206_v33 = vadd.f32 %v7154_v36, %v10658_v25  ;;  %v10872_v17 = vadd.f32 %v10740_v8, %v4201_v10 }
 0x2ae   : > { %v4073_v51 = vpop.f32.mrf.mxu1 }
 0x2af   : > { %v10874_v52 = vpop.f32.mrf.mxu0  ;;  %v4204_v19 = vadd.f32 %v4073_v51, %v10664_v48  ;;  %v10878_v37 = vadd.f32 %v10746_v16, %v4206_v33 }
 0x2b0   : > { %v7155_v61 = vpop.f32.mrf.mxu1 }
 0x2b1   : > { %v10880_v21 = vpop.f32.mrf.mxu0  ;;  %v4207_v23 = vadd.f32 %v7155_v61, %v10670_v46  ;;  %v10884_v35 = vadd.f32 %v10752_v62, %v4204_v19 }
 0x2b2   : > { %v4076_v25 = vpop.f32.mrf.mxu1 }
 0x2b3   : > { %v10886_v26 = vpop.f32.mrf.mxu0  ;;  %v4205_v8 = vadd.f32 %v4076_v25, %v10678_v6  ;;  %v10890_v4 = vadd.f32 %v10758_v20, %v4207_v23 }
 0x2b4   : > { %v7158_v48 = vpop.f32.mrf.mxu1 }
 0x2b5   : > { %v10892_v10 = vpop.f32.mrf.mxu0  ;;  %v4210_v16 = vadd.f32 %v7158_v48, %v10684_v60  ;;  %v10896_v36 = vadd.f32 %v10764_v0, %v4205_v8 }
 0x2b6   : > { %v4089_v46 = vpop.f32.mrf.mxu1 }
 0x2b7   : > { %v10898_v33 = vpop.f32.mrf.mxu0  ;;  %v4208_v62 = vadd.f32 %v4089_v46, %v10690_v53  ;;  %v10902_v51 = vadd.f32 %v10770_v34, %v4210_v16 }
 0x2b8   : > { %v7159_v6 = vpop.f32.mrf.mxu1 }
 0x2b9   : > { %v10904_v19 = vpop.f32.mrf.mxu0  ;;  %v4211_v20 = vadd.f32 %v7159_v6, %v10696_v43  ;;  %v10908_v61 = vadd.f32 %v10776_v9, %v4208_v62 }
 0x2ba   : > { %v4092_v60 = vpop.f32.mrf.mxu1 }
 0x2bb   : > { %v10910_v23 = vpop.f32.mrf.mxu0  ;;  %v4209_v0 = vadd.f32 %v4092_v60, %v10702_v7  ;;  %v10914_v25 = vadd.f32 %v10782_v24, %v4211_v20 }
 0x2bc   : > { %v7162_v53 = vpop.f32.mrf.mxu1 }
 0x2bd   : > { %v10916_v8 = vpop.f32.mrf.mxu0  ;;  %v4214_v34 = vadd.f32 %v7162_v53, %v10708_v15  ;;  %v10920_v48 = vadd.f32 %v10788_v32, %v4209_v0 }
 0x2be   : > { %v4105_v43 = vpop.f32.mrf.mxu1 }
 0x2bf   : > { %v10922_v16 = vpop.f32.mrf.mxu0  ;;  %v4212_v9 = vadd.f32 %v4105_v43, %v10714_v55  ;;  %v10926_v46 = vadd.f32 %v10794_v59, %v4214_v34 }
 0x2c0   : > { %v7163_v7 = vpop.f32.mrf.mxu1 }
 0x2c1   : > { %v10928_v62 = vpop.f32.mrf.mxu0  ;;  %v4215_v24 = vadd.f32 %v7163_v7, %v10720_v57  ;;  %v10932_v6 = vadd.f32 %v10800_v63, %v4212_v9 }
 0x2c2   : > { %v4108_v15 = vpop.f32.mrf.mxu1 }
 0x2c3   : > { %v10934_v20 = vpop.f32.mrf.mxu0  ;;  %v4213_v32 = vadd.f32 %v4108_v15, %v10726_v30  ;;  %v10938_v60 = vadd.f32 %v10806_v40, %v4215_v24 }
 0x2c4   : > { %v7166_v55 = vpop.f32.mrf.mxu1 }
 0x2c5   : > { %v10940_v0 = vpop.f32.mrf.mxu0  ;;  %v4218_v59 = vadd.f32 %v7166_v55, %v10732_v45  ;;  %v10944_v53 = vadd.f32 %v10812_v5, %v4213_v32 }
 0x2c6   : > { %v4121_v57 = vpop.f32.mrf.mxu1 }
 0x2c7   : > { %v10946_v34 = vpop.f32.mrf.mxu0  ;;  %v4216_v63 = vadd.f32 %v4121_v57, %v10738_v44  ;;  %v10950_v43 = vadd.f32 %v10818_v56, %v4218_v59 }
 0x2c8   : > { %v7167_v30 = vpop.f32.mrf.mxu1 }
 0x2c9   : > { %v10952_v9 = vpop.f32.mrf.mxu0  ;;  %v4219_v40 = vadd.f32 %v7167_v30, %v10744_v42  ;;  %v10956_v7 = vadd.f32 %v10826_v38, %v4216_v63 }
 0x2ca   : > { %v4124_v45 = vpop.f32.mrf.mxu1 }
 0x2cb   : > { %v10958_v24 = vpop.f32.mrf.mxu0  ;;  %v4217_v5 = vadd.f32 %v4124_v45, %v10750_v41  ;;  %v10962_v15 = vadd.f32 %v10832_v31, %v4219_v40 }
 0x2cc   : > { %v7170_v44 = vpop.f32.mrf.mxu1 }
 0x2cd   : > { %v10964_v32 = vpop.f32.mrf.mxu0  ;;  %v4222_v56 = vadd.f32 %v7170_v44, %v10756_v22  ;;  %v10968_v55 = vadd.f32 %v10839_v47, %v4217_v5 }
 0x2ce   : > { %v4137_v42 = vpop.f32.mrf.mxu1 }
 0x2cf   : > { %v10970_v59 = vpop.f32.mrf.mxu0  ;;  %v4220_v38 = vadd.f32 %v4137_v42, %v10762_v50  ;;  %v10974_v57 = vadd.f32 %v10844_v2, %v4222_v56  ;;  %v12036_v2 = vld [vmem:[#allocation28_spill] sm:$0xff] }
 0x2d0   : > { %v7171_v41 = vpop.f32.mrf.mxu1 }
 0x2d1   : > { %v10976_v63 = vpop.f32.mrf.mxu0  ;;  %v4223_v31 = vadd.f32 %v7171_v41, %v10768_v14  ;;  %v10980_v30 = vadd.f32 %v10850_v12, %v4220_v38  ;;  %v12038_v12 = vld [vmem:[#allocation12_spill] sm:$0xff] }
 0x2d2   : > { %v4140_v22 = vpop.f32.mrf.mxu1 }
 0x2d3   : > { %12034 = vst [vmem:[#allocation31_spill] sm:$0xff] %v10980_v30  ;;  %v10982_v40 = vpop.f32.mrf.mxu0  ;;  %v4221_v47 = vadd.f32 %v4140_v22, %v10774_v27  ;;  %v10986_v45 = vadd.f32 %v10856_v49, %v4223_v31  ;;  %v12040_v49 = vld [vmem:[#allocation14_spill] sm:$0xff] }
 0x2d4   : > { %v7174_v50 = vpop.f32.mrf.mxu1 }
 0x2d5   : > { %12035 = vst [vmem:[#allocation6_spill] sm:$0xff] %v10986_v45  ;;  %v10988_v5 = vpop.f32.mrf.mxu0  ;;  %v4226_v44 = vadd.f32 %v7174_v50, %v12036_v2  ;;  %v10992_v56 = vadd.f32 %v10862_v29, %v4221_v47  ;;  %v12042_v29 = vld [vmem:[#allocation23_spill] sm:$0xff] }
 0x2d6   : > { %v4153_v14 = vpop.f32.mrf.mxu1 }
 0x2d7   : > { %12037 = vst [vmem:[#allocation30_spill] sm:$0xff] %v10992_v56  ;;  %v10994_v42 = vpop.f32.mrf.mxu0  ;;  %v4224_v38 = vadd.f32 %v4153_v14, %v12038_v12  ;;  %v10998_v41 = vadd.f32 %v10868_v58, %v4226_v44  ;;  %v12044_v58 = vld [vmem:[#allocation13_spill] sm:$0xff] }
 0x2d8   : > { %v7175_v27 = vpop.f32.mrf.mxu1 }
 0x2d9   : > { %12039 = vst [vmem:[#allocation15_spill] sm:$0xff] %v10998_v41  ;;  %v11000_v22 = vpop.f32.mrf.mxu0  ;;  %v4227_v31 = vadd.f32 %v7175_v27, %v12040_v49  ;;  %v11004_v45 = vadd.f32 %v10874_v52, %v4224_v38  ;;  %v12045_v49 = vld [vmem:[#allocation17_spill] sm:$0xff] }
 0x2da   : > { %v4156_v50 = vpop.f32.mrf.mxu1 }
 0x2db   : > { %12041 = vst [vmem:[#allocation24_spill] sm:$0xff] %v11004_v45  ;;  %v11006_v2 = vpop.f32.mrf.mxu0  ;;  %v4225_v47 = vadd.f32 %v4156_v50, %v12042_v29  ;;  %v11010_v56 = vadd.f32 %v10880_v21, %v4227_v31  ;;  %v12046_v29 = vld [vmem:[#allocation3_spill] sm:$0xff] }
 0x2dc   : > { %v7178_v14 = vpop.f32.mrf.mxu1 }
 0x2dd   : > { %12043 = vst [vmem:[#allocation7_spill] sm:$0xff] %v11010_v56  ;;  %v11012_v12 = vpop.f32.mrf.mxu0  ;;  %v4230_v44 = vadd.f32 %v7178_v14, %v12044_v58  ;;  %v11016_v41 = vadd.f32 %v10886_v26, %v4225_v47 }
 0x2de   : > { %v4169_v27 = vpop.f32.mrf.mxu1 }
 0x2df   : > { %v4228_v52 = vadd.f32 %v4169_v27, %v12045_v49  ;;  %v11019_v38 = vpop.f32.mrf.mxu0  ;;  %v11022_v45 = vadd.f32 %v10892_v10, %v4230_v44 }
 0x2e0   : > { %v7179_v50 = vpop.f32.mrf.mxu1 }
 0x2e1   : > { %v4231_v21 = vadd.f32 %v7179_v50, %v12046_v29  ;;  %v11026_v31 = vadd.f32 %v10898_v33, %v4228_v52  ;;  %v11028_v30 = vpop.f32.mrf.mxu0 }
 0x2e2   : > { %v4172_v56 = vpop.f32.mrf.mxu1 }
 0x2e3   : > { %v4229_v26 = vadd.f32 %v4172_v56, %v10824_v39  ;;  %v11032_v47 = vadd.f32 %v10904_v19, %v4231_v21  ;;  %v11038_v27 = vpop.f32.mrf.mxu0 }
 0x2e4   : > { %v7182_v14 = vpop.f32.mrf.mxu1 }
 0x2e5   : > { %v4234_v58 = vadd.f32 %v7182_v14, %v10830_v3  ;;  %v11036_v10 = vadd.f32 %v10910_v23, %v4229_v26  ;;  %v11048_v50 = vpop.f32.mrf.mxu0 }
 0x2e6   : > { %v4185_v44 = vpop.f32.mrf.mxu1 }
 0x2e7   : > { %v4232_v33 = vadd.f32 %v4185_v44, %v10837_v54  ;;  %v11042_v49 = vadd.f32 %v10916_v8, %v4234_v58  ;;  %v11058_v26 = vpop.f32.mrf.mxu0 }
 0x2e8   : > { %v7183_v52 = vpop.f32.mrf.mxu1 }
 0x2e9   : > { %v4235_v39 = vadd.f32 %v7183_v52, %v10842_v13  ;;  %v11046_v19 = vadd.f32 %v10922_v16, %v4232_v33 }
 0x2ea   : > { %v4188_v56 = vpop.f32.mrf.mxu1 }
 0x2eb   : > { %v4233_v3 = vadd.f32 %v4188_v56, %v10848_v28  ;;  %v11052_v23 = vadd.f32 %v10928_v62, %v4235_v39  ;;  %v11065_v28 = vld [vmem:[%s11266_s4] ss:$0 sm:$0xff] }
 0x2ec   : > { %v7230_v29 = vpop.f32.mrf.mxu1 }
 0x2ed   : > { %v5088_v54 = vadd.f32 %v7230_v29, %v10854_v11  ;;  %v11056_v8 = vadd.f32 %v10934_v20, %v4233_v3  ;;  %v11069_v20 = vpop.f32.mrf.mxu0 }
 0x2ee   : > { %v4943_v21 = vpop.f32.mrf.mxu1 }
 0x2ef   : > { %v5461_v13 = vadd.f32 %v10940_v0, %v5088_v54  ;;  %v5086_v16 = vadd.f32 %v4943_v21, %v10860_v18 }
 0x2f0   : > { %v7231_v62 = vpop.f32.mrf.mxu1 }
 0x2f1   : > { %v5459_v14 = vadd.f32 %v10946_v34, %v5086_v16  ;;  %v5089_v11 = vadd.f32 %v7231_v62, %v10866_v1  ;;  %v5504_v44 = vadd.f32 %v11065_v28, %v5461_v13  ;;  %v11078_v1 = vpop.f32.mrf.mxu0 }
 0x2f2   : > { %v4946_v58 = vpop.f32.mrf.mxu1 }
 0x2f3   : > { %v5462_v33 = vadd.f32 %v10952_v9, %v5089_v11  ;;  %v5087_v0 = vadd.f32 %v4946_v58, %v10872_v17  ;;  %v5502_v52 = vadd.f32 %v11065_v28, %v5459_v14  ;;  %v5540_v29 = vmax.f32 %v5504_v44, 0.0  ;;  %v11085_v58 = vpop.f32.mrf.mxu0 }
 0x2f4   : > { %v7234_v18 = vpop.f32.mrf.mxu1 }
 0x2f5   : > { %v5505_v39 = vadd.f32 %v11065_v28, %v5462_v33  ;;  %v5460_v56 = vadd.f32 %v10958_v24, %v5087_v0  ;;  %v5092_v34 = vadd.f32 %v7234_v18, %v10878_v37  ;;  %v5538_v16 = vmax.f32 %v5502_v52, 0.0 }
 0x2f6   : > { %v4959_v3 = vpop.f32.mrf.mxu1 }
 0x2f7   : > { %v5541_v54 = vmax.f32 %v5505_v39, 0.0  ;;  %v5503_v21 = vadd.f32 %v11065_v28, %v5460_v56  ;;  %v5090_v9 = vadd.f32 %v4959_v3, %v10884_v35  ;;  %v5465_v17 = vadd.f32 %v10964_v32, %v5092_v34  ;;  %v11096_v56 = vpop.f32.mrf.mxu0 }
 0x2f8   : > { %v7235_v13 = vpop.f32.mrf.mxu1 }
 0x2f9   : > { %v5575_v62 = vpack.c.bf16 %v5541_v54, %v5540_v29  ;;  %v5539_v14 = vmax.f32 %v5503_v21, 0.0  ;;  %v5463_v11 = vadd.f32 %v10970_v59, %v5090_v9  ;;  %v5093_v24 = vadd.f32 %v7235_v13, %v10890_v4 }
 0x2fa   : > { %v4962_v37 = vpop.f32.mrf.mxu1  ;;  %v5508_v0 = vadd.f32 %v11065_v28, %v5465_v17 }
 0x2fb   : > { %v5574_v33 = vpack.c.bf16 %v5539_v14, %v5538_v16  ;;  %v5091_v44 = vadd.f32 %v4962_v37, %v10896_v36  ;;  %v5466_v35 = vadd.f32 %v10976_v63, %v5093_v24  ;;  %v5506_v32 = vadd.f32 %v11065_v28, %v5463_v11  ;;  %v11103_v16 = vpop.f32.mrf.mxu0 }
 0x2fc   : > { %v7238_v18 = vpop.f32.mrf.mxu1  ;;  %v5544_v3 = vmax.f32 %v5508_v0, 0.0 }
 0x2fd   : > { %v5464_v52 = vadd.f32 %v10982_v40, %v5091_v44  ;;  %v5096_v39 = vadd.f32 %v7238_v18, %v10902_v51  ;;  %7308 = vmatprep.mubr.msk.bf16.mxu1 %vm12047_vm2, %v5574_v33  ;;  %v5509_v4 = vadd.f32 %v11065_v28, %v5466_v35  ;;  %v5542_v54 = vmax.f32 %v5506_v32, 0.0  ;;  %v11114_v44 = vpop.f32.mrf.mxu0  ;;  %vm12068_vm2 = vmmov %vm11861_vm0 }
 0x2fe   : > { %v4975_v59 = vpop.f32.mrf.mxu1  ;;  %7309 = vmatmul.mubr.msk.bf16.vlgmr.msra.gmra.mxu1 %vm12048_vm15, %v5575_v62  ;;  %vm12069_vm15 = vmmov %vm11861_vm0 }
 0x2ff   : > { %v5507_v36 = vadd.f32 %v11065_v28, %v5464_v52  ;;  %v5469_v63 = vadd.f32 %v10988_v5, %v5096_v39  ;;  %v5094_v34 = vadd.f32 %v4975_v59, %v10908_v61  ;;  %v5545_v29 = vmax.f32 %v5509_v4, 0.0 }
 0x300   : > { %v7239_v40 = vpop.f32.mrf.mxu1 }
 0x301   : > { %v5543_v51 = vmax.f32 %v5507_v36, 0.0  ;;  %v5097_v21 = vadd.f32 %v7239_v40, %v10914_v25  ;;  %v5577_v9 = vpack.c.bf16 %v5545_v29, %v5544_v3  ;;  %v5467_v17 = vadd.f32 %v10994_v42, %v5094_v34  ;;  %v11121_v36 = vpop.f32.mrf.mxu0 }
 0x302   : > { %v4978_v13 = vpop.f32.mrf.mxu1  ;;  %v5512_v14 = vadd.f32 %v11065_v28, %v5469_v63 }
 0x303   : > { %v5576_v62 = vpack.c.bf16 %v5543_v51, %v5542_v54  ;;  %v5470_v5 = vadd.f32 %v11000_v22, %v5097_v21  ;;  %v5095_v61 = vadd.f32 %v4978_v13, %v10920_v48  ;;  %v5510_v25 = vadd.f32 %v11065_v28, %v5467_v17  ;;  %v5412_v51 = vpop.f32.mrf.mxu0 }
 0x304   : > { %v7242_v11 = vpop.f32.mrf.mxu1  ;;  %v5548_v0 = vmax.f32 %v5512_v14, 0.0 }
 0x305   : > { %v5513_v24 = vadd.f32 %v11065_v28, %v5470_v5  ;;  %v5100_v37 = vadd.f32 %v7242_v11, %v10926_v46  ;;  %7312 = vmatprep.mubr.msk.bf16.mxu1 %vm12049_vm13, %v5576_v62  ;;  %v5468_v42 = vadd.f32 %v11006_v2, %v5095_v61  ;;  %v5546_v2 = vmax.f32 %v5510_v25, 0.0  ;;  %v7295_v11 = vpop.f32.mrf.mxu0 }
 0x306   : > { %v4991_v33 = vpop.f32.mrf.mxu1  ;;  %7313 = vmatmul.mubr.msk.bf16.gmra.mxu1 %vm12050_vm1, %v5577_v9 }
 0x307   : > { %v5549_v22 = vmax.f32 %v5513_v24, 0.0  ;;  %v5473_v48 = vadd.f32 %v11012_v12, %v5100_v37  ;;  %v5098_v35 = vadd.f32 %v4991_v33, %v10932_v6  ;;  %v5511_v18 = vadd.f32 %v11065_v28, %v5468_v42 }
 0x308   : > { %v7243_v46 = vpop.f32.mrf.mxu1 }
 0x309   : > { %v5579_v32 = vpack.c.bf16 %v5549_v22, %v5548_v0  ;;  %v5471_v52 = vadd.f32 %v11019_v38, %v5098_v35  ;;  %v5101_v39 = vadd.f32 %v7243_v46, %v10938_v60  ;;  %v5547_v4 = vmax.f32 %v5511_v18, 0.0  ;;  %v5415_v22 = vpop.f32.mrf.mxu0  ;;  %v12054_v35 = vld [vmem:[#allocation31_spill] sm:$0xff] }
 0x30a   : > { %v4994_v59 = vpop.f32.mrf.mxu1  ;;  %v5516_v63 = vadd.f32 %v11065_v28, %v5473_v48 }
 0x30b   : > { %v5474_v34 = vadd.f32 %v11028_v30, %v5101_v39  ;;  %v5099_v12 = vadd.f32 %v4994_v59, %v10944_v53  ;;  %v5578_v6 = vpack.c.bf16 %v5547_v4, %v5546_v2  ;;  %v5514_v29 = vadd.f32 %v11065_v28, %v5471_v52 }
 0x30c   : > { %v7246_v3 = vpop.f32.mrf.mxu1  ;;  %v5552_v21 = vmax.f32 %v5516_v63, 0.0  ;;  %v7298_v63 = vpop.f32.mrf.mxu0 }
 0x30d   : > { %v5517_v40 = vadd.f32 %v11065_v28, %v5474_v34  ;;  %v5472_v38 = vadd.f32 %v11038_v27, %v5099_v12  ;;  %v5104_v60 = vadd.f32 %v7246_v3, %v10950_v43  ;;  %7316 = vmatprep.mubr.msk.bf16.mxu1 %vm12051_vm8, %v5578_v6  ;;  %v5550_v62 = vmax.f32 %v5514_v29, 0.0  ;;  %v12057_v6 = vld [vmem:[#allocation30_spill] sm:$0xff] }
 0x30e   : > { %v5007_v54 = vpop.f32.mrf.mxu1  ;;  %7317 = vmatmul.mubr.msk.bf16.gmra.mxu1 %vm12052_vm9, %v5579_v32 }
 0x30f   : > { %v5553_v9 = vmax.f32 %v5517_v40, 0.0  ;;  %v5515_v30 = vadd.f32 %v11065_v28, %v5472_v38  ;;  %v5102_v53 = vadd.f32 %v5007_v54, %v10956_v7  ;;  %v5477_v17 = vadd.f32 %v11048_v50, %v5104_v60  ;;  %v12058_v38 = vld [vmem:[#allocation15_spill] sm:$0xff] }
 0x310   : > { %v7247_v13 = vpop.f32.mrf.mxu1 }
 0x311   : > { %v5581_v14 = vpack.c.bf16 %v5553_v9, %v5552_v21  ;;  %v5551_v27 = vmax.f32 %v5515_v30, 0.0  ;;  %v5475_v43 = vadd.f32 %v11058_v26, %v5102_v53  ;;  %v5105_v5 = vadd.f32 %v7247_v13, %v10962_v15  ;;  %v5428_v9 = vpop.f32.mrf.mxu0 }
 0x312   : > { %v5010_v61 = vpop.f32.mrf.mxu1  ;;  %v5520_v25 = vadd.f32 %v11065_v28, %v5477_v17 }
 0x313   : > { %v5580_v24 = vpack.c.bf16 %v5551_v27, %v5550_v62  ;;  %v5103_v37 = vadd.f32 %v5010_v61, %v10968_v55  ;;  %v5478_v7 = vadd.f32 %v11069_v20, %v5105_v5  ;;  %v5518_v50 = vadd.f32 %v11065_v28, %v5475_v43  ;;  %v12062_v5 = vld [vmem:[#allocation7_spill] sm:$0xff] }
 0x314   : > { %v7250_v42 = vpop.f32.mrf.mxu1  ;;  %v5556_v20 = vmax.f32 %v5520_v25, 0.0  ;;  %v7299_v25 = vpop.f32.mrf.mxu0 }
 0x315   : > { %v5476_v33 = vadd.f32 %v11078_v1, %v5103_v37  ;;  %v5108_v0 = vadd.f32 %v7250_v42, %v10974_v57  ;;  %7320 = vmatprep.mubr.msk.bf16.mxu1 %vm12053_vm3, %v5580_v24  ;;  %v5521_v15 = vadd.f32 %v11065_v28, %v5478_v7  ;;  %v5554_v1 = vmax.f32 %v5518_v50, 0.0  ;;  %v12056_v57 = vld [vmem:[#allocation6_spill] sm:$0xff] }
 0x316   : > { %v5023_v26 = vpop.f32.mrf.mxu1  ;;  %7321 = vmatmul.mubr.msk.bf16.gmra.mxu1 %vm12055_vm6, %v5581_v14 }
 0x317   : > { %v5519_v48 = vadd.f32 %v11065_v28, %v5476_v33  ;;  %v5481_v55 = vadd.f32 %v11085_v58, %v5108_v0  ;;  %v5106_v18 = vadd.f32 %v5023_v26, %v12054_v35  ;;  %v5557_v46 = vmax.f32 %v5521_v15, 0.0 }
 0x318   : > { %v7251_v32 = vpop.f32.mrf.mxu1 }
 0x319   : > { %v5555_v52 = vmax.f32 %v5519_v48, 0.0  ;;  %v5109_v39 = vadd.f32 %v7251_v32, %v12056_v57  ;;  %v5583_v2 = vpack.c.bf16 %v5557_v46, %v5556_v20  ;;  %v5479_v4 = vadd.f32 %v11096_v56, %v5106_v18 }
 0x31a   : > { %v5026_v59 = vpop.f32.mrf.mxu1  ;;  %v5524_v12 = vadd.f32 %v11065_v28, %v5481_v55  ;;  %v5431_v55 = vpop.f32.mrf.mxu0 }
 0x31b   : > { %v5582_v34 = vpack.c.bf16 %v5555_v52, %v5554_v1  ;;  %v5482_v58 = vadd.f32 %v11103_v16, %v5109_v39  ;;  %v5107_v3 = vadd.f32 %v5026_v59, %v12057_v6  ;;  %v5522_v54 = vadd.f32 %v11065_v28, %v5479_v4  ;;  %v12060_v16 = vld [vmem:[#allocation24_spill] sm:$0xff] }
 0x31c   : > { %v7254_v29 = vpop.f32.mrf.mxu1  ;;  %v5560_v30 = vmax.f32 %v5524_v12, 0.0  ;;  %v7302_v57 = vpop.f32.mrf.mxu0 }
 0x31d   : > { %v5525_v40 = vadd.f32 %v11065_v28, %v5482_v58  ;;  %v5112_v60 = vadd.f32 %v7254_v29, %v12058_v38  ;;  %7324 = vmatprep.mubr.msk.bf16.mxu1 %vm12059_vm12, %v5582_v34  ;;  %v5480_v56 = vadd.f32 %v11114_v44, %v5107_v3  ;;  %v5558_v24 = vmax.f32 %v5522_v54, 0.0 }
 0x31e   : > { %v5039_v21 = vpop.f32.mrf.mxu1  ;;  %7325 = vmatmul.mubr.msk.bf16.gmra.mxu1 %vm12061_vm11, %v5583_v2 }
 0x31f   : > { %v5561_v53 = vmax.f32 %v5525_v40, 0.0  ;;  %v5485_v17 = vadd.f32 %v11121_v36, %v5112_v60  ;;  %v5110_v13 = vadd.f32 %v5039_v21, %v12060_v16  ;;  %v5523_v62 = vadd.f32 %v11065_v28, %v5480_v56 }
 0x320   : > { %v7255_v14 = vpop.f32.mrf.mxu1 }
 0x321   : > { %v5585_v27 = vpack.c.bf16 %v5561_v53, %v5560_v30  ;;  %v5483_v43 = vadd.f32 %v5412_v51, %v5110_v13  ;;  %v5113_v61 = vadd.f32 %v7255_v14, %v12062_v5  ;;  %v5559_v37 = vmax.f32 %v5523_v62, 0.0 }
 0x322   : > { %v5042_v44 = vpop.f32.mrf.mxu1  ;;  %v5528_v7 = vadd.f32 %v11065_v28, %v5485_v17 }
 0x323   : > { %v5486_v42 = vadd.f32 %v7295_v11, %v5113_v61  ;;  %v5111_v36 = vadd.f32 %v5042_v44, %v11016_v41  ;;  %v5584_v50 = vpack.c.bf16 %v5559_v37, %v5558_v24  ;;  %v5526_v0 = vadd.f32 %v11065_v28, %v5483_v43 }
 0x324   : > { %v7258_v33 = vpop.f32.mrf.mxu1  ;;  %v5564_v35 = vmax.f32 %v5528_v7, 0.0 }
 0x325   : > { %v5529_v15 = vadd.f32 %v11065_v28, %v5486_v42  ;;  %v5484_v26 = vadd.f32 %v5415_v22, %v5111_v36  ;;  %v5116_v51 = vadd.f32 %v7258_v33, %v11022_v45  ;;  %7328 = vmatprep.mubr.msk.bf16.mxu1 %vm12063_vm5, %v5584_v50  ;;  %v5562_v32 = vmax.f32 %v5526_v0, 0.0  ;;  %v11196_v42 = vld [vmem:[%s11268_s6] ss:$0 sm:$0xff] }
 0x326   : > { %v5055_v48 = vpop.f32.mrf.mxu1  ;;  %7329 = vmatmul.mubr.msk.bf16.gmra.mxu1 %vm12064_vm14, %v5585_v27 }
 0x327   : > { %v5565_v18 = vmax.f32 %v5529_v15, 0.0  ;;  %v5527_v20 = vadd.f32 %v11065_v28, %v5484_v26  ;;  %v5114_v11 = vadd.f32 %v5055_v48, %v11026_v31  ;;  %v5489_v41 = vadd.f32 %v7298_v63, %v5116_v51  ;;  %v5444_v63 = vpop.f32.mrf.mxu0 }
 0x328   : > { %v7259_v46 = vpop.f32.mrf.mxu1 }
 0x329   : > { %v5587_v1 = vpack.c.bf16 %v5565_v18, %v5564_v35  ;;  %v5563_v52 = vmax.f32 %v5527_v20, 0.0  ;;  %v5487_v22 = vadd.f32 %v5428_v9, %v5114_v11  ;;  %v5117_v45 = vadd.f32 %v7259_v46, %v11032_v47  ;;  %v7303_v9 = vpop.f32.mrf.mxu0 }
 0x32a   : > { %v5058_v39 = vpop.f32.mrf.mxu1  ;;  %v5532_v59 = vadd.f32 %v11065_v28, %v5489_v41 }
 0x32b   : > { %v5586_v2 = vpack.c.bf16 %v5563_v52, %v5562_v32  ;;  %v5115_v4 = vadd.f32 %v5058_v39, %v11036_v10  ;;  %v5490_v34 = vadd.f32 %v7299_v25, %v5117_v45  ;;  %v5530_v31 = vadd.f32 %v11065_v28, %v5487_v22 }
 0x32c   : > { %v7262_v12 = vpop.f32.mrf.mxu1  ;;  %v5568_v38 = vmax.f32 %v5532_v59, 0.0 }
 0x32d   : > { %v5488_v58 = vadd.f32 %v5431_v55, %v5115_v4  ;;  %v5120_v6 = vadd.f32 %v7262_v12, %v11042_v49  ;;  %7332 = vmatprep.mubr.msk.bf16.mxu1 %vm11861_vm0, %v5586_v2  ;;  %v5533_v3 = vadd.f32 %v11065_v28, %v5490_v34  ;;  %v5566_v56 = vmax.f32 %v5530_v31, 0.0 }
 0x32e   : > { %v5071_v29 = vpop.f32.mrf.mxu1  ;;  %7333 = vmatmul.mubr.msk.bf16.gmra.mxu1 %vm12065_vm10, %v5587_v1 }
 0x32f   : > { %v5531_v47 = vadd.f32 %v11065_v28, %v5488_v58  ;;  %v5493_v40 = vadd.f32 %v7302_v57, %v5120_v6  ;;  %v5118_v10 = vadd.f32 %v5071_v29, %v11046_v19  ;;  %v5569_v60 = vmax.f32 %v5533_v3, 0.0  ;;  %v5447_v19 = vpop.f32.mrf.mxu0 }
 0x330   : > { %v7263_v54 = vpop.f32.mrf.mxu1 }
 0x331   : > { %v5567_v21 = vmax.f32 %v5531_v47, 0.0  ;;  %v5121_v49 = vadd.f32 %v7263_v54, %v11052_v23  ;;  %v5589_v30 = vpack.c.bf16 %v5569_v60, %v5568_v38  ;;  %v5491_v53 = vadd.f32 %v5444_v63, %v5118_v10 }
 0x332   : > { %v5074_v17 = vpop.f32.mrf.mxu1  ;;  %v5536_v13 = vadd.f32 %v11065_v28, %v5493_v40 }
 0x333   : > { %v5588_v16 = vpack.c.bf16 %v5567_v21, %v5566_v56  ;;  %v5494_v62 = vadd.f32 %v7303_v9, %v5121_v49  ;;  %v5119_v14 = vadd.f32 %v5074_v17, %v11056_v8  ;;  %v5534_v43 = vadd.f32 %v11065_v28, %v5491_v53 }
 0x334   : > { %v5572_v61 = vmax.f32 %v5536_v13, 0.0 }
 0x335   : > { %v5537_v27 = vadd.f32 %v11065_v28, %v5494_v62  ;;  %7336 = vmatprep.mubr.msk.bf16.mxu1 %vm12066_vm4, %v5588_v16  ;;  %v5492_v5 = vadd.f32 %v5447_v19, %v5119_v14  ;;  %v5570_v44 = vmax.f32 %v5534_v43, 0.0 }
 0x336   : > { %7337 = vmatmul.mubr.msk.bf16.gmra.mxu1 %vm12067_vm7, %v5589_v30 }
 0x337   : > { %v5573_v23 = vmax.f32 %v5537_v27, 0.0  ;;  %v5535_v24 = vadd.f32 %v11065_v28, %v5492_v5 }
 0x339   : > { %v5591_v37 = vpack.c.bf16 %v5573_v23, %v5572_v61  ;;  %v5571_v25 = vmax.f32 %v5535_v24, 0.0 }
 0x33b   : > { %v5590_v7 = vpack.c.bf16 %v5571_v25, %v5570_v44 }
 0x33d   : > { %7340 = vmatprep.mubr.msk.bf16.mxu1 %vm12068_vm2, %v5590_v7 }
 0x33e   : > { %7341 = vmatmul.mubr.msk.bf16.gmra.mxu1 %vm12069_vm15, %v5591_v37 }
 0x3be   : > { %v7310_v8 = vpop.f32.mrf.mxu1 }
 0x3bf   : > { %v5712_v33 = vadd.f32 %v7310_v8, %v11196_v42 }
 0x3c0   : > { %v5703_v36 = vpop.f32.mrf.mxu1 }
 0x3c1   : > { %v5704_v15 = vadd.f32 %v11196_v42, %v5703_v36 }
 0x3c2   : > { %v7311_v50 = vpop.f32.mrf.mxu1 }
 0x3c3   : > { %v5715_v28 = vadd.f32 %v7311_v50, %v11196_v42 }
 0x3c4   : > { %v5706_v0 = vpop.f32.mrf.mxu1 }
 0x3c5   : > { %v6582_v26 = vpack.c.bf16 %v5715_v28, %v5712_v33  ;;  %v5707_v51 = vadd.f32 %v11196_v42, %v5706_v0 }
 0x3c6   : > { %v7314_v48 = vpop.f32.mrf.mxu1 }
 0x3c7   : > { %6664 = vst [vmem:[%s11205_s27 + $0x8] sm:$0xff] %v6582_v26   ;;  %v6577_v55 = vpack.c.bf16 %v5707_v51, %v5704_v15  ;;  %v5728_v20 = vadd.f32 %v7314_v48, %v11196_v42 }
 0x3c8   : > { %v5719_v35 = vpop.f32.mrf.mxu1 }
 0x3c9   : > { %6578 = vst [vmem:[%s11205_s27] sm:$0xff] %v6577_v55   ;;  %v5720_v46 = vadd.f32 %v11196_v42, %v5719_v35 }
 0x3ca   : > { %v7315_v18 = vpop.f32.mrf.mxu1 }
 0x3cb   : > { %v5731_v11 = vadd.f32 %v7315_v18, %v11196_v42 }
 0x3cc   : > { %v5722_v41 = vpop.f32.mrf.mxu1 }
 0x3cd   : > { %v6592_v32 = vpack.c.bf16 %v5731_v11, %v5728_v20  ;;  %v5723_v1 = vadd.f32 %v11196_v42, %v5722_v41 }
 0x3ce   : > { %v7318_v22 = vpop.f32.mrf.mxu1 }
 0x3cf   : > { %6666 = vst [vmem:[%s11205_s27 + $0x18] sm:$0xff] %v6592_v32   ;;  %v6587_v52 = vpack.c.bf16 %v5723_v1, %v5720_v46  ;;  %v5744_v39 = vadd.f32 %v7318_v22, %v11196_v42 }
 0x3d0   : > { %v5735_v57 = vpop.f32.mrf.mxu1 }
 0x3d1   : > { %6665 = vst [vmem:[%s11205_s27 + $0x10] sm:$0xff] %v6587_v52   ;;  %v5736_v59 = vadd.f32 %v11196_v42, %v5735_v57 }
 0x3d2   : > { %v7319_v45 = vpop.f32.mrf.mxu1 }
 0x3d3   : > { %v5747_v2 = vadd.f32 %v7319_v45, %v11196_v42 }
 0x3d4   : > { %v5738_v4 = vpop.f32.mrf.mxu1 }
 0x3d5   : > { %v6602_v34 = vpack.c.bf16 %v5747_v2, %v5744_v39  ;;  %v5739_v12 = vadd.f32 %v11196_v42, %v5738_v4 }
 0x3d6   : > { %v7322_v31 = vpop.f32.mrf.mxu1 }
 0x3d7   : > { %6668 = vst [vmem:[%s11205_s27 + $0x28] sm:$0xff] %v6602_v34   ;;  %v6597_v58 = vpack.c.bf16 %v5739_v12, %v5736_v59  ;;  %v5760_v3 = vadd.f32 %v7322_v31, %v11196_v42 }
 0x3d8   : > { %v5751_v63 = vpop.f32.mrf.mxu1 }
 0x3d9   : > { %6667 = vst [vmem:[%s11205_s27 + $0x20] sm:$0xff] %v6597_v58   ;;  %v5752_v40 = vadd.f32 %v11196_v42, %v5751_v63 }
 0x3da   : > { %v7323_v6 = vpop.f32.mrf.mxu1 }
 0x3db   : > { %v5763_v29 = vadd.f32 %v7323_v6, %v11196_v42 }
 0x3dc   : > { %v5754_v47 = vpop.f32.mrf.mxu1 }
 0x3dd   : > { %v6612_v10 = vpack.c.bf16 %v5763_v29, %v5760_v3  ;;  %v5755_v38 = vadd.f32 %v11196_v42, %v5754_v47 }
 0x3de   : > { %v7326_v60 = vpop.f32.mrf.mxu1 }
 0x3df   : > { %6670 = vst [vmem:[%s11205_s27 + $0x38] sm:$0xff] %v6612_v10   ;;  %v6607_v54 = vpack.c.bf16 %v5755_v38, %v5752_v40  ;;  %v5776_v9 = vadd.f32 %v7326_v60, %v11196_v42 }
 0x3e0   : > { %v5767_v56 = vpop.f32.mrf.mxu1 }
 0x3e1   : > { %6669 = vst [vmem:[%s11205_s27 + $0x30] sm:$0xff] %v6607_v54   ;;  %v5768_v53 = vadd.f32 %v11196_v42, %v5767_v56 }
 0x3e2   : > { %v7327_v21 = vpop.f32.mrf.mxu1 }
 0x3e3   : > { %v5779_v49 = vadd.f32 %v7327_v21, %v11196_v42 }
 0x3e4   : > { %v5770_v30 = vpop.f32.mrf.mxu1 }
 0x3e5   : > { %v6622_v17 = vpack.c.bf16 %v5779_v49, %v5776_v9  ;;  %v5771_v16 = vadd.f32 %v11196_v42, %v5770_v30 }
 0x3e6   : > { %v7330_v13 = vpop.f32.mrf.mxu1 }
 0x3e7   : > { %6672 = vst [vmem:[%s11205_s27 + $0x48] sm:$0xff] %v6622_v17   ;;  %v6617_v62 = vpack.c.bf16 %v5771_v16, %v5768_v53  ;;  %v5792_v27 = vadd.f32 %v7330_v13, %v11196_v42 }
 0x3e8   : > { %v5783_v14 = vpop.f32.mrf.mxu1 }
 0x3e9   : > { %6671 = vst [vmem:[%s11205_s27 + $0x40] sm:$0xff] %v6617_v62   ;;  %v5784_v61 = vadd.f32 %v11196_v42, %v5783_v14 }
 0x3ea   : > { %v7331_v19 = vpop.f32.mrf.mxu1 }
 0x3eb   : > { %v5795_v43 = vadd.f32 %v7331_v19, %v11196_v42 }
 0x3ec   : > { %v5786_v5 = vpop.f32.mrf.mxu1 }
 0x3ed   : > { %v6632_v23 = vpack.c.bf16 %v5795_v43, %v5792_v27  ;;  %v5787_v24 = vadd.f32 %v11196_v42, %v5786_v5 }
 0x3ee   : > { %v7334_v37 = vpop.f32.mrf.mxu1 }
 0x3ef   : > { %6674 = vst [vmem:[%s11205_s27 + $0x58] sm:$0xff] %v6632_v23   ;;  %v6627_v44 = vpack.c.bf16 %v5787_v24, %v5784_v61  ;;  %v5808_v8 = vadd.f32 %v7334_v37, %v11196_v42 }
 0x3f0   : > { %v5799_v25 = vpop.f32.mrf.mxu1 }
 0x3f1   : > { %6673 = vst [vmem:[%s11205_s27 + $0x50] sm:$0xff] %v6627_v44   ;;  %v5800_v33 = vadd.f32 %v11196_v42, %v5799_v25 }
 0x3f2   : > { %v7335_v7 = vpop.f32.mrf.mxu1 }
 0x3f3   : > { %v5811_v36 = vadd.f32 %v7335_v7, %v11196_v42 }
 0x3f4   : > { %v5802_v50 = vpop.f32.mrf.mxu1 }
 0x3f5   : > { %v6642_v28 = vpack.c.bf16 %v5811_v36, %v5808_v8  ;;  %v5803_v0 = vadd.f32 %v11196_v42, %v5802_v50 }
 0x3f6   : > { %v7338_v15 = vpop.f32.mrf.mxu1 }
 0x3f7   : > { %6676 = vst [vmem:[%s11205_s27 + $0x68] sm:$0xff] %v6642_v28   ;;  %v6637_v26 = vpack.c.bf16 %v5803_v0, %v5800_v33  ;;  %v5824_v55 = vadd.f32 %v7338_v15, %v11196_v42 }
 0x3f8   : > { %v5815_v51 = vpop.f32.mrf.mxu1 }
 0x3f9   : > { %6675 = vst [vmem:[%s11205_s27 + $0x60] sm:$0xff] %v6637_v26   ;;  %v5816_v20 = vadd.f32 %v11196_v42, %v5815_v51 }
 0x3fa   : > { %v7339_v48 = vpop.f32.mrf.mxu1 }
 0x3fb   : > { %v5827_v35 = vadd.f32 %v7339_v48, %v11196_v42 }
 0x3fc   : > { %v5818_v18 = vpop.f32.mrf.mxu1 }
 0x3fd   : > { %v6652_v11 = vpack.c.bf16 %v5827_v35, %v5824_v55  ;;  %v5819_v41 = vadd.f32 %v11196_v42, %v5818_v18 }
 0x3fe   : > { %v7342_v46 = vpop.f32.mrf.mxu1 }
 0x3ff   : > { %6678 = vst [vmem:[%s11205_s27 + $0x78] sm:$0xff] %v6652_v11   ;;  %v6647_v32 = vpack.c.bf16 %v5819_v41, %v5816_v20  ;;  %v5840_v22 = vadd.f32 %v7342_v46, %v11196_v42 }
 0x400   : > { %v5831_v1 = vpop.f32.mrf.mxu1 }
 0x401   : > { %6677 = vst [vmem:[%s11205_s27 + $0x70] sm:$0xff] %v6647_v32   ;;  %v5832_v39 = vadd.f32 %v11196_v42, %v5831_v1 }
 0x402   : > { %v7343_v52 = vpop.f32.mrf.mxu1 }
 0x403   : > { %v5843_v57 = vadd.f32 %v7343_v52, %v11196_v42 }
 0x404   : > { %v5834_v45 = vpop.f32.mrf.mxu1 }
 0x405   : > { %v6662_v2 = vpack.c.bf16 %v5843_v57, %v5840_v22  ;;  %v5835_v4 = vadd.f32 %v11196_v42, %v5834_v45 }
 0x407   : > { %6680 = vst [vmem:[%s11205_s27 + $0x88] sm:$0xff] %v6662_v2   ;;  %v6657_v59 = vpack.c.bf16 %v5835_v4, %v5832_v39 }
 0x409   : > { %6679 = vst [vmem:[%s11205_s27 + $0x80] sm:$0xff] %v6657_v59  }
 0x40a PF: > { %s17_s24 = sadd.s32 1, %s7582_s24  }
 0x40b   : > { %p14_p4 = scmp.ge.s32.totalorder %s17_s24, 4  }
 0x40d   :  { %16 = sbr.rel (!%p14_p4) target bundleno = 1 (0x1), region = 78 }

</bundles_post_ra>
